<compile_context>
chip_gen: v5e
topology: v5e:2x2
jax: 0.10.0
libtpu: 0.0.40
codegen_flags: <defaults>
</compile_context>

<pallas_src>
import numpy as np
import jax
import jax.numpy as jnp
from jax.experimental import pallas as pl
from jax.experimental.pallas import tpu as pltpu

# ---- hyperparameters consistent with the module's forward (small shapes) ----
VOCAB    = 32
EMBED    = 32
HEADS    = 4
FF       = 64
LAYERS   = 2
MAX_SEQ  = 16
BATCH    = 8
SEQ      = 8
HEAD_DIM = EMBED // HEADS
M_ROWS   = BATCH * SEQ                     # 64 activation rows, one program
OUT_PAD  = 128                             # lane-dense padded output width
EPS      = 1e-5
SCALE    = 1.0 / float(HEAD_DIM) ** 0.5

# packed-slab geometry
PROJ_W   = 2 * EMBED + HEADS * EMBED       # 192: [Q*scale | K | V@Wo per head]
LAYER_W  = PROJ_W + FF                     # 256: per-layer chunk of w_e slab
WE_W     = LAYERS * LAYER_W + FF           # 576: w_e slab width
WFF_W    = LAYERS * EMBED + OUT_PAD        # 192: w_ff slab width
VEC_W    = PROJ_W                          # 192: bias/LN table width
VROWS    = 8 * LAYERS + 4                  # 20 rows in the bias/LN table


# ----------------------------- kernel helpers ------------------------------
def _layernorm(x, w, b):
    mu = jnp.mean(x, axis=-1, keepdims=True)
    var = jnp.mean((x - mu) ** 2, axis=-1, keepdims=True)
    return (x - mu) * jax.lax.rsqrt(var + EPS) * w + b


# ------------------------------- the kernel --------------------------------
def predictor_kernel(x_ref, w_e_ref, w_ff_ref, vec_ref, out_ref):
    def vrow(r, w):                        # (1, w) f32 row of the packed table
        return vec_ref[r:r + 1, 0:w]

    def bf16(a):
        return a.astype(jnp.bfloat16)

    x2 = x_ref[...]                        # (M_ROWS, E) f32; embed+pos fused

    for l in range(LAYERS):                # static unroll over layers
        col = l * LAYER_W
        vb = 8 * l

        # fused [Q*scale | K | V_h @ Wo_h per head] projection, bf16 MXU feed
        proj = jnp.dot(bf16(x2), w_e_ref[:, col:col + PROJ_W],
                       preferred_element_type=jnp.float32) + vrow(vb + 0, PROJ_W)
        q3 = proj[:, :EMBED].reshape(BATCH, SEQ, EMBED)
        k3 = proj[:, EMBED:2 * EMBED].reshape(BATCH, SEQ, EMBED)
        vo3 = proj[:, 2 * EMBED:].reshape(BATCH, SEQ, HEADS * EMBED)

        # ---- multi-head self-attention (eval mode, no dropout) ----
        attn = jnp.zeros((BATCH, SEQ, EMBED), jnp.float32)
        for h in range(HEADS):             # static unroll over heads
            hd = slice(h * HEAD_DIM, (h + 1) * HEAD_DIM)
            he = slice(h * EMBED, (h + 1) * EMBED)
            s = jnp.einsum('bqd,bkd->bqk', bf16(q3[..., hd]), bf16(k3[..., hd]),
                           preferred_element_type=jnp.float32)
            s = s - jnp.max(s, axis=-1, keepdims=True)
            p = jnp.exp(s)
            p = p * pl.reciprocal(jnp.sum(p, axis=-1, keepdims=True),
                                  approx=True)
            attn = attn + jnp.einsum('bqk,bke->bqe', bf16(p), bf16(vo3[..., he]),
                                     preferred_element_type=jnp.float32)
        attn = attn.reshape(M_ROWS, EMBED) + vrow(vb + 1, EMBED)   # + out bias

        x2 = _layernorm(x2 + attn, vrow(vb + 2, EMBED), vrow(vb + 3, EMBED))

        # ---- feed-forward ----
        hdn = jnp.maximum(
            jnp.dot(bf16(x2), w_e_ref[:, col + PROJ_W:col + LAYER_W],
                    preferred_element_type=jnp.float32) + vrow(vb + 4, FF), 0.0)
        ffo = jnp.dot(bf16(hdn), w_ff_ref[:, l * EMBED:(l + 1) * EMBED],
                      preferred_element_type=jnp.float32) + vrow(vb + 5, EMBED)
        x2 = _layernorm(x2 + ffo, vrow(vb + 6, EMBED), vrow(vb + 7, EMBED))

    # final LayerNorm + AdaptiveMaxPool1d(1) over the sequence axis
    x2 = _layernorm(x2, vrow(8 * LAYERS, EMBED), vrow(8 * LAYERS + 1, EMBED))
    pooled = jnp.max(x2.reshape(BATCH, SEQ, EMBED), axis=1)        # (B, E)

    # MLP head: Linear(E, FF) -> ReLU -> Linear(FF, 1) padded to 128 lanes
    hid = jnp.maximum(
        jnp.dot(bf16(pooled), w_e_ref[:, LAYERS * LAYER_W:],
                preferred_element_type=jnp.float32)
        + vrow(8 * LAYERS + 2, FF), 0.0)
    out = jnp.dot(bf16(hid), w_ff_ref[:, LAYERS * EMBED:],
                  preferred_element_type=jnp.float32) + vrow(8 * LAYERS + 3,
                                                             OUT_PAD)
    out_ref[...] = out                                             # (B, 128)


# ------------------------------ parameters ---------------------------------
def build_params(key):
    keys = iter(jax.random.split(key, 64))

    def nrm(shape, scale=0.05):
        return scale * jax.random.normal(next(keys), shape, dtype=jnp.float32)

    p = {
        'embed_table': nrm((VOCAB, EMBED), 1.0),
        'pos': nrm((MAX_SEQ, EMBED), 0.02),
        'in_proj_w': [], 'in_proj_b': [], 'out_w': [], 'out_b': [],
        'n1w': [], 'n1b': [], 'ff1_w': [], 'ff1_b': [],
        'ff2_w': [], 'ff2_b': [], 'n2w': [], 'n2b': [],
    }
    for _ in range(LAYERS):
        p['in_proj_w'].append(nrm((3 * EMBED, EMBED)))
        p['in_proj_b'].append(nrm((3 * EMBED,), 0.02))
        p['out_w'].append(nrm((EMBED, EMBED)))
        p['out_b'].append(nrm((EMBED,), 0.02))
        p['n1w'].append(jnp.ones((EMBED,), jnp.float32))
        p['n1b'].append(jnp.zeros((EMBED,), jnp.float32))
        p['ff1_w'].append(nrm((FF, EMBED)))
        p['ff1_b'].append(nrm((FF,), 0.02))
        p['ff2_w'].append(nrm((EMBED, FF)))
        p['ff2_b'].append(nrm((EMBED,), 0.02))
        p['n2w'].append(jnp.ones((EMBED,), jnp.float32))
        p['n2b'].append(jnp.zeros((EMBED,), jnp.float32))
    p['fn_w'] = jnp.ones((EMBED,), jnp.float32)
    p['fn_b'] = jnp.zeros((EMBED,), jnp.float32)
    p['mlp1_w'] = nrm((FF, EMBED))
    p['mlp1_b'] = nrm((FF,), 0.02)
    p['mlp2_w'] = nrm((1, FF))
    p['mlp2_b'] = nrm((1,), 0.02)
    return p


def to_kernel_inputs(p):
    """Pack all weights into 3 lane-dense slabs (bf16 matmul weights, f32 vecs)."""
    def pad_row(v):
        return jnp.zeros((VEC_W,), jnp.float32).at[:v.shape[0]].set(v)

    we_cols, vec_rows = [], []
    for l in range(LAYERS):
        W3, b3 = p['in_proj_w'][l], p['in_proj_b'][l]
        Wq, Wk, Wv = W3[:EMBED], W3[EMBED:2 * EMBED], W3[2 * EMBED:]
        bq, bk, bv = b3[:EMBED], b3[EMBED:2 * EMBED], b3[2 * EMBED:]
        Wo = p['out_w'][l]                                 # (E, E)

        # [Q*scale | K | V_h @ Wo_h per head]  (scale + Wo folded offline)
        cols = [Wq.T * SCALE, Wk.T]
        bias = [bq * SCALE, bk]
        for h in range(HEADS):
            sl = slice(h * HEAD_DIM, (h + 1) * HEAD_DIM)
            Wo_hT = Wo[:, sl].T                            # (D, E)
            cols.append(Wv[sl].T @ Wo_hT)                  # (E, E)
            bias.append(bv[sl] @ Wo_hT)                    # (E,)
        proj_w = jnp.concatenate(cols, axis=1)             # (E, 192)
        proj_b = jnp.concatenate(bias)                     # (192,)

        we_cols += [proj_w, p['ff1_w'][l].T]               # + (E, FF)
        vec_rows += [proj_b,
                     pad_row(p['out_b'][l]),
                     pad_row(p['n1w'][l]), pad_row(p['n1b'][l]),
                     pad_row(p['ff1_b'][l]),
                     pad_row(p['ff2_b'][l]),
                     pad_row(p['n2w'][l]), pad_row(p['n2b'][l])]

    we_cols.append(p['mlp1_w'].T)                          # (E, FF)
    w_e = jnp.concatenate(we_cols, axis=1).astype(jnp.bfloat16)     # (E, 576)

    m2w_pad = jnp.zeros((FF, OUT_PAD), jnp.float32).at[:, 0].set(p['mlp2_w'][0])
    w_ff = jnp.concatenate([p['ff2_w'][l].T for l in range(LAYERS)]
                           + [m2w_pad], axis=1).astype(jnp.bfloat16)  # (FF, 192)

    vec_rows += [pad_row(p['fn_w']), pad_row(p['fn_b']),
                 pad_row(p['mlp1_b']),
                 pad_row(jnp.full((OUT_PAD,), p['mlp2_b'][0]))]
    vecs = jnp.stack(vec_rows, axis=0)                     # (20, 192) f32
    assert vecs.shape == (VROWS, VEC_W)
    assert w_e.shape == (EMBED, WE_W) and w_ff.shape == (FF, WFF_W)
    return w_e, w_ff, vecs


# ------------------------------ pallas wrapper ------------------------------
def run_kernel(x_in, w_e, w_ff, vecs):
    vmem = lambda: pl.BlockSpec(memory_space=pltpu.MemorySpace.VMEM)
    return pl.pallas_call(
        predictor_kernel,
        out_shape=jax.ShapeDtypeStruct((BATCH, OUT_PAD), jnp.float32),
        in_specs=[vmem(), vmem(), vmem(), vmem()],
        out_specs=vmem(),
    )(x_in, w_e, w_ff, vecs)


# --------------------------- pure-JAX reference -----------------------------
def reference_forward(p, tokens):
    def ln(x, w, b):
        mu = jnp.mean(x, axis=-1, keepdims=True)
        var = jnp.mean((x - mu) ** 2, axis=-1, keepdims=True)
        return (x - mu) / jnp.sqrt(var + EPS) * w + b

    x = p['embed_table'][tokens] + p['pos'][None, :SEQ, :]
    for l in range(LAYERS):
        wqkv, bqkv = p['in_proj_w'][l], p['in_proj_b'][l]
        q = (x @ wqkv[:EMBED].T + bqkv[:EMBED]) * SCALE
        k = x @ wqkv[EMBED:2 * EMBED].T + bqkv[EMBED:2 * EMBED]
        v = x @ wqkv[2 * EMBED:].T + bqkv[2 * EMBED:]
        qh = q.reshape(BATCH, SEQ, HEADS, HEAD_DIM)
        kh = k.reshape(BATCH, SEQ, HEADS, HEAD_DIM)
        vh = v.reshape(BATCH, SEQ, HEADS, HEAD_DIM)
        s = jnp.einsum('bqhd,bkhd->bhqk', qh, kh)
        pa = jax.nn.softmax(s, axis=-1)
        o = jnp.einsum('bhqk,bkhd->bqhd', pa, vh).reshape(BATCH, SEQ, EMBED)
        o = o @ p['out_w'][l].T + p['out_b'][l]
        x = ln(x + o, p['n1w'][l], p['n1b'][l])
        hdn = jax.nn.relu(x @ p['ff1_w'][l].T + p['ff1_b'][l])
        ffo = hdn @ p['ff2_w'][l].T + p['ff2_b'][l]
        x = ln(x + ffo, p['n2w'][l], p['n2b'][l])
    x = ln(x, p['fn_w'], p['fn_b'])
    pooled = jnp.max(x, axis=1)
    h = jax.nn.relu(pooled @ p['mlp1_w'].T + p['mlp1_b'])
    return h @ p['mlp2_w'].T + p['mlp2_b']


# ----------------------------------- main -----------------------------------
if __name__ == "__main__":
    key = jax.random.PRNGKey(0)
    pkey, tkey = jax.random.split(key)
    params = build_params(pkey)
    tokens = jax.random.randint(tkey, (BATCH, SEQ), 0, VOCAB)   # SMILES ids

    # JAX-side glue: embedding gather + positional encoding fused into one
    # flat (B*S, E) activation slab (data-dependent gather stays outside).
    x_in = (params['embed_table'][tokens]
            + params['pos'][None, :SEQ, :]).reshape(M_ROWS, EMBED)

    w_e, w_ff, vecs = to_kernel_inputs(params)
    out_padded = jax.block_until_ready(run_kernel(x_in, w_e, w_ff, vecs))
    out = out_padded[:, :1]                                     # (B, 1)

    ref = reference_forward(params, tokens)
    assert out.shape == (BATCH, 1)
    # tolerance covers the bf16 MXU feed (f32 accumulation) and the EUP
    # approximate reciprocal in softmax; structural errors would be >> this.
    np.testing.assert_allclose(np.asarray(out), np.asarray(ref),
                               rtol=2e-2, atol=2e-2)
    print("KERNEL_OK")
</pallas_src>

<mosaic_0001>
module attributes {stable_mosaic.version = 11 : i64} {
  func.func @predictor_kernel(%arg0: memref<64x32xf32, #tpu.memory_space<vmem>>, %arg1: memref<32x576xbf16, #tpu.memory_space<vmem>>, %arg2: memref<64x192xbf16, #tpu.memory_space<vmem>>, %arg3: memref<20x192xf32, #tpu.memory_space<vmem>>, %arg4: memref<8x128xf32, #tpu.memory_space<vmem>>) attributes {dimension_semantics = [], scalar_prefetch = 0 : i64, scratch_operands = 0 : i64, tpu.core_type = #tpu.core_type<tc>} {
    %c0 = arith.constant 0 : index
    %c0_0 = arith.constant 0 : index
    %0 = vector.load %arg0[%c0, %c0_0] : memref<64x32xf32, #tpu.memory_space<vmem>>, vector<64x32xf32>
    %1 = arith.truncf %0 : vector<64x32xf32> to vector<64x32xbf16>
    %c0_1 = arith.constant 0 : index
    %c0_2 = arith.constant 0 : index
    %2 = vector.load %arg1[%c0_1, %c0_2] : memref<32x576xbf16, #tpu.memory_space<vmem>>, vector<32x192xbf16>
    %cst = arith.constant dense<0.000000e+00> : vector<64x192xf32>
    %3 = tpu.matmul %1, %2, %cst {dimension_numbers = #tpu.dot_dimension_numbers<[1], [0], [0], [1], [0, 0, 1, 1], [], []>} : vector<64x32xbf16>, vector<32x192xbf16>, vector<64x192xf32> -> vector<64x192xf32>
    %c0_3 = arith.constant 0 : index
    %c0_4 = arith.constant 0 : index
    %4 = vector.load %arg3[%c0_3, %c0_4] : memref<20x192xf32, #tpu.memory_space<vmem>>, vector<1x192xf32>
    %5 = vector.broadcast %4 : vector<1x192xf32> to vector<64x192xf32>
    %6 = arith.addf %3, %5 : vector<64x192xf32>
    %7 = vector.extract_strided_slice %6 {offsets = [0, 0], sizes = [64, 32], strides = [1, 1]} : vector<64x192xf32> to vector<64x32xf32>
    %8 = vector.shape_cast %7 : vector<64x32xf32> to vector<8x8x32xf32>
    %9 = vector.extract_strided_slice %6 {offsets = [0, 32], sizes = [64, 32], strides = [1, 1]} : vector<64x192xf32> to vector<64x32xf32>
    %10 = vector.shape_cast %9 : vector<64x32xf32> to vector<8x8x32xf32>
    %11 = vector.extract_strided_slice %6 {offsets = [0, 64], sizes = [64, 128], strides = [1, 1]} : vector<64x192xf32> to vector<64x128xf32>
    %12 = vector.shape_cast %11 : vector<64x128xf32> to vector<8x8x128xf32>
    %cst_5 = arith.constant 0.000000e+00 : f32
    %13 = vector.broadcast %cst_5 : f32 to vector<8x8x32xf32>
    %14 = vector.extract_strided_slice %8 {offsets = [0, 0, 0], sizes = [8, 8, 8], strides = [1, 1, 1]} : vector<8x8x32xf32> to vector<8x8x8xf32>
    %15 = arith.truncf %14 : vector<8x8x8xf32> to vector<8x8x8xbf16>
    %16 = vector.extract_strided_slice %10 {offsets = [0, 0, 0], sizes = [8, 8, 8], strides = [1, 1, 1]} : vector<8x8x32xf32> to vector<8x8x8xf32>
    %17 = arith.truncf %16 : vector<8x8x8xf32> to vector<8x8x8xbf16>
    "tpu.trace_start"() <{level = 10 : i32, message = "bqd,bkd->bqk"}> : () -> ()
    %cst_6 = arith.constant dense<0.000000e+00> : vector<8x8x8xf32>
    %18 = tpu.matmul %15, %17, %cst_6 {dimension_numbers = #tpu.dot_dimension_numbers<[2], [2], [1], [1], [0, 0, 0, 1, 1, 1], [0], [0]>} : vector<8x8x8xbf16>, vector<8x8x8xbf16>, vector<8x8x8xf32> -> vector<8x8x8xf32>
    "tpu.trace_stop"() : () -> ()
    %cst_7 = arith.constant dense<0xFF800000> : vector<8x8xf32>
    %19 = vector.multi_reduction <maximumf>, %18, %cst_7 [2] : vector<8x8x8xf32> to vector<8x8xf32>
    %20 = vector.shape_cast %19 : vector<8x8xf32> to vector<8x8x1xf32>
    %21 = vector.broadcast %20 : vector<8x8x1xf32> to vector<8x8x8xf32>
    %22 = arith.subf %18, %21 : vector<8x8x8xf32>
    %23 = math.exp %22 : vector<8x8x8xf32>
    %cst_8 = arith.constant dense<0.000000e+00> : vector<8x8xf32>
    %24 = vector.multi_reduction <add>, %23, %cst_8 [2] : vector<8x8x8xf32> to vector<8x8xf32>
    %25 = vector.shape_cast %24 : vector<8x8xf32> to vector<8x8x1xf32>
    %26 = tpu.reciprocal %25 {approx = true} : vector<8x8x1xf32> -> vector<8x8x1xf32>
    %27 = vector.broadcast %26 : vector<8x8x1xf32> to vector<8x8x8xf32>
    %28 = arith.mulf %23, %27 : vector<8x8x8xf32>
    %29 = arith.truncf %28 : vector<8x8x8xf32> to vector<8x8x8xbf16>
    %30 = vector.extract_strided_slice %12 {offsets = [0, 0, 0], sizes = [8, 8, 32], strides = [1, 1, 1]} : vector<8x8x128xf32> to vector<8x8x32xf32>
    %31 = arith.truncf %30 : vector<8x8x32xf32> to vector<8x8x32xbf16>
    "tpu.trace_start"() <{level = 10 : i32, message = "bqk,bke->bqe"}> : () -> ()
    %cst_9 = arith.constant dense<0.000000e+00> : vector<8x8x32xf32>
    %32 = tpu.matmul %29, %31, %cst_9 {dimension_numbers = #tpu.dot_dimension_numbers<[2], [1], [1], [2], [0, 0, 0, 1, 1, 2], [0], [0]>} : vector<8x8x8xbf16>, vector<8x8x32xbf16>, vector<8x8x32xf32> -> vector<8x8x32xf32>
    "tpu.trace_stop"() : () -> ()
    %33 = arith.addf %13, %32 : vector<8x8x32xf32>
    %34 = vector.extract_strided_slice %8 {offsets = [0, 0, 8], sizes = [8, 8, 8], strides = [1, 1, 1]} : vector<8x8x32xf32> to vector<8x8x8xf32>
    %35 = arith.truncf %34 : vector<8x8x8xf32> to vector<8x8x8xbf16>
    %36 = vector.extract_strided_slice %10 {offsets = [0, 0, 8], sizes = [8, 8, 8], strides = [1, 1, 1]} : vector<8x8x32xf32> to vector<8x8x8xf32>
    %37 = arith.truncf %36 : vector<8x8x8xf32> to vector<8x8x8xbf16>
    "tpu.trace_start"() <{level = 10 : i32, message = "bqd,bkd->bqk"}> : () -> ()
    %cst_10 = arith.constant dense<0.000000e+00> : vector<8x8x8xf32>
    %38 = tpu.matmul %35, %37, %cst_10 {dimension_numbers = #tpu.dot_dimension_numbers<[2], [2], [1], [1], [0, 0, 0, 1, 1, 1], [0], [0]>} : vector<8x8x8xbf16>, vector<8x8x8xbf16>, vector<8x8x8xf32> -> vector<8x8x8xf32>
    "tpu.trace_stop"() : () -> ()
    %cst_11 = arith.constant dense<0xFF800000> : vector<8x8xf32>
    %39 = vector.multi_reduction <maximumf>, %38, %cst_11 [2] : vector<8x8x8xf32> to vector<8x8xf32>
    %40 = vector.shape_cast %39 : vector<8x8xf32> to vector<8x8x1xf32>
    %41 = vector.broadcast %40 : vector<8x8x1xf32> to vector<8x8x8xf32>
    %42 = arith.subf %38, %41 : vector<8x8x8xf32>
    %43 = math.exp %42 : vector<8x8x8xf32>
    %cst_12 = arith.constant dense<0.000000e+00> : vector<8x8xf32>
    %44 = vector.multi_reduction <add>, %43, %cst_12 [2] : vector<8x8x8xf32> to vector<8x8xf32>
    %45 = vector.shape_cast %44 : vector<8x8xf32> to vector<8x8x1xf32>
    %46 = tpu.reciprocal %45 {approx = true} : vector<8x8x1xf32> -> vector<8x8x1xf32>
    %47 = vector.broadcast %46 : vector<8x8x1xf32> to vector<8x8x8xf32>
    %48 = arith.mulf %43, %47 : vector<8x8x8xf32>
    %49 = arith.truncf %48 : vector<8x8x8xf32> to vector<8x8x8xbf16>
    %50 = vector.extract_strided_slice %12 {offsets = [0, 0, 32], sizes = [8, 8, 32], strides = [1, 1, 1]} : vector<8x8x128xf32> to vector<8x8x32xf32>
    %51 = arith.truncf %50 : vector<8x8x32xf32> to vector<8x8x32xbf16>
    "tpu.trace_start"() <{level = 10 : i32, message = "bqk,bke->bqe"}> : () -> ()
    %cst_13 = arith.constant dense<0.000000e+00> : vector<8x8x32xf32>
    %52 = tpu.matmul %49, %51, %cst_13 {dimension_numbers = #tpu.dot_dimension_numbers<[2], [1], [1], [2], [0, 0, 0, 1, 1, 2], [0], [0]>} : vector<8x8x8xbf16>, vector<8x8x32xbf16>, vector<8x8x32xf32> -> vector<8x8x32xf32>
    "tpu.trace_stop"() : () -> ()
    %53 = arith.addf %33, %52 : vector<8x8x32xf32>
    %54 = vector.extract_strided_slice %8 {offsets = [0, 0, 16], sizes = [8, 8, 8], strides = [1, 1, 1]} : vector<8x8x32xf32> to vector<8x8x8xf32>
    %55 = arith.truncf %54 : vector<8x8x8xf32> to vector<8x8x8xbf16>
    %56 = vector.extract_strided_slice %10 {offsets = [0, 0, 16], sizes = [8, 8, 8], strides = [1, 1, 1]} : vector<8x8x32xf32> to vector<8x8x8xf32>
    %57 = arith.truncf %56 : vector<8x8x8xf32> to vector<8x8x8xbf16>
    "tpu.trace_start"() <{level = 10 : i32, message = "bqd,bkd->bqk"}> : () -> ()
    %cst_14 = arith.constant dense<0.000000e+00> : vector<8x8x8xf32>
    %58 = tpu.matmul %55, %57, %cst_14 {dimension_numbers = #tpu.dot_dimension_numbers<[2], [2], [1], [1], [0, 0, 0, 1, 1, 1], [0], [0]>} : vector<8x8x8xbf16>, vector<8x8x8xbf16>, vector<8x8x8xf32> -> vector<8x8x8xf32>
    "tpu.trace_stop"() : () -> ()
    %cst_15 = arith.constant dense<0xFF800000> : vector<8x8xf32>
    %59 = vector.multi_reduction <maximumf>, %58, %cst_15 [2] : vector<8x8x8xf32> to vector<8x8xf32>
    %60 = vector.shape_cast %59 : vector<8x8xf32> to vector<8x8x1xf32>
    %61 = vector.broadcast %60 : vector<8x8x1xf32> to vector<8x8x8xf32>
    %62 = arith.subf %58, %61 : vector<8x8x8xf32>
    %63 = math.exp %62 : vector<8x8x8xf32>
    %cst_16 = arith.constant dense<0.000000e+00> : vector<8x8xf32>
    %64 = vector.multi_reduction <add>, %63, %cst_16 [2] : vector<8x8x8xf32> to vector<8x8xf32>
    %65 = vector.shape_cast %64 : vector<8x8xf32> to vector<8x8x1xf32>
    %66 = tpu.reciprocal %65 {approx = true} : vector<8x8x1xf32> -> vector<8x8x1xf32>
    %67 = vector.broadcast %66 : vector<8x8x1xf32> to vector<8x8x8xf32>
    %68 = arith.mulf %63, %67 : vector<8x8x8xf32>
    %69 = arith.truncf %68 : vector<8x8x8xf32> to vector<8x8x8xbf16>
    %70 = vector.extract_strided_slice %12 {offsets = [0, 0, 64], sizes = [8, 8, 32], strides = [1, 1, 1]} : vector<8x8x128xf32> to vector<8x8x32xf32>
    %71 = arith.truncf %70 : vector<8x8x32xf32> to vector<8x8x32xbf16>
    "tpu.trace_start"() <{level = 10 : i32, message = "bqk,bke->bqe"}> : () -> ()
    %cst_17 = arith.constant dense<0.000000e+00> : vector<8x8x32xf32>
    %72 = tpu.matmul %69, %71, %cst_17 {dimension_numbers = #tpu.dot_dimension_numbers<[2], [1], [1], [2], [0, 0, 0, 1, 1, 2], [0], [0]>} : vector<8x8x8xbf16>, vector<8x8x32xbf16>, vector<8x8x32xf32> -> vector<8x8x32xf32>
    "tpu.trace_stop"() : () -> ()
    %73 = arith.addf %53, %72 : vector<8x8x32xf32>
    %74 = vector.extract_strided_slice %8 {offsets = [0, 0, 24], sizes = [8, 8, 8], strides = [1, 1, 1]} : vector<8x8x32xf32> to vector<8x8x8xf32>
    %75 = arith.truncf %74 : vector<8x8x8xf32> to vector<8x8x8xbf16>
    %76 = vector.extract_strided_slice %10 {offsets = [0, 0, 24], sizes = [8, 8, 8], strides = [1, 1, 1]} : vector<8x8x32xf32> to vector<8x8x8xf32>
    %77 = arith.truncf %76 : vector<8x8x8xf32> to vector<8x8x8xbf16>
    "tpu.trace_start"() <{level = 10 : i32, message = "bqd,bkd->bqk"}> : () -> ()
    %cst_18 = arith.constant dense<0.000000e+00> : vector<8x8x8xf32>
    %78 = tpu.matmul %75, %77, %cst_18 {dimension_numbers = #tpu.dot_dimension_numbers<[2], [2], [1], [1], [0, 0, 0, 1, 1, 1], [0], [0]>} : vector<8x8x8xbf16>, vector<8x8x8xbf16>, vector<8x8x8xf32> -> vector<8x8x8xf32>
    "tpu.trace_stop"() : () -> ()
    %cst_19 = arith.constant dense<0xFF800000> : vector<8x8xf32>
    %79 = vector.multi_reduction <maximumf>, %78, %cst_19 [2] : vector<8x8x8xf32> to vector<8x8xf32>
    %80 = vector.shape_cast %79 : vector<8x8xf32> to vector<8x8x1xf32>
    %81 = vector.broadcast %80 : vector<8x8x1xf32> to vector<8x8x8xf32>
    %82 = arith.subf %78, %81 : vector<8x8x8xf32>
    %83 = math.exp %82 : vector<8x8x8xf32>
    %cst_20 = arith.constant dense<0.000000e+00> : vector<8x8xf32>
    %84 = vector.multi_reduction <add>, %83, %cst_20 [2] : vector<8x8x8xf32> to vector<8x8xf32>
    %85 = vector.shape_cast %84 : vector<8x8xf32> to vector<8x8x1xf32>
    %86 = tpu.reciprocal %85 {approx = true} : vector<8x8x1xf32> -> vector<8x8x1xf32>
    %87 = vector.broadcast %86 : vector<8x8x1xf32> to vector<8x8x8xf32>
    %88 = arith.mulf %83, %87 : vector<8x8x8xf32>
    %89 = arith.truncf %88 : vector<8x8x8xf32> to vector<8x8x8xbf16>
    %90 = vector.extract_strided_slice %12 {offsets = [0, 0, 96], sizes = [8, 8, 32], strides = [1, 1, 1]} : vector<8x8x128xf32> to vector<8x8x32xf32>
    %91 = arith.truncf %90 : vector<8x8x32xf32> to vector<8x8x32xbf16>
    "tpu.trace_start"() <{level = 10 : i32, message = "bqk,bke->bqe"}> : () -> ()
    %cst_21 = arith.constant dense<0.000000e+00> : vector<8x8x32xf32>
    %92 = tpu.matmul %89, %91, %cst_21 {dimension_numbers = #tpu.dot_dimension_numbers<[2], [1], [1], [2], [0, 0, 0, 1, 1, 2], [0], [0]>} : vector<8x8x8xbf16>, vector<8x8x32xbf16>, vector<8x8x32xf32> -> vector<8x8x32xf32>
    "tpu.trace_stop"() : () -> ()
    %93 = arith.addf %73, %92 : vector<8x8x32xf32>
    %94 = vector.shape_cast %93 : vector<8x8x32xf32> to vector<64x32xf32>
    %c1 = arith.constant 1 : index
    %c0_22 = arith.constant 0 : index
    %95 = vector.load %arg3[%c1, %c0_22] : memref<20x192xf32, #tpu.memory_space<vmem>>, vector<1x32xf32>
    %96 = vector.broadcast %95 : vector<1x32xf32> to vector<64x32xf32>
    %97 = arith.addf %94, %96 : vector<64x32xf32>
    %98 = arith.addf %0, %97 : vector<64x32xf32>
    %c2 = arith.constant 2 : index
    %c0_23 = arith.constant 0 : index
    %99 = vector.load %arg3[%c2, %c0_23] : memref<20x192xf32, #tpu.memory_space<vmem>>, vector<1x32xf32>
    %c3 = arith.constant 3 : index
    %c0_24 = arith.constant 0 : index
    %100 = vector.load %arg3[%c3, %c0_24] : memref<20x192xf32, #tpu.memory_space<vmem>>, vector<1x32xf32>
    %cst_25 = arith.constant dense<0.000000e+00> : vector<64xf32>
    %101 = vector.multi_reduction <add>, %98, %cst_25 [1] : vector<64x32xf32> to vector<64xf32>
    %102 = vector.shape_cast %101 : vector<64xf32> to vector<64x1xf32>
    %cst_26 = arith.constant 3.200000e+01 : f32
    %103 = vector.broadcast %cst_26 : f32 to vector<64x1xf32>
    %104 = arith.divf %102, %103 : vector<64x1xf32>
    %105 = vector.broadcast %104 : vector<64x1xf32> to vector<64x32xf32>
    %106 = arith.subf %98, %105 : vector<64x32xf32>
    %107 = arith.mulf %106, %106 : vector<64x32xf32>
    %cst_27 = arith.constant dense<0.000000e+00> : vector<64xf32>
    %108 = vector.multi_reduction <add>, %107, %cst_27 [1] : vector<64x32xf32> to vector<64xf32>
    %109 = vector.shape_cast %108 : vector<64xf32> to vector<64x1xf32>
    %cst_28 = arith.constant 3.200000e+01 : f32
    %110 = vector.broadcast %cst_28 : f32 to vector<64x1xf32>
    %111 = arith.divf %109, %110 : vector<64x1xf32>
    %112 = vector.broadcast %104 : vector<64x1xf32> to vector<64x32xf32>
    %113 = arith.subf %98, %112 : vector<64x32xf32>
    %cst_29 = arith.constant 9.99999974E-6 : f32
    %114 = vector.broadcast %cst_29 : f32 to vector<64x1xf32>
    %115 = arith.addf %111, %114 : vector<64x1xf32>
    %116 = math.rsqrt %115 : vector<64x1xf32>
    %117 = vector.broadcast %116 : vector<64x1xf32> to vector<64x32xf32>
    %118 = arith.mulf %113, %117 : vector<64x32xf32>
    %119 = vector.broadcast %99 : vector<1x32xf32> to vector<64x32xf32>
    %120 = arith.mulf %118, %119 : vector<64x32xf32>
    %121 = vector.broadcast %100 : vector<1x32xf32> to vector<64x32xf32>
    %122 = arith.addf %120, %121 : vector<64x32xf32>
    %123 = arith.truncf %122 : vector<64x32xf32> to vector<64x32xbf16>
    %c0_30 = arith.constant 0 : index
    %c192 = arith.constant 192 : index
    %124 = vector.load %arg1[%c0_30, %c192] : memref<32x576xbf16, #tpu.memory_space<vmem>>, vector<32x64xbf16>
    %cst_31 = arith.constant dense<0.000000e+00> : vector<64x64xf32>
    %125 = tpu.matmul %123, %124, %cst_31 {dimension_numbers = #tpu.dot_dimension_numbers<[1], [0], [0], [1], [0, 0, 1, 1], [], []>} : vector<64x32xbf16>, vector<32x64xbf16>, vector<64x64xf32> -> vector<64x64xf32>
    %c4 = arith.constant 4 : index
    %c0_32 = arith.constant 0 : index
    %126 = vector.load %arg3[%c4, %c0_32] : memref<20x192xf32, #tpu.memory_space<vmem>>, vector<1x64xf32>
    %127 = vector.broadcast %126 : vector<1x64xf32> to vector<64x64xf32>
    %128 = arith.addf %125, %127 : vector<64x64xf32>
    %cst_33 = arith.constant 0.000000e+00 : f32
    %129 = vector.broadcast %cst_33 : f32 to vector<64x64xf32>
    %130 = arith.maximumf %128, %129 : vector<64x64xf32>
    %131 = arith.truncf %130 : vector<64x64xf32> to vector<64x64xbf16>
    %c0_34 = arith.constant 0 : index
    %c0_35 = arith.constant 0 : index
    %132 = vector.load %arg2[%c0_34, %c0_35] : memref<64x192xbf16, #tpu.memory_space<vmem>>, vector<64x32xbf16>
    %cst_36 = arith.constant dense<0.000000e+00> : vector<64x32xf32>
    %133 = tpu.matmul %131, %132, %cst_36 {dimension_numbers = #tpu.dot_dimension_numbers<[1], [0], [0], [1], [0, 0, 1, 1], [], []>} : vector<64x64xbf16>, vector<64x32xbf16>, vector<64x32xf32> -> vector<64x32xf32>
    %c5 = arith.constant 5 : index
    %c0_37 = arith.constant 0 : index
    %134 = vector.load %arg3[%c5, %c0_37] : memref<20x192xf32, #tpu.memory_space<vmem>>, vector<1x32xf32>
    %135 = vector.broadcast %134 : vector<1x32xf32> to vector<64x32xf32>
    %136 = arith.addf %133, %135 : vector<64x32xf32>
    %137 = arith.addf %122, %136 : vector<64x32xf32>
    %c6 = arith.constant 6 : index
    %c0_38 = arith.constant 0 : index
    %138 = vector.load %arg3[%c6, %c0_38] : memref<20x192xf32, #tpu.memory_space<vmem>>, vector<1x32xf32>
    %c7 = arith.constant 7 : index
    %c0_39 = arith.constant 0 : index
    %139 = vector.load %arg3[%c7, %c0_39] : memref<20x192xf32, #tpu.memory_space<vmem>>, vector<1x32xf32>
    %cst_40 = arith.constant dense<0.000000e+00> : vector<64xf32>
    %140 = vector.multi_reduction <add>, %137, %cst_40 [1] : vector<64x32xf32> to vector<64xf32>
    %141 = vector.shape_cast %140 : vector<64xf32> to vector<64x1xf32>
    %cst_41 = arith.constant 3.200000e+01 : f32
    %142 = vector.broadcast %cst_41 : f32 to vector<64x1xf32>
    %143 = arith.divf %141, %142 : vector<64x1xf32>
    %144 = vector.broadcast %143 : vector<64x1xf32> to vector<64x32xf32>
    %145 = arith.subf %137, %144 : vector<64x32xf32>
    %146 = arith.mulf %145, %145 : vector<64x32xf32>
    %cst_42 = arith.constant dense<0.000000e+00> : vector<64xf32>
    %147 = vector.multi_reduction <add>, %146, %cst_42 [1] : vector<64x32xf32> to vector<64xf32>
    %148 = vector.shape_cast %147 : vector<64xf32> to vector<64x1xf32>
    %cst_43 = arith.constant 3.200000e+01 : f32
    %149 = vector.broadcast %cst_43 : f32 to vector<64x1xf32>
    %150 = arith.divf %148, %149 : vector<64x1xf32>
    %151 = vector.broadcast %143 : vector<64x1xf32> to vector<64x32xf32>
    %152 = arith.subf %137, %151 : vector<64x32xf32>
    %cst_44 = arith.constant 9.99999974E-6 : f32
    %153 = vector.broadcast %cst_44 : f32 to vector<64x1xf32>
    %154 = arith.addf %150, %153 : vector<64x1xf32>
    %155 = math.rsqrt %154 : vector<64x1xf32>
    %156 = vector.broadcast %155 : vector<64x1xf32> to vector<64x32xf32>
    %157 = arith.mulf %152, %156 : vector<64x32xf32>
    %158 = vector.broadcast %138 : vector<1x32xf32> to vector<64x32xf32>
    %159 = arith.mulf %157, %158 : vector<64x32xf32>
    %160 = vector.broadcast %139 : vector<1x32xf32> to vector<64x32xf32>
    %161 = arith.addf %159, %160 : vector<64x32xf32>
    %162 = arith.truncf %161 : vector<64x32xf32> to vector<64x32xbf16>
    %c0_45 = arith.constant 0 : index
    %c256 = arith.constant 256 : index
    %163 = vector.load %arg1[%c0_45, %c256] : memref<32x576xbf16, #tpu.memory_space<vmem>>, vector<32x192xbf16>
    %cst_46 = arith.constant dense<0.000000e+00> : vector<64x192xf32>
    %164 = tpu.matmul %162, %163, %cst_46 {dimension_numbers = #tpu.dot_dimension_numbers<[1], [0], [0], [1], [0, 0, 1, 1], [], []>} : vector<64x32xbf16>, vector<32x192xbf16>, vector<64x192xf32> -> vector<64x192xf32>
    %c8 = arith.constant 8 : index
    %c0_47 = arith.constant 0 : index
    %165 = vector.load %arg3[%c8, %c0_47] : memref<20x192xf32, #tpu.memory_space<vmem>>, vector<1x192xf32>
    %166 = vector.broadcast %165 : vector<1x192xf32> to vector<64x192xf32>
    %167 = arith.addf %164, %166 : vector<64x192xf32>
    %168 = vector.extract_strided_slice %167 {offsets = [0, 0], sizes = [64, 32], strides = [1, 1]} : vector<64x192xf32> to vector<64x32xf32>
    %169 = vector.shape_cast %168 : vector<64x32xf32> to vector<8x8x32xf32>
    %170 = vector.extract_strided_slice %167 {offsets = [0, 32], sizes = [64, 32], strides = [1, 1]} : vector<64x192xf32> to vector<64x32xf32>
    %171 = vector.shape_cast %170 : vector<64x32xf32> to vector<8x8x32xf32>
    %172 = vector.extract_strided_slice %167 {offsets = [0, 64], sizes = [64, 128], strides = [1, 1]} : vector<64x192xf32> to vector<64x128xf32>
    %173 = vector.shape_cast %172 : vector<64x128xf32> to vector<8x8x128xf32>
    %cst_48 = arith.constant 0.000000e+00 : f32
    %174 = vector.broadcast %cst_48 : f32 to vector<8x8x32xf32>
    %175 = vector.extract_strided_slice %169 {offsets = [0, 0, 0], sizes = [8, 8, 8], strides = [1, 1, 1]} : vector<8x8x32xf32> to vector<8x8x8xf32>
    %176 = arith.truncf %175 : vector<8x8x8xf32> to vector<8x8x8xbf16>
    %177 = vector.extract_strided_slice %171 {offsets = [0, 0, 0], sizes = [8, 8, 8], strides = [1, 1, 1]} : vector<8x8x32xf32> to vector<8x8x8xf32>
    %178 = arith.truncf %177 : vector<8x8x8xf32> to vector<8x8x8xbf16>
    "tpu.trace_start"() <{level = 10 : i32, message = "bqd,bkd->bqk"}> : () -> ()
    %cst_49 = arith.constant dense<0.000000e+00> : vector<8x8x8xf32>
    %179 = tpu.matmul %176, %178, %cst_49 {dimension_numbers = #tpu.dot_dimension_numbers<[2], [2], [1], [1], [0, 0, 0, 1, 1, 1], [0], [0]>} : vector<8x8x8xbf16>, vector<8x8x8xbf16>, vector<8x8x8xf32> -> vector<8x8x8xf32>
    "tpu.trace_stop"() : () -> ()
    %cst_50 = arith.constant dense<0xFF800000> : vector<8x8xf32>
    %180 = vector.multi_reduction <maximumf>, %179, %cst_50 [2] : vector<8x8x8xf32> to vector<8x8xf32>
    %181 = vector.shape_cast %180 : vector<8x8xf32> to vector<8x8x1xf32>
    %182 = vector.broadcast %181 : vector<8x8x1xf32> to vector<8x8x8xf32>
    %183 = arith.subf %179, %182 : vector<8x8x8xf32>
    %184 = math.exp %183 : vector<8x8x8xf32>
    %cst_51 = arith.constant dense<0.000000e+00> : vector<8x8xf32>
    %185 = vector.multi_reduction <add>, %184, %cst_51 [2] : vector<8x8x8xf32> to vector<8x8xf32>
    %186 = vector.shape_cast %185 : vector<8x8xf32> to vector<8x8x1xf32>
    %187 = tpu.reciprocal %186 {approx = true} : vector<8x8x1xf32> -> vector<8x8x1xf32>
    %188 = vector.broadcast %187 : vector<8x8x1xf32> to vector<8x8x8xf32>
    %189 = arith.mulf %184, %188 : vector<8x8x8xf32>
    %190 = arith.truncf %189 : vector<8x8x8xf32> to vector<8x8x8xbf16>
    %191 = vector.extract_strided_slice %173 {offsets = [0, 0, 0], sizes = [8, 8, 32], strides = [1, 1, 1]} : vector<8x8x128xf32> to vector<8x8x32xf32>
    %192 = arith.truncf %191 : vector<8x8x32xf32> to vector<8x8x32xbf16>
    "tpu.trace_start"() <{level = 10 : i32, message = "bqk,bke->bqe"}> : () -> ()
    %cst_52 = arith.constant dense<0.000000e+00> : vector<8x8x32xf32>
    %193 = tpu.matmul %190, %192, %cst_52 {dimension_numbers = #tpu.dot_dimension_numbers<[2], [1], [1], [2], [0, 0, 0, 1, 1, 2], [0], [0]>} : vector<8x8x8xbf16>, vector<8x8x32xbf16>, vector<8x8x32xf32> -> vector<8x8x32xf32>
    "tpu.trace_stop"() : () -> ()
    %194 = arith.addf %174, %193 : vector<8x8x32xf32>
    %195 = vector.extract_strided_slice %169 {offsets = [0, 0, 8], sizes = [8, 8, 8], strides = [1, 1, 1]} : vector<8x8x32xf32> to vector<8x8x8xf32>
    %196 = arith.truncf %195 : vector<8x8x8xf32> to vector<8x8x8xbf16>
    %197 = vector.extract_strided_slice %171 {offsets = [0, 0, 8], sizes = [8, 8, 8], strides = [1, 1, 1]} : vector<8x8x32xf32> to vector<8x8x8xf32>
    %198 = arith.truncf %197 : vector<8x8x8xf32> to vector<8x8x8xbf16>
    "tpu.trace_start"() <{level = 10 : i32, message = "bqd,bkd->bqk"}> : () -> ()
    %cst_53 = arith.constant dense<0.000000e+00> : vector<8x8x8xf32>
    %199 = tpu.matmul %196, %198, %cst_53 {dimension_numbers = #tpu.dot_dimension_numbers<[2], [2], [1], [1], [0, 0, 0, 1, 1, 1], [0], [0]>} : vector<8x8x8xbf16>, vector<8x8x8xbf16>, vector<8x8x8xf32> -> vector<8x8x8xf32>
    "tpu.trace_stop"() : () -> ()
    %cst_54 = arith.constant dense<0xFF800000> : vector<8x8xf32>
    %200 = vector.multi_reduction <maximumf>, %199, %cst_54 [2] : vector<8x8x8xf32> to vector<8x8xf32>
    %201 = vector.shape_cast %200 : vector<8x8xf32> to vector<8x8x1xf32>
    %202 = vector.broadcast %201 : vector<8x8x1xf32> to vector<8x8x8xf32>
    %203 = arith.subf %199, %202 : vector<8x8x8xf32>
    %204 = math.exp %203 : vector<8x8x8xf32>
    %cst_55 = arith.constant dense<0.000000e+00> : vector<8x8xf32>
    %205 = vector.multi_reduction <add>, %204, %cst_55 [2] : vector<8x8x8xf32> to vector<8x8xf32>
    %206 = vector.shape_cast %205 : vector<8x8xf32> to vector<8x8x1xf32>
    %207 = tpu.reciprocal %206 {approx = true} : vector<8x8x1xf32> -> vector<8x8x1xf32>
    %208 = vector.broadcast %207 : vector<8x8x1xf32> to vector<8x8x8xf32>
    %209 = arith.mulf %204, %208 : vector<8x8x8xf32>
    %210 = arith.truncf %209 : vector<8x8x8xf32> to vector<8x8x8xbf16>
    %211 = vector.extract_strided_slice %173 {offsets = [0, 0, 32], sizes = [8, 8, 32], strides = [1, 1, 1]} : vector<8x8x128xf32> to vector<8x8x32xf32>
    %212 = arith.truncf %211 : vector<8x8x32xf32> to vector<8x8x32xbf16>
    "tpu.trace_start"() <{level = 10 : i32, message = "bqk,bke->bqe"}> : () -> ()
    %cst_56 = arith.constant dense<0.000000e+00> : vector<8x8x32xf32>
    %213 = tpu.matmul %210, %212, %cst_56 {dimension_numbers = #tpu.dot_dimension_numbers<[2], [1], [1], [2], [0, 0, 0, 1, 1, 2], [0], [0]>} : vector<8x8x8xbf16>, vector<8x8x32xbf16>, vector<8x8x32xf32> -> vector<8x8x32xf32>
    "tpu.trace_stop"() : () -> ()
    %214 = arith.addf %194, %213 : vector<8x8x32xf32>
    %215 = vector.extract_strided_slice %169 {offsets = [0, 0, 16], sizes = [8, 8, 8], strides = [1, 1, 1]} : vector<8x8x32xf32> to vector<8x8x8xf32>
    %216 = arith.truncf %215 : vector<8x8x8xf32> to vector<8x8x8xbf16>
    %217 = vector.extract_strided_slice %171 {offsets = [0, 0, 16], sizes = [8, 8, 8], strides = [1, 1, 1]} : vector<8x8x32xf32> to vector<8x8x8xf32>
    %218 = arith.truncf %217 : vector<8x8x8xf32> to vector<8x8x8xbf16>
    "tpu.trace_start"() <{level = 10 : i32, message = "bqd,bkd->bqk"}> : () -> ()
    %cst_57 = arith.constant dense<0.000000e+00> : vector<8x8x8xf32>
    %219 = tpu.matmul %216, %218, %cst_57 {dimension_numbers = #tpu.dot_dimension_numbers<[2], [2], [1], [1], [0, 0, 0, 1, 1, 1], [0], [0]>} : vector<8x8x8xbf16>, vector<8x8x8xbf16>, vector<8x8x8xf32> -> vector<8x8x8xf32>
    "tpu.trace_stop"() : () -> ()
    %cst_58 = arith.constant dense<0xFF800000> : vector<8x8xf32>
    %220 = vector.multi_reduction <maximumf>, %219, %cst_58 [2] : vector<8x8x8xf32> to vector<8x8xf32>
    %221 = vector.shape_cast %220 : vector<8x8xf32> to vector<8x8x1xf32>
    %222 = vector.broadcast %221 : vector<8x8x1xf32> to vector<8x8x8xf32>
    %223 = arith.subf %219, %222 : vector<8x8x8xf32>
    %224 = math.exp %223 : vector<8x8x8xf32>
    %cst_59 = arith.constant dense<0.000000e+00> : vector<8x8xf32>
    %225 = vector.multi_reduction <add>, %224, %cst_59 [2] : vector<8x8x8xf32> to vector<8x8xf32>
    %226 = vector.shape_cast %225 : vector<8x8xf32> to vector<8x8x1xf32>
    %227 = tpu.reciprocal %226 {approx = true} : vector<8x8x1xf32> -> vector<8x8x1xf32>
    %228 = vector.broadcast %227 : vector<8x8x1xf32> to vector<8x8x8xf32>
    %229 = arith.mulf %224, %228 : vector<8x8x8xf32>
    %230 = arith.truncf %229 : vector<8x8x8xf32> to vector<8x8x8xbf16>
    %231 = vector.extract_strided_slice %173 {offsets = [0, 0, 64], sizes = [8, 8, 32], strides = [1, 1, 1]} : vector<8x8x128xf32> to vector<8x8x32xf32>
    %232 = arith.truncf %231 : vector<8x8x32xf32> to vector<8x8x32xbf16>
    "tpu.trace_start"() <{level = 10 : i32, message = "bqk,bke->bqe"}> : () -> ()
    %cst_60 = arith.constant dense<0.000000e+00> : vector<8x8x32xf32>
    %233 = tpu.matmul %230, %232, %cst_60 {dimension_numbers = #tpu.dot_dimension_numbers<[2], [1], [1], [2], [0, 0, 0, 1, 1, 2], [0], [0]>} : vector<8x8x8xbf16>, vector<8x8x32xbf16>, vector<8x8x32xf32> -> vector<8x8x32xf32>
    "tpu.trace_stop"() : () -> ()
    %234 = arith.addf %214, %233 : vector<8x8x32xf32>
    %235 = vector.extract_strided_slice %169 {offsets = [0, 0, 24], sizes = [8, 8, 8], strides = [1, 1, 1]} : vector<8x8x32xf32> to vector<8x8x8xf32>
    %236 = arith.truncf %235 : vector<8x8x8xf32> to vector<8x8x8xbf16>
    %237 = vector.extract_strided_slice %171 {offsets = [0, 0, 24], sizes = [8, 8, 8], strides = [1, 1, 1]} : vector<8x8x32xf32> to vector<8x8x8xf32>
    %238 = arith.truncf %237 : vector<8x8x8xf32> to vector<8x8x8xbf16>
    "tpu.trace_start"() <{level = 10 : i32, message = "bqd,bkd->bqk"}> : () -> ()
    %cst_61 = arith.constant dense<0.000000e+00> : vector<8x8x8xf32>
    %239 = tpu.matmul %236, %238, %cst_61 {dimension_numbers = #tpu.dot_dimension_numbers<[2], [2], [1], [1], [0, 0, 0, 1, 1, 1], [0], [0]>} : vector<8x8x8xbf16>, vector<8x8x8xbf16>, vector<8x8x8xf32> -> vector<8x8x8xf32>
    "tpu.trace_stop"() : () -> ()
    %cst_62 = arith.constant dense<0xFF800000> : vector<8x8xf32>
    %240 = vector.multi_reduction <maximumf>, %239, %cst_62 [2] : vector<8x8x8xf32> to vector<8x8xf32>
    %241 = vector.shape_cast %240 : vector<8x8xf32> to vector<8x8x1xf32>
    %242 = vector.broadcast %241 : vector<8x8x1xf32> to vector<8x8x8xf32>
    %243 = arith.subf %239, %242 : vector<8x8x8xf32>
    %244 = math.exp %243 : vector<8x8x8xf32>
    %cst_63 = arith.constant dense<0.000000e+00> : vector<8x8xf32>
    %245 = vector.multi_reduction <add>, %244, %cst_63 [2] : vector<8x8x8xf32> to vector<8x8xf32>
    %246 = vector.shape_cast %245 : vector<8x8xf32> to vector<8x8x1xf32>
    %247 = tpu.reciprocal %246 {approx = true} : vector<8x8x1xf32> -> vector<8x8x1xf32>
    %248 = vector.broadcast %247 : vector<8x8x1xf32> to vector<8x8x8xf32>
    %249 = arith.mulf %244, %248 : vector<8x8x8xf32>
    %250 = arith.truncf %249 : vector<8x8x8xf32> to vector<8x8x8xbf16>
    %251 = vector.extract_strided_slice %173 {offsets = [0, 0, 96], sizes = [8, 8, 32], strides = [1, 1, 1]} : vector<8x8x128xf32> to vector<8x8x32xf32>
    %252 = arith.truncf %251 : vector<8x8x32xf32> to vector<8x8x32xbf16>
    "tpu.trace_start"() <{level = 10 : i32, message = "bqk,bke->bqe"}> : () -> ()
    %cst_64 = arith.constant dense<0.000000e+00> : vector<8x8x32xf32>
    %253 = tpu.matmul %250, %252, %cst_64 {dimension_numbers = #tpu.dot_dimension_numbers<[2], [1], [1], [2], [0, 0, 0, 1, 1, 2], [0], [0]>} : vector<8x8x8xbf16>, vector<8x8x32xbf16>, vector<8x8x32xf32> -> vector<8x8x32xf32>
    "tpu.trace_stop"() : () -> ()
    %254 = arith.addf %234, %253 : vector<8x8x32xf32>
    %255 = vector.shape_cast %254 : vector<8x8x32xf32> to vector<64x32xf32>
    %c9 = arith.constant 9 : index
    %c0_65 = arith.constant 0 : index
    %256 = vector.load %arg3[%c9, %c0_65] : memref<20x192xf32, #tpu.memory_space<vmem>>, vector<1x32xf32>
    %257 = vector.broadcast %256 : vector<1x32xf32> to vector<64x32xf32>
    %258 = arith.addf %255, %257 : vector<64x32xf32>
    %259 = arith.addf %161, %258 : vector<64x32xf32>
    %c10 = arith.constant 10 : index
    %c0_66 = arith.constant 0 : index
    %260 = vector.load %arg3[%c10, %c0_66] : memref<20x192xf32, #tpu.memory_space<vmem>>, vector<1x32xf32>
    %c11 = arith.constant 11 : index
    %c0_67 = arith.constant 0 : index
    %261 = vector.load %arg3[%c11, %c0_67] : memref<20x192xf32, #tpu.memory_space<vmem>>, vector<1x32xf32>
    %cst_68 = arith.constant dense<0.000000e+00> : vector<64xf32>
    %262 = vector.multi_reduction <add>, %259, %cst_68 [1] : vector<64x32xf32> to vector<64xf32>
    %263 = vector.shape_cast %262 : vector<64xf32> to vector<64x1xf32>
    %cst_69 = arith.constant 3.200000e+01 : f32
    %264 = vector.broadcast %cst_69 : f32 to vector<64x1xf32>
    %265 = arith.divf %263, %264 : vector<64x1xf32>
    %266 = vector.broadcast %265 : vector<64x1xf32> to vector<64x32xf32>
    %267 = arith.subf %259, %266 : vector<64x32xf32>
    %268 = arith.mulf %267, %267 : vector<64x32xf32>
    %cst_70 = arith.constant dense<0.000000e+00> : vector<64xf32>
    %269 = vector.multi_reduction <add>, %268, %cst_70 [1] : vector<64x32xf32> to vector<64xf32>
    %270 = vector.shape_cast %269 : vector<64xf32> to vector<64x1xf32>
    %cst_71 = arith.constant 3.200000e+01 : f32
    %271 = vector.broadcast %cst_71 : f32 to vector<64x1xf32>
    %272 = arith.divf %270, %271 : vector<64x1xf32>
    %273 = vector.broadcast %265 : vector<64x1xf32> to vector<64x32xf32>
    %274 = arith.subf %259, %273 : vector<64x32xf32>
    %cst_72 = arith.constant 9.99999974E-6 : f32
    %275 = vector.broadcast %cst_72 : f32 to vector<64x1xf32>
    %276 = arith.addf %272, %275 : vector<64x1xf32>
    %277 = math.rsqrt %276 : vector<64x1xf32>
    %278 = vector.broadcast %277 : vector<64x1xf32> to vector<64x32xf32>
    %279 = arith.mulf %274, %278 : vector<64x32xf32>
    %280 = vector.broadcast %260 : vector<1x32xf32> to vector<64x32xf32>
    %281 = arith.mulf %279, %280 : vector<64x32xf32>
    %282 = vector.broadcast %261 : vector<1x32xf32> to vector<64x32xf32>
    %283 = arith.addf %281, %282 : vector<64x32xf32>
    %284 = arith.truncf %283 : vector<64x32xf32> to vector<64x32xbf16>
    %c0_73 = arith.constant 0 : index
    %c448 = arith.constant 448 : index
    %285 = vector.load %arg1[%c0_73, %c448] : memref<32x576xbf16, #tpu.memory_space<vmem>>, vector<32x64xbf16>
    %cst_74 = arith.constant dense<0.000000e+00> : vector<64x64xf32>
    %286 = tpu.matmul %284, %285, %cst_74 {dimension_numbers = #tpu.dot_dimension_numbers<[1], [0], [0], [1], [0, 0, 1, 1], [], []>} : vector<64x32xbf16>, vector<32x64xbf16>, vector<64x64xf32> -> vector<64x64xf32>
    %c12 = arith.constant 12 : index
    %c0_75 = arith.constant 0 : index
    %287 = vector.load %arg3[%c12, %c0_75] : memref<20x192xf32, #tpu.memory_space<vmem>>, vector<1x64xf32>
    %288 = vector.broadcast %287 : vector<1x64xf32> to vector<64x64xf32>
    %289 = arith.addf %286, %288 : vector<64x64xf32>
    %cst_76 = arith.constant 0.000000e+00 : f32
    %290 = vector.broadcast %cst_76 : f32 to vector<64x64xf32>
    %291 = arith.maximumf %289, %290 : vector<64x64xf32>
    %292 = arith.truncf %291 : vector<64x64xf32> to vector<64x64xbf16>
    %c0_77 = arith.constant 0 : index
    %c32 = arith.constant 32 : index
    %293 = vector.load %arg2[%c0_77, %c32] : memref<64x192xbf16, #tpu.memory_space<vmem>>, vector<64x32xbf16>
    %cst_78 = arith.constant dense<0.000000e+00> : vector<64x32xf32>
    %294 = tpu.matmul %292, %293, %cst_78 {dimension_numbers = #tpu.dot_dimension_numbers<[1], [0], [0], [1], [0, 0, 1, 1], [], []>} : vector<64x64xbf16>, vector<64x32xbf16>, vector<64x32xf32> -> vector<64x32xf32>
    %c13 = arith.constant 13 : index
    %c0_79 = arith.constant 0 : index
    %295 = vector.load %arg3[%c13, %c0_79] : memref<20x192xf32, #tpu.memory_space<vmem>>, vector<1x32xf32>
    %296 = vector.broadcast %295 : vector<1x32xf32> to vector<64x32xf32>
    %297 = arith.addf %294, %296 : vector<64x32xf32>
    %298 = arith.addf %283, %297 : vector<64x32xf32>
    %c14 = arith.constant 14 : index
    %c0_80 = arith.constant 0 : index
    %299 = vector.load %arg3[%c14, %c0_80] : memref<20x192xf32, #tpu.memory_space<vmem>>, vector<1x32xf32>
    %c15 = arith.constant 15 : index
    %c0_81 = arith.constant 0 : index
    %300 = vector.load %arg3[%c15, %c0_81] : memref<20x192xf32, #tpu.memory_space<vmem>>, vector<1x32xf32>
    %cst_82 = arith.constant dense<0.000000e+00> : vector<64xf32>
    %301 = vector.multi_reduction <add>, %298, %cst_82 [1] : vector<64x32xf32> to vector<64xf32>
    %302 = vector.shape_cast %301 : vector<64xf32> to vector<64x1xf32>
    %cst_83 = arith.constant 3.200000e+01 : f32
    %303 = vector.broadcast %cst_83 : f32 to vector<64x1xf32>
    %304 = arith.divf %302, %303 : vector<64x1xf32>
    %305 = vector.broadcast %304 : vector<64x1xf32> to vector<64x32xf32>
    %306 = arith.subf %298, %305 : vector<64x32xf32>
    %307 = arith.mulf %306, %306 : vector<64x32xf32>
    %cst_84 = arith.constant dense<0.000000e+00> : vector<64xf32>
    %308 = vector.multi_reduction <add>, %307, %cst_84 [1] : vector<64x32xf32> to vector<64xf32>
    %309 = vector.shape_cast %308 : vector<64xf32> to vector<64x1xf32>
    %cst_85 = arith.constant 3.200000e+01 : f32
    %310 = vector.broadcast %cst_85 : f32 to vector<64x1xf32>
    %311 = arith.divf %309, %310 : vector<64x1xf32>
    %312 = vector.broadcast %304 : vector<64x1xf32> to vector<64x32xf32>
    %313 = arith.subf %298, %312 : vector<64x32xf32>
    %cst_86 = arith.constant 9.99999974E-6 : f32
    %314 = vector.broadcast %cst_86 : f32 to vector<64x1xf32>
    %315 = arith.addf %311, %314 : vector<64x1xf32>
    %316 = math.rsqrt %315 : vector<64x1xf32>
    %317 = vector.broadcast %316 : vector<64x1xf32> to vector<64x32xf32>
    %318 = arith.mulf %313, %317 : vector<64x32xf32>
    %319 = vector.broadcast %299 : vector<1x32xf32> to vector<64x32xf32>
    %320 = arith.mulf %318, %319 : vector<64x32xf32>
    %321 = vector.broadcast %300 : vector<1x32xf32> to vector<64x32xf32>
    %322 = arith.addf %320, %321 : vector<64x32xf32>
    %c16 = arith.constant 16 : index
    %c0_87 = arith.constant 0 : index
    %323 = vector.load %arg3[%c16, %c0_87] : memref<20x192xf32, #tpu.memory_space<vmem>>, vector<1x32xf32>
    %c17 = arith.constant 17 : index
    %c0_88 = arith.constant 0 : index
    %324 = vector.load %arg3[%c17, %c0_88] : memref<20x192xf32, #tpu.memory_space<vmem>>, vector<1x32xf32>
    %cst_89 = arith.constant dense<0.000000e+00> : vector<64xf32>
    %325 = vector.multi_reduction <add>, %322, %cst_89 [1] : vector<64x32xf32> to vector<64xf32>
    %326 = vector.shape_cast %325 : vector<64xf32> to vector<64x1xf32>
    %cst_90 = arith.constant 3.200000e+01 : f32
    %327 = vector.broadcast %cst_90 : f32 to vector<64x1xf32>
    %328 = arith.divf %326, %327 : vector<64x1xf32>
    %329 = vector.broadcast %328 : vector<64x1xf32> to vector<64x32xf32>
    %330 = arith.subf %322, %329 : vector<64x32xf32>
    %331 = arith.mulf %330, %330 : vector<64x32xf32>
    %cst_91 = arith.constant dense<0.000000e+00> : vector<64xf32>
    %332 = vector.multi_reduction <add>, %331, %cst_91 [1] : vector<64x32xf32> to vector<64xf32>
    %333 = vector.shape_cast %332 : vector<64xf32> to vector<64x1xf32>
    %cst_92 = arith.constant 3.200000e+01 : f32
    %334 = vector.broadcast %cst_92 : f32 to vector<64x1xf32>
    %335 = arith.divf %333, %334 : vector<64x1xf32>
    %336 = vector.broadcast %328 : vector<64x1xf32> to vector<64x32xf32>
    %337 = arith.subf %322, %336 : vector<64x32xf32>
    %cst_93 = arith.constant 9.99999974E-6 : f32
    %338 = vector.broadcast %cst_93 : f32 to vector<64x1xf32>
    %339 = arith.addf %335, %338 : vector<64x1xf32>
    %340 = math.rsqrt %339 : vector<64x1xf32>
    %341 = vector.broadcast %340 : vector<64x1xf32> to vector<64x32xf32>
    %342 = arith.mulf %337, %341 : vector<64x32xf32>
    %343 = vector.broadcast %323 : vector<1x32xf32> to vector<64x32xf32>
    %344 = arith.mulf %342, %343 : vector<64x32xf32>
    %345 = vector.broadcast %324 : vector<1x32xf32> to vector<64x32xf32>
    %346 = arith.addf %344, %345 : vector<64x32xf32>
    %347 = vector.shape_cast %346 : vector<64x32xf32> to vector<8x8x32xf32>
    %cst_94 = arith.constant dense<0xFF800000> : vector<8x32xf32>
    %348 = vector.multi_reduction <maximumf>, %347, %cst_94 [1] : vector<8x8x32xf32> to vector<8x32xf32>
    %349 = arith.truncf %348 : vector<8x32xf32> to vector<8x32xbf16>
    %c0_95 = arith.constant 0 : index
    %c512 = arith.constant 512 : index
    %350 = vector.load %arg1[%c0_95, %c512] : memref<32x576xbf16, #tpu.memory_space<vmem>>, vector<32x64xbf16>
    %cst_96 = arith.constant dense<0.000000e+00> : vector<8x64xf32>
    %351 = tpu.matmul %349, %350, %cst_96 {dimension_numbers = #tpu.dot_dimension_numbers<[1], [0], [0], [1], [0, 0, 1, 1], [], []>} : vector<8x32xbf16>, vector<32x64xbf16>, vector<8x64xf32> -> vector<8x64xf32>
    %c18 = arith.constant 18 : index
    %c0_97 = arith.constant 0 : index
    %352 = vector.load %arg3[%c18, %c0_97] : memref<20x192xf32, #tpu.memory_space<vmem>>, vector<1x64xf32>
    %353 = vector.broadcast %352 : vector<1x64xf32> to vector<8x64xf32>
    %354 = arith.addf %351, %353 : vector<8x64xf32>
    %cst_98 = arith.constant 0.000000e+00 : f32
    %355 = vector.broadcast %cst_98 : f32 to vector<8x64xf32>
    %356 = arith.maximumf %354, %355 : vector<8x64xf32>
    %357 = arith.truncf %356 : vector<8x64xf32> to vector<8x64xbf16>
    %c0_99 = arith.constant 0 : index
    %c64 = arith.constant 64 : index
    %358 = vector.load %arg2[%c0_99, %c64] : memref<64x192xbf16, #tpu.memory_space<vmem>>, vector<64x128xbf16>
    %cst_100 = arith.constant dense<0.000000e+00> : vector<8x128xf32>
    %359 = tpu.matmul %357, %358, %cst_100 {dimension_numbers = #tpu.dot_dimension_numbers<[1], [0], [0], [1], [0, 0, 1, 1], [], []>} : vector<8x64xbf16>, vector<64x128xbf16>, vector<8x128xf32> -> vector<8x128xf32>
    %c19 = arith.constant 19 : index
    %c0_101 = arith.constant 0 : index
    %360 = vector.load %arg3[%c19, %c0_101] : memref<20x192xf32, #tpu.memory_space<vmem>>, vector<1x128xf32>
    %361 = vector.broadcast %360 : vector<1x128xf32> to vector<8x128xf32>
    %362 = arith.addf %359, %361 : vector<8x128xf32>
    %c0_102 = arith.constant 0 : index
    %c0_103 = arith.constant 0 : index
    %363 = vector.load %arg4[%c0_102, %c0_103] : memref<8x128xf32, #tpu.memory_space<vmem>>, vector<8x128xf32>
    tpu.vector_store %arg4[%c0_102, %c0_103], %362 {strides = array<i32>} : memref<8x128xf32, #tpu.memory_space<vmem>>, vector<8x128xf32>,
    return
  }
}

</mosaic_0001>

<bundles_post_ra>
// kernel: tpu_custom_call.1
= control target key start
LH: loop header
LB: loop body
LE: loop exit
PB: predicated region body
PF: predicated region fallthrough
CT: control target
= control target key end

     0   :  { %9 = vsyncpa [#allocation3], 0  ;;  %s8686_s0 = inlined_call_operand.vmem [shape: f32[64,32], index: 0, kind: input, shape index: {}]   ;;  %s8687_s1 = inlined_call_operand.vmem [shape: bf16[32,576], index: 1, kind: input, shape index: {}]   ;;  %s8688_s2 = inlined_call_operand.hbm [shape: bf16[64,192], index: 2, kind: input, shape index: {}]   ;;  %s8689_s3 = inlined_call_operand.hbm [shape: f32[20,192], index: 3, kind: input, shape index: {}]   ;;  %s8690_s4 = inlined_call_operand.hbm [shape: f32[8,128], index: 4, kind: output, shape index: {}]  }
   0x1   :  { %10 = vsyncpa [#allocation6], 0 }
   0x2   :  { %11 = vsyncpa [#allocation4], 0  ;;  %s20_s17 = sshll.u32 %s8688_s2, 4  ;;  %s6280_s18 = smov [#allocation2]   ;;  %s21_s17 = int_to_ptr.hbm [resolvable:$true] %s20_s17 }
   0x3   :  { %s22_s19 = sshll.u32 %s6280_s18, 4  ;;  %s33_s22 = sshll.u32 %s8689_s3, 4  ;;  %s23_s19 = int_to_ptr.vmem [resolvable:$true] %s22_s19  ;;  %s34_s22 = int_to_ptr.hbm [resolvable:$true] %s33_s22 }
   0x4   :  { %s6281_s23 = smov 128   ;;  %s6282_s24 = smov 8  }
   0x5   :  { %28 = dma.hbm_to_vmem [thread:$0]  %s21_s17, 1024, %s23_s19, [#allocation3], %s6281_s23, %s6281_s23, %s6282_s24  }
   0x6   :  { %s6283_s25 = smov [#allocation5]   ;;  %s6284_s27 = smov 256  }
   0x7   :  { %s35_s26 = sshll.u32 %s6283_s25, 4  ;;  %s6285_s28 = smov 16   ;;  %s36_s26 = int_to_ptr.vmem [resolvable:$true] %s35_s26 }
   0x8   :  { %41 = dma.hbm_to_vmem [thread:$0]  %s34_s22, 768, %s36_s26, [#allocation6], %s6284_s27, %s6284_s27, %s6285_s28  }
   0x9   :  { %6274 = dma.done.wait [#allocation3], 1024  }
   0xa   :  { %6275 = vsyncadd [#allocation3], 4294966272 }
   0xb   :  { %6276 = dma.done.wait [#allocation6], 768  }
   0xc   :  { %6277 = vsyncadd [#allocation6], 4294966528  ;;  %v5532_v0 = vld [vmem:[%s8687_s1 + $0x28] sm:$0xf]  ;;  %v5807_v1 = vld [vmem:[%s8687_s1 + $0x38] sm:$0xf0] }
   0xd   :  { %v5524_v2 = vld [vmem:[%s8687_s1] sm:$0xf]  ;;  %v5533_v3 = vor.u32 %v5807_v1, %v5532_v0  ;;  %v5805_v4 = vld [vmem:[%s8687_s1 + $0x10] sm:$0xf0]  ;;  %v52_v7 = vld [vmem:[%s8686_s0 + $0x8] sm:$0xff]  ;;  %vm93_vm0 = vcmask 261120  }
   0xe   :  { %v51_v5 = vld [vmem:[%s8686_s0] sm:$0xff]  ;;  %v5525_v6 = vor.u32 %v5805_v4, %v5524_v2  ;;  %v57_v8 = vld [vmem:[%s8686_s0 + $0x30] sm:$0xff]  ;;  %v58_v9 = vld [vmem:[%s8686_s0 + $0x38] sm:$0xff]  ;;  %s6286_s25 = smov 96   ;;  %s6287_s26 = smov 88   ;;  %vm177_vm1 = vcmask 64512  }
   0xf   :  { %112 = vmatpush.bf16.msra.mxu0 %v5533_v3  ;;  %5834 = vmatpush.bf16.msra.mxu2 %v5533_v3  ;;  %v6352_v10 = vpack.c.bf16 %v52_v7, %v51_v5  ;;  %v6354_v11 = vpack.c.bf16 %v58_v9, %v57_v8  ;;  %v53_v12 = vld [vmem:[%s8686_s0 + $0x10] sm:$0xff]  ;;  %v54_v13 = vld [vmem:[%s8686_s0 + $0x18] sm:$0xff]  ;;  %v55_v15 = vld [vmem:[%s8686_s0 + $0x20] sm:$0xff]  ;;  %s6288_s27 = smov 120   ;;  %s6289_s3 = smov 32   ;;  %vm746_vm2 = vcmask 1043456  }
  0x10   :  { %v6366_v14 = vpack.c.bf16 %v54_v13, %v53_v12  ;;  %v56_v16 = vld [vmem:[%s8686_s0 + $0x28] sm:$0xff]  ;;  %v5534_v61 = vld [vmem:[%s8687_s1 + $0x3c] sm:$0xf0]  ;;  %v5804_v63 = vld [vmem:[%s8687_s1 + $0x4] sm:$0xf]  ;;  %s6290_s9 = smov 64  }
  0x11   :  { %v6376_v17 = vpack.c.bf16 %v56_v16, %v55_v15  ;;  %v67_v18 = vld [vmem:[#allocation5] ss:$8 sm:$0x3]  ;;  %v5806_v60 = vld [vmem:[%s8687_s1 + $0x2c] sm:$0xf]  ;;  %s6291_s10 = smov 80  }
  0x12   :  { %v69_v19 = vperm.slane %v67_v18, 0  ;;  %v5537_v62 = vor.u32 %v5806_v60, %v5534_v61  ;;  %v5526_v0 = vld [vmem:[%s8687_s1 + $0x14] sm:$0xf0]  ;;  %s6292_s11 = smov 112   ;;  %s6293_s12 = smov 72  }
  0x13   :  { %113 = vmatpush.bf16.msra.mxu0 %v5525_v6  ;;  %5835 = vmatpush.bf16.msra.mxu2 %v5525_v6  ;;  %v5529_v1 = vor.u32 %v5804_v63, %v5526_v0  ;;  %s6294_s13 = smov 104   ;;  %s5511_s24 = sshll.u32 %s8690_s4, 4  ;;  %s5512_s24 = int_to_ptr.hbm [resolvable:$true] %s5511_s24 }
  0x14   :  { %141 = vmatpush.bf16.msra.mxu1 %v5537_v62  ;;  %5836 = vmatpush.bf16.msra.mxu3 %v5537_v62 }
  0x16   :  { %5538 = vmatmul.msk.bf16.vlgmr.msra.gmra.mxu0 %vm93_vm0, %v6352_v10  ;;  %5541 = vmatmul.msk.bf16.vlgmr.msra.gmra.mxu2 %vm93_vm0, %v6354_v11 }
  0x18   :  { %142 = vmatpush.bf16.msra.mxu1 %v5529_v1  ;;  %5837 = vmatpush.bf16.msra.mxu3 %v5529_v1 }
  0x1b   :  { %5542 = vmatmul.msk.bf16.vlgmr.msra.gmra.mxu1 %vm93_vm0, %v6352_v10  ;;  %5545 = vmatmul.msk.bf16.vlgmr.msra.gmra.mxu3 %vm93_vm0, %v6354_v11 }
  0x26   :  { %5539 = vmatmul.msk.bf16.gmra.mxu0 %vm93_vm0, %v6366_v14 }
  0x2b   :  { %5543 = vmatmul.msk.bf16.gmra.mxu1 %vm93_vm0, %v6366_v14 }
  0x36   :  { %5540 = vmatmul.msk.bf16.gmra.mxu0 %vm93_vm0, %v6376_v17 }
  0x3b   :  { %5544 = vmatmul.msk.bf16.gmra.mxu1 %vm93_vm0, %v6376_v17 }
  0x93   :  { %v115_v20 = vpop.f32.mrf.mxu0 }
  0x94   :  { %v116_v21 = vadd.f32 %v115_v20, %v69_v19 }
  0x96   :  { %v6380_v22 = vpack.c.bf16 %v116_v21, %v116_v21 }
  0x98   :  { %v173_v23 = vunpack.c.l.b16 %v6380_v22 }
  0x99   :  { %v130_v24 = vpop.f32.mrf.mxu2 }
  0x9a   :  { %v6383_v25 = vpack.c.b16 %v173_v23, %v173_v23  ;;  %v131_v28 = vadd.f32 %v130_v24, %v69_v19 }
  0x9b   :  { %v117_v26 = vpop.f32.mrf.mxu0 }
  0x9c   :  { %v118_v27 = vadd.f32 %v117_v26, %v69_v19  ;;  %175 = vrot.lane.b32.xlu0 %v6383_v25, %s6286_s25  ;;  %v6390_v31 = vpack.c.bf16 %v131_v28, %v131_v28 }
  0x9e   :  { %v6387_v29 = vpack.c.bf16 %v118_v27, %v118_v27  ;;  %v318_v35 = vunpack.c.l.b16 %v6390_v31 }
  0xa0   :  { %v198_v30 = vunpack.c.l.b16 %v6387_v29  ;;  %v6400_v38 = vpack.c.b16 %v318_v35, %v318_v35 }
  0xa1   :  { %v132_v41 = vpop.f32.mrf.mxu2 }
  0xa2   :  { %v6392_v32 = vpack.c.b16 %v198_v30, %v198_v30  ;;  %v133_v44 = vadd.f32 %v132_v41, %v69_v19 }
  0xa3   :  { %v120_v33 = vpop.f32.mrf.mxu0 }
  0xa4   :  { %v121_v34 = vadd.f32 %v120_v33, %v69_v19  ;;  %200 = vrot.lane.b32.xlu0 %v6392_v32, %s6286_s25  ;;  %v6413_v47 = vpack.c.bf16 %v133_v44, %v133_v44 }
  0xa6   :  { %v6397_v36 = vpack.c.bf16 %v121_v34, %v121_v34  ;;  %v342_v50 = vunpack.c.l.b16 %v6413_v47 }
  0xa8   :  { %v222_v37 = vunpack.c.l.b16 %v6397_v36  ;;  %v6423_v53 = vpack.c.b16 %v342_v50, %v342_v50 }
  0xaa   :  { %v6402_v39 = vpack.c.b16 %v222_v37, %v222_v37 }
  0xab   :  { %v122_v40 = vpop.f32.mrf.mxu0 }
  0xac   :  { %v123_v42 = vadd.f32 %v122_v40, %v69_v19  ;;  %224 = vrot.lane.b32.xlu1 %v6402_v39, %s6286_s25  ;;  %320 = vrot.lane.b32.xlu0 %v6400_v38, %s6286_s25 }
  0xae   :  { %v6408_v43 = vpack.c.bf16 %v123_v42, %v123_v42 }
  0xb0   :  { %v246_v45 = vunpack.c.l.b16 %v6408_v43 }
  0xb2   :  { %v6411_v46 = vpack.c.b16 %v246_v45, %v246_v45 }
  0xb3   :  { %v125_v48 = vpop.f32.mrf.mxu0 }
  0xb4   :  { %v126_v49 = vadd.f32 %v125_v48, %v69_v19  ;;  %248 = vrot.lane.b32.xlu1 %v6411_v46, %s6286_s25  ;;  %532 = vrot.lane.b32.xlu0 %v6411_v46, %s6287_s26 }
  0xb6   :  { %v6420_v51 = vpack.c.bf16 %v126_v49, %v126_v49 }
  0xb8   :  { %v270_v52 = vunpack.c.l.b16 %v6420_v51 }
  0xba   :  { %v6425_v54 = vpack.c.b16 %v270_v52, %v270_v52 }
  0xbb   :  { %v127_v55 = vpop.f32.mrf.mxu0 }
  0xbc   :  { %v128_v56 = vadd.f32 %v127_v55, %v69_v19  ;;  %272 = vrot.lane.b32.xlu2 %v6425_v54, %s6286_s25  ;;  %344 = vrot.lane.b32.xlu1 %v6423_v53, %s6286_s25 }
  0xbd   :  { %507 = vrot.lane.b32.xlu0 %v6402_v39, %s6288_s27 }
  0xbe   :  { %v6433_v57 = vpack.c.bf16 %v128_v56, %v128_v56 }
  0xc0   :  { %v294_v58 = vunpack.c.l.b16 %v6433_v57 }
  0xc2   :  { %v6436_v59 = vpack.c.b16 %v294_v58, %v294_v58 }
  0xc4   :  { %296 = vrot.lane.b32.xlu2 %v6436_v59, %s6286_s25  ;;  %463 = vrot.lane.b32.xlu1 %v6383_v25, %s6287_s26 }
  0xc5   :  { %484 = vrot.lane.b32.xlu0 %v6392_v32, %s6288_s27 }
  0xcc   :  { %509 = vrot.lane.b32.xlu2 %v6402_v39, %s6287_s26  ;;  %530 = vrot.lane.b32.xlu1 %v6411_v46, %s6288_s27 }
  0xcd   :  { %555 = vrot.lane.b32.xlu0 %v6425_v54, %s6287_s26 }
  0xd4   :  { %486 = vrot.lane.b32.xlu2 %v6392_v32, %s6287_s26  ;;  %601 = vrot.lane.b32.xlu1 %v6400_v38, %s6287_s26 }
  0xd5   :  { %622 = vrot.lane.b32.xlu0 %v6423_v53, %s6288_s27 }
  0xdc   :  { %461 = vrot.lane.b32.xlu2 %v6383_v25, %s6288_s27  ;;  %578 = vrot.lane.b32.xlu1 %v6436_v59, %s6287_s26 }
  0xdd   :  { %741 = vrot.lane.b32.xlu0 %v6383_v25, %s6289_s3 }
  0xe4   :  { %624 = vrot.lane.b32.xlu2 %v6423_v53, %s6287_s26  ;;  %553 = vrot.lane.b32.xlu1 %v6425_v54, %s6288_s27 }
  0xe5   :  { %826 = vrot.lane.b32.xlu0 %v6425_v54, %s6289_s3 }
  0xec   :  { %599 = vrot.lane.b32.xlu2 %v6400_v38, %s6288_s27  ;;  %784 = vrot.lane.b32.xlu1 %v6402_v39, %s6289_s3 }
  0xed   :  { %910 = vrot.lane.b32.xlu0 %v6383_v25, %s6290_s9 }
  0xf4   :  { %576 = vrot.lane.b32.xlu2 %v6436_v59, %s6288_s27  ;;  %763 = vrot.lane.b32.xlu1 %v6392_v32, %s6289_s3 }
  0xfc   :  { %805 = vrot.lane.b32.xlu2 %v6411_v46, %s6289_s3  ;;  %889 = vrot.lane.b32.xlu1 %v6423_v53, %s6289_s3 }
 0x104   :  { %868 = vrot.lane.b32.xlu2 %v6400_v38, %s6289_s3  ;;  %952 = vrot.lane.b32.xlu1 %v6402_v39, %s6290_s9 }
 0x10c   :  { %973 = vrot.lane.b32.xlu2 %v6411_v46, %s6290_s9 }
 0x10e   :  { %v176_v2 = vpop.permute.xlu0 %175 }
 0x10f   :  { %v182_v3 = vsel %vm177_vm1, %v176_v2, 0 }
 0x110   :  { %191 = vmatpush.bf16.xpose.msrb.mxu2 %v182_v3  ;;  %v6560_v3 = vpop.f32.mrf.mxu1 }
 0x114   :  { %847 = vrot.lane.b32.xlu2 %v6436_v59, %s6289_s3 }
 0x116   :  { %v273_v4 = vpop.permute.xlu2 %272  ;;  %v201_v5 = vpop.permute.xlu0 %200 }
 0x117   :  { %5546 = vmatmul.msk.bf16.vlgmr.msrb.gmra.mxu2 %vm177_vm1, %v6380_v22  ;;  %v206_v6 = vsel %vm177_vm1, %v201_v5, 0  ;;  %v278_v7 = vsel %vm177_vm1, %v273_v4, 0 }
 0x118   :  { %215 = vmatpush.bf16.xpose.msrb.mxu3 %v206_v6  ;;  %v6562_v4 = vpop.f32.mrf.mxu1  ;;  %v6566_v6 = vpop.f32.mrf.mxu3 }
 0x11e   :  { %v297_v8 = vpop.permute.xlu2 %296  ;;  %v225_v9 = vpop.permute.xlu1 %224 }
 0x11f   :  { %v230_v10 = vsel %vm177_vm1, %v225_v9, 0  ;;  %v321_v11 = vpop.permute.xlu0 %320  ;;  %5547 = vmatmul.msk.bf16.vlgmr.msrb.gmra.mxu3 %vm177_vm1, %v6387_v29  ;;  %v302_v17 = vsel %vm177_vm1, %v297_v8, 0 }
 0x120   :  { %239 = vmatpush.bf16.xpose.msra.mxu2 %v230_v10  ;;  %v326_v12 = vsel %vm177_vm1, %v321_v11, 0  ;;  %v6564_v5 = vpop.f32.mrf.mxu1  ;;  %v6570_v8 = vpop.f32.mrf.mxu3 }
 0x126   :  { %v510_v13 = vpop.permute.xlu2 %509  ;;  %v249_v14 = vpop.permute.xlu1 %248 }
 0x127   :  { %v254_v15 = vsel %vm177_vm1, %v249_v14, 0  ;;  %v533_v16 = vpop.permute.xlu0 %532  ;;  %5548 = vmatmul.msk.bf16.vlgmr.msra.gmra.mxu2 %vm177_vm1, %v6397_v36  ;;  %v515_v26 = vsel %vm177_vm1, %v510_v13, 0 }
 0x128   :  { %287 = vmatpush.bf16.xpose.msrb.mxu2 %v278_v7  ;;  %263 = vmatpush.bf16.xpose.msra.mxu3 %v254_v15  ;;  %v538_v33 = vsel %vm177_vm1, %v533_v16, 0  ;;  %v6568_v7 = vpop.f32.mrf.mxu1 }
 0x12e   :  { %v345_v18 = vpop.permute.xlu1 %344  ;;  %v487_v19 = vpop.permute.xlu2 %486 }
 0x12f   :  { %v350_v20 = vsel %vm177_vm1, %v345_v18, 0  ;;  %v508_v21 = vpop.permute.xlu0 %507  ;;  %5549 = vmatmul.msk.bf16.vlgmr.msra.gmra.mxu3 %vm177_vm1, %v6408_v43  ;;  %v492_v22 = vsel %vm177_vm1, %v487_v19, 0 }
 0x130   :  { %335 = vmatpush.bf16.xpose.msra.mxu2 %v326_v12  ;;  %311 = vmatpush.bf16.xpose.msrb.mxu3 %v302_v17  ;;  %v6576_v11 = vpop.f32.mrf.mxu1 }
 0x131   :  { %501 = vmatpush.bf16.xpose.msrb.mxu1 %v492_v22 }
 0x136   :  { %v462_v23 = vpop.permute.xlu2 %461  ;;  %v464_v24 = vpop.permute.xlu1 %463 }
 0x137   :  { %v485_v27 = vpop.permute.xlu0 %484  ;;  %5550 = vmatmul.msk.bf16.vlgmr.msrb.gmra.mxu2 %vm177_vm1, %v6420_v51  ;;  %v469_v28 = vsel %vm177_vm1, %v464_v24, 0 }
 0x138   :  { %359 = vmatpush.bf16.xpose.msra.mxu3 %v350_v20  ;;  %5555 = vmatmul.msk.bf16.vlgmr.msrb.gmra.mxu1 %vm177_vm1, %v485_v27  ;;  %v6584_v17 = vpop.f32.mrf.mxu1 }
 0x139   :  { %524 = vmatpush.bf16.xpose.msrb.mxu2 %v515_v26  ;;  %478 = vmatpush.bf16.xpose.msrb.mxu0 %v469_v28 }
 0x13e   :  { %v625_v29 = vpop.permute.xlu2 %624  ;;  %v531_v30 = vpop.permute.xlu1 %530 }
 0x13f   :  { %v556_v34 = vpop.permute.xlu0 %555  ;;  %5551 = vmatmul.msk.bf16.vlgmr.msrb.gmra.mxu3 %vm177_vm1, %v6433_v57  ;;  %v630_v44 = vsel %vm177_vm1, %v625_v29, 0 }
 0x140   :  { %v561_v35 = vsel %vm177_vm1, %v556_v34, 0  ;;  %5554 = vmatmul.msk.bf16.vlgmr.msrb.gmra.mxu0 %vm177_vm1, %v462_v23  ;;  %547 = vmatpush.bf16.xpose.msrb.mxu3 %v538_v33 }
 0x141   :  { %570 = vmatpush.bf16.xpose.msra.mxu0 %v561_v35 }
 0x146   :  { %v600_v36 = vpop.permute.xlu2 %599  ;;  %v602_v37 = vpop.permute.xlu1 %601 }
 0x147   :  { %v607_v40 = vsel %vm177_vm1, %v602_v37, 0  ;;  %v623_v41 = vpop.permute.xlu0 %622  ;;  %5552 = vmatmul.msk.bf16.vlgmr.msra.gmra.mxu2 %vm177_vm1, %v6390_v31 }
 0x148   :  { %616 = vmatpush.bf16.xpose.msra.mxu2 %v607_v40 }
 0x14e   :  { %v577_v42 = vpop.permute.xlu2 %576  ;;  %v579_v43 = vpop.permute.xlu1 %578 }
 0x14f   :  { %v584_v45 = vsel %vm177_vm1, %v579_v43, 0  ;;  %v742_v48 = vpop.permute.xlu0 %741  ;;  %5553 = vmatmul.msk.bf16.vlgmr.msra.gmra.mxu3 %vm177_vm1, %v6413_v47 }
 0x150   :  { %v748_v49 = vsel %vm746_vm2, %v742_v48, 0  ;;  %639 = vmatpush.bf16.xpose.msra.mxu3 %v630_v44  ;;  %593 = vmatpush.bf16.xpose.msra.mxu1 %v584_v45 }
 0x151   :  { %757 = vmatpush.bf16.msrb.mxu0 %v748_v49 }
 0x156   :  { %v806_v50 = vpop.permute.xlu2 %805  ;;  %v554_v51 = vpop.permute.xlu1 %553 }
 0x157   :  { %v827_v31 = vpop.permute.xlu0 %826  ;;  %5556 = vmatmul.msk.bf16.vlgmr.msrb.gmra.mxu2 %vm177_vm1, %v508_v21  ;;  %5558 = vmatmul.msk.bf16.vlgmr.msra.gmra.mxu0 %vm177_vm1, %v554_v51  ;;  %v811_v47 = vsel %vm746_vm2, %v806_v50, 0 }
 0x158   :  { %v832_v52 = vsel %vm746_vm2, %v827_v31, 0  ;;  %5559 = vmatmul.msk.bf16.vlgmr.msra.gmra.mxu1 %vm177_vm1, %v577_v42 }
 0x159   :  { %841 = vmatpush.bf16.msra.mxu0 %v832_v52 }
 0x15e   :  { %v869_v55 = vpop.permute.xlu2 %868  ;;  %v785_v56 = vpop.permute.xlu1 %784 }
 0x15f   :  { %v790_v57 = vsel %vm746_vm2, %v785_v56, 0  ;;  %5557 = vmatmul.msk.bf16.vlgmr.msrb.gmra.mxu3 %vm177_vm1, %v531_v30  ;;  %v874_v61 = vsel %vm746_vm2, %v869_v55, 0 }
 0x160   :  { %820 = vmatpush.bf16.msrb.mxu3 %v811_v47  ;;  %799 = vmatpush.bf16.msrb.mxu2 %v790_v57 }
 0x166   :  { %v6552_v58 = vpop.permute.xlu2 %973  ;;  %v764_v60 = vpop.permute.xlu1 %763 }
 0x167   :  { %v769_v62 = vsel %vm746_vm2, %v764_v60, 0  ;;  %5560 = vmatmul.msk.bf16.vlgmr.msra.gmra.mxu2 %vm177_vm1, %v600_v36 }
 0x168   :  { %883 = vmatpush.bf16.msra.mxu2 %v874_v61  ;;  %778 = vmatpush.bf16.msrb.mxu1 %v769_v62 }
 0x16e   :  { %v848_v63 = vpop.permute.xlu2 %847  ;;  %v890_v0 = vpop.permute.xlu1 %889 }
 0x16f   :  { %v853_v1 = vsel %vm746_vm2, %v848_v63, 0  ;;  %v895_v2 = vsel %vm746_vm2, %v890_v0, 0  ;;  %5561 = vmatmul.msk.bf16.vlgmr.msra.gmra.mxu3 %vm177_vm1, %v623_v41 }
 0x170   :  { %862 = vmatpush.bf16.msra.mxu1 %v853_v1  ;;  %904 = vmatpush.bf16.msra.mxu3 %v895_v2 }
 0x19a   :  { %v6572_v9 = vpop.f32.mrf.mxu2 }
 0x19b   :  { %v365_v10 = vsel %vm177_vm1, %v6572_v9, -inf }
 0x19c   :  { %366 = vmax.xlane.f32.xlu0 %v365_v10 }
 0x1a2   :  { %v195_v12 = vpop.f32.mrf.mxu2  ;;  %v6578_v13 = vpop.f32.mrf.mxu3 }
 0x1a3   :  { %v368_v14 = vsel %vm177_vm1, %v6578_v13, -inf  ;;  %v6637_v12 = vpop.permute.xlu0 %910 }
 0x1a4   :  { %369 = vmax.xlane.f32.xlu1 %v368_v14  ;;  %v6639_v14 = vpop.permute.xlu1 %952 }
 0x1aa   :  { %v219_v15 = vpop.f32.mrf.mxu3  ;;  %v6582_v16 = vpop.f32.mrf.mxu2 }
 0x1ab   :  { %v371_v18 = vsel %vm177_vm1, %v6582_v16, -inf }
 0x1ac   :  { %372 = vmax.xlane.f32.xlu1 %v371_v18 }
 0x1b2   :  { %v243_v19 = vpop.f32.mrf.mxu2  ;;  %v6588_v20 = vpop.f32.mrf.mxu3 }
 0x1b3   :  { %v374_v37 = vsel %vm177_vm1, %v6588_v20, -inf }
 0x1b5   :  { %v6590_v21 = vpop.f32.mrf.mxu1 }
 0x1b6   :  { %v648_v34 = vsel %vm177_vm1, %v6590_v21, -inf }
 0x1ba   :  { %v267_v22 = vpop.f32.mrf.mxu3  ;;  %v6592_v23 = vpop.f32.mrf.mxu2 }
 0x1bb   :  { %v377_v24 = vsel %vm177_vm1, %v6592_v23, -inf }
 0x1bc   :  { %378 = vmax.xlane.f32.xlu1 %v377_v24 }
 0x1bd   :  { %v480_v26 = vpop.f32.mrf.mxu0  ;;  %v505_v27 = vpop.f32.mrf.mxu1 }
 0x1be   :  { %v645_v28 = vsel %vm177_vm1, %v480_v26, -inf }
 0x1bf   :  { %646 = vmax.xlane.f32.xlu2 %v645_v28 }
 0x1c2   :  { %v291_v29 = vpop.f32.mrf.mxu2  ;;  %v6597_v30 = vpop.f32.mrf.mxu3 }
 0x1c3   :  { %v380_v52 = vsel %vm177_vm1, %v6597_v30, -inf }
 0x1c5   :  { %v482_v33 = vpop.f32.mrf.mxu0 }
 0x1c7   :  { %649 = vmax.xlane.f32.xlu2 %v648_v34 }
 0x1ca   :  { %v315_v35 = vpop.f32.mrf.mxu3  ;;  %v6601_v36 = vpop.f32.mrf.mxu2 }
 0x1cb   :  { %v383_v60 = vsel %vm177_vm1, %v6601_v36, -inf }
 0x1cf   :  { %375 = vmax.xlane.f32.xlu2 %v374_v37 }
 0x1d2   :  { %v339_v40 = vpop.f32.mrf.mxu2  ;;  %v6605_v41 = vpop.f32.mrf.mxu3 }
 0x1d3   :  { %v386_v31 = vsel %vm177_vm1, %v6605_v41, -inf }
 0x1d4   :  { %v6607_v42 = vpop.f32.mrf.mxu0 }
 0x1d5   :  { %v6609_v43 = vpop.f32.mrf.mxu1  ;;  %v657_v44 = vsel %vm177_vm1, %v6607_v42, -inf }
 0x1d6   :  { %v660_v45 = vsel %vm177_vm1, %v6609_v43, -inf }
 0x1d7   :  { %661 = vmax.xlane.f32.xlu0 %v660_v45  ;;  %658 = vmax.xlane.f32.xlu2 %v657_v44 }
 0x1da   :  { %v363_v48 = vpop.f32.mrf.mxu3  ;;  %v6615_v49 = vpop.f32.mrf.mxu2 }
 0x1db   :  { %v651_v57 = vsel %vm177_vm1, %v6615_v49, -inf }
 0x1dc   :  { %v574_v50 = vpop.f32.mrf.mxu0 }
 0x1dd   :  { %v597_v51 = vpop.f32.mrf.mxu1 }
 0x1df   :  { %387 = vmax.xlane.f32.xlu0 %v386_v31  ;;  %381 = vmax.xlane.f32.xlu2 %v380_v52 }
 0x1e2   :  { %v528_v55 = vpop.f32.mrf.mxu2  ;;  %v6621_v56 = vpop.f32.mrf.mxu3 }
 0x1e3   :  { %v654_v47 = vsel %vm177_vm1, %v6621_v56, -inf }
 0x1e4   :  { %655 = vmax.xlane.f32.xlu1 %v654_v47 }
 0x1e7   :  { %652 = vmax.xlane.f32.xlu0 %v651_v57  ;;  %384 = vmax.xlane.f32.xlu2 %v383_v60 }
 0x1ea   :  { %v551_v61 = vpop.f32.mrf.mxu3  ;;  %v6629_v62 = vpop.f32.mrf.mxu2 }
 0x1eb   :  { %v663_v63 = vsel %vm177_vm1, %v6629_v62, -inf }
 0x1ef   :  { %664 = vmax.xlane.f32.xlu0 %v663_v63 }
 0x1f2   :  { %v620_v0 = vpop.f32.mrf.mxu2  ;;  %v6633_v1 = vpop.f32.mrf.mxu3 }
 0x1f3   :  { %v666_v2 = vsel %vm177_vm1, %v6633_v1, -inf }
 0x1f4   :  { %667 = vmax.xlane.f32.xlu1 %v666_v2 }
 0x1fa   :  { %v643_v10 = vpop.f32.mrf.mxu3 }
 0x20f   :  { %v367_v15 = vpop.xlane.xlu0 %366 }
 0x210   :  { %v389_v22 = vsub.f32 %v6572_v9, %v367_v15 }
 0x212   :  { %v397_v28 = vmul.f32 1.442695, %v389_v22 }
 0x217   :  { %v370_v27 = vpop.xlane.xlu1 %369 }
 0x218   :  { %v390_v35 = vsub.f32 %v6578_v13, %v370_v27 }
 0x21f   :  { %v373_v9 = vpop.xlane.xlu1 %372 }
 0x22f   :  { %v379_v2 = vpop.xlane.xlu1 %378 }
 0x232   :  { %v647_v18 = vpop.xlane.xlu2 %646 }
 0x233   :  { %v669_v19 = vsub.f32 %v480_v26, %v647_v18  ;;  %v399_v26 = vmul.f32 1.442695, %v390_v35 }
 0x235   :  { %v677_v24 = vmul.f32 1.442695, %v669_v19 }
 0x237   :  { %5855 = vpow2.f32 %v677_v24 }
 0x238   :  { %5857 = vpow2.f32 %v397_v28 }
 0x23a   :  { %v650_v29 = vpop.xlane.xlu2 %649 }
 0x23b   :  { %v670_v33 = vsub.f32 %v6590_v21, %v650_v29  ;;  %v391_v21 = vsub.f32 %v6582_v16, %v373_v9 }
 0x23d   :  { %v6643_v34 = vpop.eup %5855  ;;  %v679_v37 = vmul.f32 1.442695, %v670_v33  ;;  %v401_v52 = vmul.f32 1.442695, %v391_v21 }
 0x23e   :  { %v693_v40 = vsel %vm177_vm1, %v6643_v34, 0.0  ;;  %v6648_v45 = vpop.eup %5857 }
 0x23f   :  { %5859 = vpow2.f32 %v679_v37  ;;  %694 = vadd.xlane.f32.xlu2 %v693_v40  ;;  %v413_v31 = vsel %vm177_vm1, %v6648_v45, 0.0 }
 0x240   :  { %5861 = vpow2.f32 %v399_v26 }
 0x242   :  { %v376_v44 = vpop.xlane.xlu2 %375 }
 0x243   :  { %v392_v48 = vsub.f32 %v6588_v20, %v376_v44 }
 0x245   :  { %v6651_v50 = vpop.eup %5859  ;;  %v403_v51 = vmul.f32 1.442695, %v392_v48 }
 0x246   :  { %v696_v13 = vsel %vm177_vm1, %v6651_v50, 0.0  ;;  %v6658_v57 = vpop.eup %5861 }
 0x247   :  { %5863 = vpow2.f32 %v403_v51  ;;  %697 = vadd.xlane.f32.xlu0 %v696_v13  ;;  %414 = vadd.xlane.f32.xlu2 %v413_v31  ;;  %v416_v63 = vsel %vm177_vm1, %v6658_v57, 0.0 }
 0x248   :  { %5865 = vpow2.f32 %v401_v52 }
 0x24a   :  { %v659_v55 = vpop.xlane.xlu2 %658  ;;  %v662_v47 = vpop.xlane.xlu0 %661 }
 0x24b   :  { %v673_v20 = vsub.f32 %v6607_v42, %v659_v55  ;;  %v674_v61 = vsub.f32 %v6609_v43, %v662_v47 }
 0x24d   :  { %v6661_v60 = vpop.eup %5863  ;;  %v685_v16 = vmul.f32 1.442695, %v673_v20  ;;  %v687_v10 = vmul.f32 1.442695, %v674_v61 }
 0x24e   :  { %v422_v0 = vsel %vm177_vm1, %v6661_v60, 0.0  ;;  %v6668_v42 = vpop.eup %5865 }
 0x24f   :  { %5867 = vpow2.f32 %v685_v16  ;;  %417 = vadd.xlane.f32.xlu0 %v416_v63  ;;  %423 = vadd.xlane.f32.xlu1 %v422_v0  ;;  %v419_v24 = vsel %vm177_vm1, %v6668_v42, 0.0  ;;  %v393_v0 = vsub.f32 %v6592_v23, %v379_v2 }
 0x250   :  { %5869 = vpow2.f32 %v687_v10 }
 0x251   :  { %v405_v10 = vmul.f32 1.442695, %v393_v0 }
 0x252   :  { %v382_v15 = vpop.xlane.xlu2 %381  ;;  %v388_v18 = vpop.xlane.xlu0 %387 }
 0x253   :  { %v396_v19 = vsub.f32 %v6605_v41, %v388_v18 }
 0x255   :  { %v6671_v22 = vpop.eup %5867  ;;  %v411_v43 = vmul.f32 1.442695, %v396_v19 }
 0x256   :  { %v705_v27 = vsel %vm177_vm1, %v6671_v22, 0.0  ;;  %v6678_v37 = vpop.eup %5869 }
 0x257   :  { %420 = vadd.xlane.f32.xlu0 %v419_v24  ;;  %706 = vadd.xlane.f32.xlu1 %v705_v27  ;;  %v656_v28 = vpop.xlane.xlu1 %655  ;;  %5871 = vpow2.f32 %v411_v43  ;;  %v708_v48 = vsel %vm177_vm1, %v6678_v37, 0.0 }
 0x258   :  { %v672_v29 = vsub.f32 %v6621_v56, %v656_v28 }
 0x25a   :  { %v683_v33 = vmul.f32 1.442695, %v672_v29  ;;  %v653_v35 = vpop.xlane.xlu0 %652  ;;  %v385_v41 = vpop.xlane.xlu2 %384 }
 0x25b   :  { %v671_v40 = vsub.f32 %v6615_v49, %v653_v35  ;;  %v395_v44 = vsub.f32 %v6601_v36, %v385_v41  ;;  %v394_v36 = vsub.f32 %v6597_v30, %v382_v15  ;;  %v916_v41 = vsel %vm746_vm2, %v6637_v12, 0 }
 0x25c   :  { %5873 = vpow2.f32 %v683_v33 }
 0x25d   :  { %v681_v26 = vmul.f32 1.442695, %v671_v40  ;;  %v6681_v9 = vpop.eup %5871  ;;  %v409_v51 = vmul.f32 1.442695, %v395_v44  ;;  %v407_v52 = vmul.f32 1.442695, %v394_v36 }
 0x25e   :  { %v434_v56 = vsel %vm177_vm1, %v6681_v9, 0.0 }
 0x25f   :  { %709 = vadd.xlane.f32.xlu0 %v708_v48  ;;  %5875 = vpow2.f32 %v681_v26  ;;  %435 = vadd.xlane.f32.xlu2 %v434_v56 }
 0x260   :  { %5877 = vpow2.f32 %v409_v51 }
 0x261   :  { %5879 = vpow2.f32 %v407_v52 }
 0x262   :  { %v6688_v21 = vpop.eup %5873  ;;  %v665_v19 = vpop.xlane.xlu0 %664 }
 0x263   :  { %v702_v49 = vsel %vm177_vm1, %v6688_v21, 0.0  ;;  %v675_v24 = vsub.f32 %v6629_v62, %v665_v19  ;;  %v979_v19 = vsel %vm746_vm2, %v6552_v58, 0 }
 0x264   :  { %703 = vadd.xlane.f32.xlu1 %v702_v49 }
 0x265   :  { %v6692_v13 = vpop.eup %5875  ;;  %v689_v27 = vmul.f32 1.442695, %v675_v24 }
 0x266   :  { %v699_v31 = vsel %vm177_vm1, %v6692_v13, 0.0  ;;  %v6697_v55 = vpop.eup %5877 }
 0x267   :  { %700 = vadd.xlane.f32.xlu0 %v699_v31  ;;  %v431_v47 = vsel %vm177_vm1, %v6697_v55, 0.0  ;;  %v6701_v20 = vpop.eup %5879  ;;  %v668_v30 = vpop.xlane.xlu1 %667 }
 0x268   :  { %v428_v16 = vsel %vm177_vm1, %v6701_v20, 0.0  ;;  %v676_v61 = vsub.f32 %v6633_v1, %v668_v30 }
 0x26a   :  { %v691_v63 = vmul.f32 1.442695, %v676_v61 }
 0x26c   :  { %5881 = vpow2.f32 %v691_v63 }
 0x26d   :  { %5883 = vpow2.f32 %v405_v10 }
 0x26e   :  { %5885 = vpow2.f32 %v689_v27 }
 0x26f   :  { %432 = vadd.xlane.f32.xlu0 %v431_v47 }
 0x272   :  { %v6713_v15 = vpop.eup %5881 }
 0x273   :  { %v714_v18 = vsel %vm177_vm1, %v6713_v15, 0.0  ;;  %v6717_v43 = vpop.eup %5883 }
 0x274   :  { %v425_v1 = vsel %vm177_vm1, %v6717_v43, 0.0  ;;  %v6722_v23 = vpop.eup %5885 }
 0x275   :  { %v711_v28 = vsel %vm177_vm1, %v6722_v23, 0.0 }
 0x277   :  { %1036 = vrot.lane.b32.xlu2 %v6400_v38, %s6290_s9  ;;  %429 = vadd.xlane.f32.xlu0 %v428_v16 }
 0x27d   :  { %931 = vrot.lane.b32.xlu1 %v6392_v32, %s6290_s9 }
 0x28b   :  { %994 = vrot.lane.b32.xlu0 %v6425_v54, %s6290_s9 }
 0x2a0   :  { %715 = vadd.xlane.f32.xlu2 %v714_v18 }
 0x2a7   :  { %426 = vadd.xlane.f32.xlu1 %v425_v1  ;;  %v958_v1 = vsel %vm746_vm2, %v6639_v14, 0 }
 0x2b2   :  { %v695_v2 = vpop.xlane.xlu2 %694 }
 0x2b3   :  { %5887 = vrcp.f32 %v695_v2 }
 0x2b5   :  { %712 = vadd.xlane.f32.xlu0 %v711_v28 }
 0x2b8   :  { %1015 = vrot.lane.b32.xlu2 %v6436_v59, %s6290_s9 }
 0x2b9   :  { %v5888_v29 = vpop.eup %5887 }
 0x2ba   :  { %v725_v62 = vmul.f32 %v5888_v29, %v6643_v34  ;;  %v698_v33 = vpop.xlane.xlu0 %697  ;;  %v415_v36 = vpop.xlane.xlu2 %414 }
 0x2bb   :  { %5889 = vrcp.f32 %v698_v33 }
 0x2bc   :  { %v733_v35 = vpack.c.bf16 %v725_v62, %v725_v62 }
 0x2be   :  { %5562 = vmatmul.msk.bf16.vlgmr.msrb.gmra.mxu0 %vm177_vm1, %v733_v35 }
 0x2bf   :  { %925 = vmatpush.bf16.msrb.mxu0 %v916_v41 }
 0x2c0   :  { %1057 = vrot.lane.b32.xlu1 %v6423_v53, %s6290_s9  ;;  %1080 = vrot.lane.b32.xlu2 %v6383_v25, %s6291_s10 }
 0x2c1   :  { %v5890_v40 = vpop.eup %5889 }
 0x2c2   :  { %v6736_v26 = vpop.xlane.xlu1 %423  ;;  %v418_v34 = vpop.xlane.xlu0 %417  ;;  %v726_v44 = vmul.f32 %v5890_v40, %v6651_v50 }
 0x2c4   :  { %v734_v48 = vpack.c.bf16 %v726_v44, %v726_v44 }
 0x2c6   :  { %5563 = vmatmul.msk.bf16.vlgmr.msrb.gmra.mxu1 %vm177_vm1, %v734_v48 }
 0x2c8   :  { %1149 = vrot.lane.b32.xlu1 %v6411_v46, %s6291_s10  ;;  %1147 = vrot.lane.b32.xlu2 %v6411_v46, %s6292_s11 }
 0x2c9   :  { %1126 = vrot.lane.b32.xlu0 %v6402_v39, %s6291_s10 }
 0x2ca   :  { %v707_v12 = vpop.xlane.xlu1 %706  ;;  %v6746_v56 = vpop.xlane.xlu0 %420 }
 0x2cb   :  { %5891 = vrcp.f32 %v707_v12 }
 0x2d0   :  { %1124 = vrot.lane.b32.xlu1 %v6402_v39, %s6292_s11  ;;  %1218 = vrot.lane.b32.xlu2 %v6400_v38, %s6291_s10 }
 0x2d1   :  { %v5892_v50 = vpop.eup %5891  ;;  %1103 = vrot.lane.b32.xlu0 %v6392_v32, %s6291_s10 }
 0x2d2   :  { %v729_v51 = vmul.f32 %v5892_v50, %v6671_v22  ;;  %v710_v49 = vpop.xlane.xlu0 %709  ;;  %v436_v35 = vpop.xlane.xlu2 %435 }
 0x2d3   :  { %5893 = vrcp.f32 %v710_v49 }
 0x2d4   :  { %v737_v31 = vpack.c.bf16 %v729_v51, %v729_v51  ;;  %5895 = vrcp.f32 %v415_v36 }
 0x2d6   :  { %5566 = vmatmul.msk.bf16.vlgmr.msra.gmra.mxu0 %vm177_vm1, %v737_v31 }
 0x2d7   :  { %v704_v52 = vpop.xlane.xlu1 %703 }
 0x2d8   :  { %5897 = vrcp.f32 %v704_v52  ;;  %1101 = vrot.lane.b32.xlu1 %v6392_v32, %s6292_s11  ;;  %1195 = vrot.lane.b32.xlu2 %v6436_v59, %s6291_s10 }
 0x2d9   :  { %v5894_v47 = vpop.eup %5893  ;;  %1078 = vrot.lane.b32.xlu0 %v6383_v25, %s6292_s11 }
 0x2da   :  { %v730_v22 = vmul.f32 %v5894_v47, %v6678_v37  ;;  %v701_v16 = vpop.xlane.xlu0 %700  ;;  %v5896_v61 = vpop.eup %5895 }
 0x2db   :  { %5899 = vrcp.f32 %v701_v16  ;;  %v445_v10 = vmul.f32 %v5896_v61, %v6648_v45  ;;  %v1037_v41 = vpop.permute.xlu2 %1036 }
 0x2dc   :  { %v738_v30 = vpack.c.bf16 %v730_v22, %v730_v22  ;;  %5901 = vrcp.f32 %v418_v34 }
 0x2de   :  { %v5898_v63 = vpop.eup %5897  ;;  %5567 = vmatmul.msk.bf16.vlgmr.msra.gmra.mxu1 %vm177_vm1, %v738_v30 }
 0x2df   :  { %v728_v0 = vmul.f32 %v5898_v63, %v6688_v21  ;;  %v453_v21 = vpack.c.bf16 %v445_v10, %v445_v10 }
 0x2e0   :  { %1172 = vrot.lane.b32.xlu1 %v6425_v54, %s6291_s10  ;;  %1170 = vrot.lane.b32.xlu2 %v6425_v54, %s6292_s11 }
 0x2e1   :  { %v736_v18 = vpack.c.bf16 %v728_v0, %v728_v0  ;;  %v5900_v37 = vpop.eup %5899  ;;  %1241 = vrot.lane.b32.xlu0 %v6423_v53, %s6291_s10 }
 0x2e2   :  { %v727_v24 = vmul.f32 %v5900_v37, %v6692_v13  ;;  %v5902_v58 = vpop.eup %5901  ;;  %v6784_v13 = vpop.xlane.xlu0 %432  ;;  %v1042_v37 = vsel %vm746_vm2, %v1037_v41, 0 }
 0x2e3   :  { %5565 = vmatmul.msk.bf16.vlgmr.msrb.gmra.mxu3 %vm177_vm1, %v736_v18  ;;  %v446_v27 = vmul.f32 %v5902_v58, %v6658_v57 }
 0x2e4   :  { %988 = vmatpush.bf16.msrb.mxu3 %v979_v19  ;;  %v735_v45 = vpack.c.bf16 %v727_v24, %v727_v24 }
 0x2e5   :  { %v454_v29 = vpack.c.bf16 %v446_v27, %v446_v27 }
 0x2e6   :  { %5570 = vmatmul.msk.bf16.vlgmr.msrb.gmra.mxu0 %vm177_vm1, %v453_v21  ;;  %5564 = vmatmul.msk.bf16.vlgmr.msrb.gmra.mxu2 %vm177_vm1, %v735_v45 }
 0x2e7   :  { %967 = vmatpush.bf16.msrb.mxu2 %v958_v1 }
 0x2e8   :  { %1239 = vrot.lane.b32.xlu1 %v6423_v53, %s6292_s11 }
 0x2e9   :  { %1216 = vrot.lane.b32.xlu0 %v6400_v38, %s6292_s11 }
 0x2ea   :  { %v430_v14 = vpop.xlane.xlu0 %429 }
 0x2eb   :  { %5903 = vrcp.f32 %v430_v14 }
 0x2ef   :  { %v932_v2 = vpop.permute.xlu1 %931 }
 0x2f0   :  { %v937_v28 = vsel %vm746_vm2, %v932_v2, 0 }
 0x2f1   :  { %946 = vmatpush.bf16.msrb.mxu1 %v937_v28  ;;  %1193 = vrot.lane.b32.xlu0 %v6436_v59, %s6292_s11  ;;  %v5904_v57 = vpop.eup %5903  ;;  %v6193_v28 = vld [vmem:[#allocation5] ss:$8 sm:$0x3] }
 0x2f2   :  { %v450_v48 = vmul.f32 %v5904_v57, %v6701_v20 }
 0x2f4   :  { %5571 = vmatmul.msk.bf16.vlgmr.msrb.gmra.mxu1 %vm177_vm1, %v454_v29  ;;  %v458_v36 = vpack.c.bf16 %v450_v48, %v450_v48 }
 0x2fd   :  { %v995_v62 = vpop.permute.xlu0 %994 }
 0x2fe   :  { %v1000_v33 = vsel %vm746_vm2, %v995_v62, 0 }
 0x2ff   :  { %1009 = vmatpush.bf16.msra.mxu0 %v1000_v33 }
 0x313   :  { %v716_v40 = vpop.xlane.xlu2 %715 }
 0x314   :  { %5905 = vrcp.f32 %v716_v40 }
 0x31a   :  { %v427_v34 = vpop.xlane.xlu1 %426  ;;  %v5906_v44 = vpop.eup %5905 }
 0x31b   :  { %5907 = vrcp.f32 %v427_v34  ;;  %v732_v12 = vmul.f32 %v5906_v44, %v6713_v15  ;;  %v1016_v50 = vpop.permute.xlu2 %1015 }
 0x31c   :  { %v1021_v51 = vsel %vm746_vm2, %v1016_v50, 0  ;;  %5909 = vrcp.f32 %v6736_v26 }
 0x31d   :  { %v740_v49 = vpack.c.bf16 %v732_v12, %v732_v12  ;;  %1030 = vmatpush.bf16.msra.mxu1 %v1021_v51 }
 0x31f   :  { %5569 = vmatmul.msk.bf16.vlgmr.msra.gmra.mxu3 %vm177_vm1, %v740_v49 }
 0x320   :  { %5575 = vmatmul.msk.bf16.vlgmr.msra.gmra.mxu1 %vm177_vm1, %v458_v36 }
 0x321   :  { %v5908_v31 = vpop.eup %5907 }
 0x322   :  { %v449_v52 = vmul.f32 %v5908_v31, %v6717_v43  ;;  %v5910_v15 = vpop.eup %5909 }
 0x323   :  { %v1081_v20 = vpop.permute.xlu2 %1080  ;;  %v448_v30 = vmul.f32 %v5910_v15, %v6661_v60 }
 0x324   :  { %v457_v47 = vpack.c.bf16 %v449_v52, %v449_v52  ;;  %v1086_v22 = vsel %vm177_vm1, %v1081_v20, 0 }
 0x325   :  { %1095 = vmatpush.bf16.xpose.msrb.mxu0 %v1086_v22  ;;  %v456_v61 = vpack.c.bf16 %v448_v30, %v448_v30 }
 0x326   :  { %5574 = vmatmul.msk.bf16.vlgmr.msra.gmra.mxu0 %vm177_vm1, %v457_v47 }
 0x328   :  { %v713_v16 = vpop.xlane.xlu0 %712 }
 0x329   :  { %5911 = vrcp.f32 %v713_v16 }
 0x32a   :  { %5913 = vrcp.f32 %v436_v35 }
 0x32b   :  { %v1148_v0 = vpop.permute.xlu2 %1147  ;;  %5915 = vrcp.f32 %v6746_v56  ;;  %v6814_v56 = vperm.slane %v6193_v28, 1 }
 0x32c   :  { %5917 = vrcp.f32 %v6784_v13 }
 0x32d   :  { %v145_v12 = vadd.f32 %v6560_v3, %v6814_v56  ;;  %v152_v13 = vadd.f32 %v6568_v7, %v6814_v56  ;;  %v155_v15 = vadd.f32 %v6576_v11, %v6814_v56  ;;  %v150_v11 = vadd.f32 %v6564_v5, %v6814_v56 }
 0x32f   :  { %v5912_v63 = vpop.eup %5911  ;;  %5573 = vmatmul.msk.bf16.vlgmr.msrb.gmra.mxu3 %vm177_vm1, %v456_v61  ;;  %v6838_v36 = vpack.c.bf16 %v145_v12, %v145_v12  ;;  %v6841_v31 = vpack.c.bf16 %v152_v13, %v152_v13  ;;  %v162_v61 = vadd.f32 %v6570_v8, %v6814_v56 }
 0x330   :  { %v731_v43 = vmul.f32 %v5912_v63, %v6722_v23  ;;  %v5914_v60 = vpop.eup %5913  ;;  %v6857_v63 = vpack.c.bf16 %v155_v15, %v155_v15 }
 0x331   :  { %v452_v19 = vmul.f32 %v5914_v60, %v6681_v9  ;;  %v5916_v1 = vpop.eup %5915  ;;  %v1370_v22 = vsel %vm746_vm2, %v6838_v36, 0  ;;  %v1427_v30 = vsel %vm746_vm2, %v6841_v31, 0  ;;  %v157_v60 = vadd.f32 %v6584_v17, %v6814_v56 }
 0x332   :  { %v1058_v26 = vpop.permute.xlu1 %1057  ;;  %v739_v10 = vpack.c.bf16 %v731_v43, %v731_v43  ;;  %v447_v2 = vmul.f32 %v5916_v1, %v6668_v42  ;;  %v147_v42 = vadd.f32 %v6562_v4, %v6814_v56  ;;  %v5918_v48 = vpop.eup %5917 }
 0x333   :  { %v1063_v18 = vsel %vm746_vm2, %v1058_v26, 0  ;;  %v1219_v24 = vpop.permute.xlu2 %1218  ;;  %v460_v27 = vpack.c.bf16 %v452_v19, %v452_v19  ;;  %v451_v49 = vmul.f32 %v5918_v48, %v6697_v55  ;;  %v6859_v26 = vpack.c.bf16 %v162_v61, %v162_v61 }
 0x334   :  { %1072 = vmatpush.bf16.msra.mxu3 %v1063_v18  ;;  %5568 = vmatmul.msk.bf16.vlgmr.msra.gmra.mxu2 %vm177_vm1, %v739_v10  ;;  %v455_v9 = vpack.c.bf16 %v447_v2, %v447_v2  ;;  %v6827_v34 = vpack.c.bf16 %v147_v42, %v147_v42  ;;  %v1224_v7 = vsel %vm177_vm1, %v1219_v24, 0  ;;  %v6871_v24 = vpack.c.bf16 %v150_v11, %v150_v11 }
 0x335   :  { %1051 = vmatpush.bf16.msra.mxu2 %v1042_v37  ;;  %v459_v52 = vpack.c.bf16 %v451_v49, %v451_v49  ;;  %v1446_v37 = vsel %vm746_vm2, %v6857_v63, 0  ;;  %v1503_v19 = vsel %vm746_vm2, %v6859_v26, 0  ;;  %v6873_v5 = vpack.c.bf16 %v157_v60, %v157_v60 }
 0x336   :  { %v1389_v4 = vsel %vm746_vm2, %v6827_v34, 0  ;;  %v1408_v17 = vsel %vm746_vm2, %v6871_v24, 0 }
 0x33a   :  { %v1150_v21 = vpop.permute.xlu1 %1149 }
 0x33b   :  { %v1155_v45 = vsel %vm177_vm1, %v1150_v21, 0  ;;  %v6810_v23 = vpop.f32.mrf.mxu0  ;;  %v1127_v58 = vpop.permute.xlu0 %1126 }
 0x33c   :  { %1164 = vmatpush.bf16.xpose.msrb.mxu3 %v1155_v45  ;;  %v1196_v62 = vpop.permute.xlu2 %1195  ;;  %v1132_v35 = vsel %vm177_vm1, %v1127_v58, 0 }
 0x33d   :  { %v1201_v57 = vsel %vm177_vm1, %v1196_v62, 0 }
 0x33f   :  { %5577 = vmatmul.msk.bf16.vlgmr.msra.gmra.mxu3 %vm177_vm1, %v460_v27  ;;  %v1465_v27 = vsel %vm746_vm2, %v6873_v5, 0 }
 0x342   :  { %v6816_v29 = vpop.permute.xlu1 %1124 }
 0x343   :  { %v761_v14 = vpop.f32.mrf.mxu0  ;;  %v6818_v33 = vpop.f32.mrf.mxu1 }
 0x344   :  { %v1104_v41 = vpop.permute.xlu0 %1103  ;;  %5572 = vmatmul.msk.bf16.vlgmr.msrb.gmra.mxu2 %vm177_vm1, %v455_v9  ;;  %v1171_v10 = vpop.permute.xlu2 %1170  ;;  %v160_v9 = vadd.f32 %v6566_v6, %v6814_v56 }
 0x345   :  { %v1109_v40 = vsel %vm177_vm1, %v1104_v41, 0  ;;  %1141 = vmatpush.bf16.xpose.msrb.mxu2 %v1132_v35 }
 0x346   :  { %1118 = vmatpush.bf16.xpose.msrb.mxu1 %v1109_v40  ;;  %v6891_v62 = vpack.c.bf16 %v160_v9, %v160_v9 }
 0x348   :  { %v1484_v42 = vsel %vm746_vm2, %v6891_v62, 0 }
 0x34a   :  { %v1102_v44 = vpop.permute.xlu1 %1101 }
 0x34b   :  { %v782_v50 = vpop.f32.mrf.mxu1 }
 0x34c   :  { %v1079_v51 = vpop.permute.xlu0 %1078 }
 0x34d   :  { %5578 = vmatmul.msk.bf16.vlgmr.msrb.gmra.mxu0 %vm177_vm1, %v1079_v51  ;;  %5579 = vmatmul.msk.bf16.vlgmr.msrb.gmra.mxu1 %vm177_vm1, %v1102_v44 }
 0x34e   :  { %1210 = vmatpush.bf16.xpose.msra.mxu1 %v1201_v57 }
 0x34f   :  { %5581 = vmatmul.msk.bf16.vlgmr.msrb.gmra.mxu3 %vm177_vm1, %v1148_v0 }
 0x352   :  { %v1173_v3 = vpop.permute.xlu1 %1172 }
 0x353   :  { %v1178_v47 = vsel %vm177_vm1, %v1173_v3, 0  ;;  %v6844_v20 = vpop.f32.mrf.mxu0 }
 0x354   :  { %1187 = vmatpush.bf16.xpose.msra.mxu0 %v1178_v47  ;;  %v1242_v55 = vpop.permute.xlu0 %1241  ;;  %5576 = vmatmul.msk.bf16.vlgmr.msra.gmra.mxu2 %vm177_vm1, %v459_v52 }
 0x355   :  { %v1247_v16 = vsel %vm177_vm1, %v1242_v55, 0  ;;  %1233 = vmatpush.bf16.xpose.msra.mxu2 %v1224_v7 }
 0x356   :  { %1398 = vmatpush.bf16.msrb.mxu1 %v1389_v4  ;;  %1256 = vmatpush.bf16.xpose.msra.mxu3 %v1247_v16 }
 0x35a   :  { %v1240_v8 = vpop.permute.xlu1 %1239 }
 0x35b   :  { %v845_v0 = vpop.f32.mrf.mxu0  ;;  %v864_v43 = vpop.f32.mrf.mxu1 }
 0x35c   :  { %1379 = vmatpush.bf16.msrb.mxu0 %v1370_v22  ;;  %v1217_v18 = vpop.permute.xlu0 %1216 }
 0x35d   :  { %5582 = vmatmul.msk.bf16.vlgmr.msra.gmra.mxu0 %vm177_vm1, %v1171_v10 }
 0x35e   :  { %1436 = vmatpush.bf16.msrb.mxu3 %v1427_v30 }
 0x35f   :  { %5585 = vmatmul.msk.bf16.vlgmr.msra.gmra.mxu3 %vm177_vm1, %v1240_v8 }
 0x360   :  { %1455 = vmatpush.bf16.msra.mxu0 %v1446_v37 }
 0x362   :  { %1512 = vmatpush.bf16.msra.mxu3 %v1503_v19 }
 0x363   :  { %v866_v21 = vpop.f32.mrf.mxu1  ;;  %v927_v45 = vpop.f32.mrf.mxu0 }
 0x364   :  { %v6876_v1 = vadd.f32 %v927_v45, %v6810_v23  ;;  %v1194_v58 = vpop.permute.xlu0 %1193  ;;  %5580 = vmatmul.msk.bf16.vlgmr.msrb.gmra.mxu2 %vm177_vm1, %v6816_v29 }
 0x365   :  { %5583 = vmatmul.msk.bf16.vlgmr.msra.gmra.mxu1 %vm177_vm1, %v1194_v58  ;;  %1417 = vmatpush.bf16.msrb.mxu2 %v1408_v17 }
 0x366   :  { %v6885_v2 = vpop.f32.mrf.mxu3  ;;  %1474 = vmatpush.bf16.msra.mxu1 %v1465_v27 }
 0x369   :  { %v6887_v28 = vpop.f32.mrf.mxu2 }
 0x36b   :  { %v929_v23 = vpop.f32.mrf.mxu0 }
 0x36e   :  { %v824_v14 = vpop.f32.mrf.mxu3 }
 0x371   :  { %v948_v35 = vpop.f32.mrf.mxu1  ;;  %v803_v29 = vpop.f32.mrf.mxu2 }
 0x372   :  { %v6894_v41 = vadd.f32 %v948_v35, %v6818_v33 }
 0x374   :  { %5584 = vmatmul.msk.bf16.vlgmr.msra.gmra.mxu2 %vm177_vm1, %v1217_v18 }
 0x375   :  { %1493 = vmatpush.bf16.msra.mxu2 %v1484_v42 }
 0x379   :  { %v950_v40 = vpop.f32.mrf.mxu1 }
 0x39d   :  { %v1032_v57 = vpop.f32.mrf.mxu1 }
 0x39e   :  { %v6899_v44 = vadd.f32 %v1032_v57, %v864_v43 }
 0x3a2   :  { %v906_v48 = vpop.f32.mrf.mxu3 }
 0x3a3   :  { %v6901_v6 = vpop.f32.mrf.mxu0 }
 0x3a5   :  { %v1034_v56 = vpop.f32.mrf.mxu1 }
 0x3aa   :  { %v908_v12 = vpop.f32.mrf.mxu3 }
 0x3ab   :  { %v1013_v50 = vpop.f32.mrf.mxu0 }
 0x3b2   :  { %v6903_v51 = vpop.f32.mrf.mxu3 }
 0x3b7   :  { %v885_v33 = vpop.f32.mrf.mxu2 }
 0x3ba   :  { %v992_v4 = vpop.f32.mrf.mxu3 }
 0x3bf   :  { %v887_v13 = vpop.f32.mrf.mxu2 }
 0x3c2   :  { %v1074_v49 = vpop.f32.mrf.mxu3 }
 0x3c3   :  { %v6905_v3 = vadd.f32 %v1074_v49, %v906_v48 }
 0x3c7   :  { %v6907_v52 = vpop.f32.mrf.mxu2 }
 0x3ca   :  { %v1097_v47 = vpop.f32.mrf.mxu0  ;;  %v1120_v22 = vpop.f32.mrf.mxu1 }
 0x3cb   :  { %v1076_v7 = vpop.f32.mrf.mxu3  ;;  %v1265_v55 = vsel %vm177_vm1, %v1120_v22, -inf  ;;  %v1262_v15 = vsel %vm177_vm1, %v1097_v47, -inf }
 0x3cc   :  { %1266 = vmax.xlane.f32.xlu2 %v1265_v55  ;;  %1263 = vmax.xlane.f32.xlu1 %v1262_v15 }
 0x3cf   :  { %v971_v16 = vpop.f32.mrf.mxu2 }
 0x3d2   :  { %v1099_v30 = vpop.f32.mrf.mxu0  ;;  %v1122_v61 = vpop.f32.mrf.mxu1 }
 0x3d3   :  { %v1166_v0 = vpop.f32.mrf.mxu3 }
 0x3d4   :  { %v1271_v43 = vsel %vm177_vm1, %v1166_v0, -inf }
 0x3d5   :  { %1272 = vmax.xlane.f32.xlu2 %v1271_v43 }
 0x3d7   :  { %v1053_v11 = vpop.f32.mrf.mxu2 }
 0x3d8   :  { %v6912_v10 = vadd.f32 %v1053_v11, %v885_v33 }
 0x3da   :  { %v1189_v18 = vpop.f32.mrf.mxu0 }
 0x3db   :  { %v1168_v37 = vpop.f32.mrf.mxu3  ;;  %v1274_v60 = vsel %vm177_vm1, %v1189_v18, -inf }
 0x3dc   :  { %1275 = vmax.xlane.f32.xlu1 %v1274_v60 }
 0x3df   :  { %v1055_v8 = vpop.f32.mrf.mxu2 }
 0x3e2   :  { %v1191_v19 = vpop.f32.mrf.mxu0  ;;  %v1212_v21 = vpop.f32.mrf.mxu1 }
 0x3e3   :  { %v1258_v45 = vpop.f32.mrf.mxu3  ;;  %v1277_v17 = vsel %vm177_vm1, %v1212_v21, -inf }
 0x3e4   :  { %1278 = vmax.xlane.f32.xlu0 %v1277_v17  ;;  %v1283_v58 = vsel %vm177_vm1, %v1258_v45, -inf }
 0x3e5   :  { %1284 = vmax.xlane.f32.xlu1 %v1283_v58 }
 0x3e7   :  { %v1143_v27 = vpop.f32.mrf.mxu2 }
 0x3e8   :  { %v1268_v14 = vsel %vm177_vm1, %v1143_v27, -inf }
 0x3ea   :  { %v1214_v23 = vpop.f32.mrf.mxu1 }
 0x3eb   :  { %v1260_v9 = vpop.f32.mrf.mxu3 }
 0x3ec   :  { %1269 = vmax.xlane.f32.xlu0 %v1268_v14 }
 0x3ef   :  { %v1145_v35 = vpop.f32.mrf.mxu2 }
 0x3f7   :  { %v1235_v29 = vpop.f32.mrf.mxu2 }
 0x3f8   :  { %v1280_v42 = vsel %vm177_vm1, %v1235_v29, -inf }
 0x3f9   :  { %1281 = vmax.xlane.f32.xlu2 %v1280_v42 }
 0x3fe   :  { %1528 = vrot.lane.b32.xlu1 %v6383_v25, %s6293_s12 }
 0x3ff   :  { %v1237_v40 = vpop.f32.mrf.mxu2 }
 0x400   :  { %1551 = vrot.lane.b32.xlu0 %v6392_v32, %s6293_s12 }
 0x408   :  { %1597 = vrot.lane.b32.xlu0 %v6411_v46, %s6293_s12 }
 0x411   :  { %1574 = vrot.lane.b32.xlu2 %v6402_v39, %s6293_s12 }
 0x43f   :  { %v1267_v57 = vpop.xlane.xlu2 %1266  ;;  %v1264_v48 = vpop.xlane.xlu1 %1263 }
 0x440   :  { %v1287_v56 = vsub.f32 %v1120_v22, %v1267_v57  ;;  %v1286_v12 = vsub.f32 %v1097_v47, %v1264_v48 }
 0x442   :  { %v1296_v50 = vmul.f32 1.442695, %v1287_v56  ;;  %v1294_v33 = vmul.f32 1.442695, %v1286_v12 }
 0x444   :  { %5919 = vpow2.f32 %v1296_v50 }
 0x445   :  { %5921 = vpow2.f32 %v1294_v33 }
 0x448   :  { %v1273_v4 = vpop.xlane.xlu2 %1272 }
 0x449   :  { %v1289_v13 = vsub.f32 %v1166_v0, %v1273_v4 }
 0x44a   :  { %v6927_v49 = vpop.eup %5919 }
 0x44b   :  { %v6929_v7 = vpop.eup %5921  ;;  %v1300_v55 = vmul.f32 1.442695, %v1289_v13  ;;  %v1313_v15 = vsel %vm177_vm1, %v6927_v49, 0.0 }
 0x44c   :  { %1314 = vadd.xlane.f32.xlu2 %v1313_v15  ;;  %v1310_v16 = vsel %vm177_vm1, %v6929_v7, 0.0 }
 0x44d   :  { %5923 = vpow2.f32 %v1300_v55  ;;  %1311 = vadd.xlane.f32.xlu0 %v1310_v16 }
 0x44f   :  { %v1276_v47 = vpop.xlane.xlu1 %1275 }
 0x450   :  { %v1290_v22 = vsub.f32 %v1189_v18, %v1276_v47 }
 0x452   :  { %v1302_v30 = vmul.f32 1.442695, %v1290_v22 }
 0x453   :  { %v6935_v61 = vpop.eup %5923 }
 0x454   :  { %5925 = vpow2.f32 %v1302_v30  ;;  %v1319_v0 = vsel %vm177_vm1, %v6935_v61, 0.0 }
 0x455   :  { %1320 = vadd.xlane.f32.xlu0 %v1319_v0 }
 0x457   :  { %v1279_v43 = vpop.xlane.xlu0 %1278 }
 0x458   :  { %v1291_v11 = vsub.f32 %v1212_v21, %v1279_v43  ;;  %v1285_v37 = vpop.xlane.xlu1 %1284 }
 0x459   :  { %v1293_v60 = vsub.f32 %v1258_v45, %v1285_v37 }
 0x45a   :  { %v6939_v8 = vpop.eup %5925  ;;  %v1304_v19 = vmul.f32 1.442695, %v1291_v11 }
 0x45b   :  { %v1308_v17 = vmul.f32 1.442695, %v1293_v60  ;;  %v1322_v58 = vsel %vm177_vm1, %v6939_v8, 0.0 }
 0x45c   :  { %5927 = vpow2.f32 %v1304_v19  ;;  %1323 = vadd.xlane.f32.xlu2 %v1322_v58 }
 0x45d   :  { %5929 = vpow2.f32 %v1308_v17 }
 0x45f   :  { %v1270_v18 = vpop.xlane.xlu0 %1269 }
 0x460   :  { %v1288_v23 = vsub.f32 %v1143_v27, %v1270_v18 }
 0x462   :  { %v6943_v9 = vpop.eup %5927  ;;  %v1298_v14 = vmul.f32 1.442695, %v1288_v23 }
 0x463   :  { %v6945_v35 = vpop.eup %5929  ;;  %v1325_v21 = vsel %vm177_vm1, %v6943_v9, 0.0 }
 0x464   :  { %5931 = vpow2.f32 %v1298_v14  ;;  %1326 = vadd.xlane.f32.xlu1 %v1325_v21  ;;  %v1331_v45 = vsel %vm177_vm1, %v6945_v35, 0.0 }
 0x465   :  { %1332 = vadd.xlane.f32.xlu2 %v1331_v45 }
 0x46a   :  { %v6951_v42 = vpop.eup %5931 }
 0x46b   :  { %v1316_v40 = vsel %vm177_vm1, %v6951_v42, 0.0 }
 0x46c   :  { %1317 = vadd.xlane.f32.xlu1 %v1316_v40  ;;  %v1282_v27 = vpop.xlane.xlu2 %1281 }
 0x46d   :  { %v1292_v57 = vsub.f32 %v1235_v29, %v1282_v27 }
 0x46f   :  { %v1306_v48 = vmul.f32 1.442695, %v1292_v57 }
 0x470   :  { %v1529_v13 = vpop.permute.xlu1 %1528 }
 0x471   :  { %5933 = vpow2.f32 %v1306_v48  ;;  %v1534_v15 = vsel %vm177_vm1, %v1529_v13, 0 }
 0x477   :  { %v6955_v56 = vpop.eup %5933 }
 0x478   :  { %v1328_v12 = vsel %vm177_vm1, %v6955_v56, 0.0 }
 0x479   :  { %1329 = vadd.xlane.f32.xlu0 %v1328_v12 }
 0x47d   :  { %1549 = vrot.lane.b32.xlu2 %v6392_v32, %s6294_s13  ;;  %v1575_v32 = vpop.permute.xlu2 %1574 }
 0x485   :  { %1620 = vrot.lane.b32.xlu2 %v6425_v54, %s6293_s12  ;;  %1526 = vrot.lane.b32.xlu1 %v6383_v25, %s6294_s13  ;;  %v1552_v25 = vpop.permute.xlu0 %1551 }
 0x48d   :  { %1689 = vrot.lane.b32.xlu2 %v6423_v53, %s6293_s12  ;;  %1595 = vrot.lane.b32.xlu1 %v6411_v46, %s6294_s13 }
 0x48e   :  { %1572 = vrot.lane.b32.xlu0 %v6402_v39, %s6294_s13  ;;  %v1598_v39 = vpop.permute.xlu0 %1597 }
 0x48f   :  { %v1603_v22 = vsel %vm177_vm1, %v1598_v39, 0 }
 0x495   :  { %1664 = vrot.lane.b32.xlu2 %v6400_v38, %s6294_s13  ;;  %1666 = vrot.lane.b32.xlu1 %v6400_v38, %s6293_s12 }
 0x496   :  { %1643 = vrot.lane.b32.xlu0 %v6436_v59, %s6293_s12 }
 0x49d   :  { %1641 = vrot.lane.b32.xlu1 %v6436_v59, %s6294_s13 }
 0x49e   :  { %1618 = vrot.lane.b32.xlu0 %v6425_v54, %s6294_s13 }
 0x4a6   :  { %1687 = vrot.lane.b32.xlu0 %v6423_v53, %s6294_s13  ;;  %v1557_v53 = vsel %vm177_vm1, %v1552_v25, 0 }
 0x4bf   :  { %v1315_v46 = vpop.xlane.xlu2 %1314 }
 0x4c0   :  { %5935 = vrcp.f32 %v1315_v46  ;;  %v1312_v29 = vpop.xlane.xlu0 %1311 }
 0x4c1   :  { %5937 = vrcp.f32 %v1312_v29 }
 0x4c6   :  { %v5936_v38 = vpop.eup %5935 }
 0x4c7   :  { %v5938_v50 = vpop.eup %5937  ;;  %v1343_v33 = vmul.f32 %v5936_v38, %v6927_v49 }
 0x4c8   :  { %v1342_v4 = vmul.f32 %v5938_v50, %v6929_v7  ;;  %v1321_v59 = vpop.xlane.xlu0 %1320 }
 0x4c9   :  { %v1351_v55 = vpack.c.bf16 %v1343_v33, %v1343_v33  ;;  %5939 = vrcp.f32 %v1321_v59 }
 0x4ca   :  { %v1350_v54 = vpack.c.bf16 %v1342_v4, %v1342_v4 }
 0x4cb   :  { %5587 = vmatmul.msk.bf16.vlgmr.msrb.gmra.mxu1 %vm177_vm1, %v1351_v55 }
 0x4cc   :  { %5586 = vmatmul.msk.bf16.vlgmr.msrb.gmra.mxu0 %vm177_vm1, %v1350_v54  ;;  %1566 = vmatpush.bf16.xpose.msrb.mxu1 %v1557_v53 }
 0x4cd   :  { %1543 = vmatpush.bf16.xpose.msrb.mxu0 %v1534_v15 }
 0x4cf   :  { %v5940_v16 = vpop.eup %5939  ;;  %v1324_v47 = vpop.xlane.xlu2 %1323 }
 0x4d0   :  { %v1345_v49 = vmul.f32 %v5940_v16, %v6935_v61  ;;  %5941 = vrcp.f32 %v1324_v47 }
 0x4d2   :  { %v1353_v7 = vpack.c.bf16 %v1345_v49, %v1345_v49  ;;  %v991_v49 = vadd.f32 %v6903_v51, %v6885_v2  ;;  %v970_v51 = vadd.f32 %v6907_v52, %v6887_v28 }
 0x4d4   :  { %5589 = vmatmul.msk.bf16.vlgmr.msrb.gmra.mxu3 %vm177_vm1, %v1353_v7 }
 0x4d5   :  { %1612 = vmatpush.bf16.xpose.msrb.mxu3 %v1603_v22  ;;  %v1012_v22 = vadd.f32 %v6901_v6, %v6844_v20 }
 0x4d6   :  { %v5942_v30 = vpop.eup %5941 }
 0x4d7   :  { %v1346_v0 = vmul.f32 %v5942_v30, %v6939_v8  ;;  %v1327_v43 = vpop.xlane.xlu1 %1326 }
 0x4d8   :  { %5943 = vrcp.f32 %v1327_v43  ;;  %v1333_v11 = vpop.xlane.xlu2 %1332 }
 0x4d9   :  { %v1354_v37 = vpack.c.bf16 %v1346_v0, %v1346_v0  ;;  %5945 = vrcp.f32 %v1333_v11 }
 0x4dc   :  { %5590 = vmatmul.msk.bf16.vlgmr.msra.gmra.mxu0 %vm177_vm1, %v1354_v37 }
 0x4de   :  { %v5944_v60 = vpop.eup %5943 }
 0x4df   :  { %v5946_v19 = vpop.eup %5945  ;;  %v1347_v61 = vmul.f32 %v5944_v60, %v6943_v9  ;;  %v1318_v17 = vpop.xlane.xlu1 %1317  ;;  %v1580_v9 = vsel %vm177_vm1, %v1575_v32, 0 }
 0x4e0   :  { %v1349_v58 = vmul.f32 %v5946_v19, %v6945_v35  ;;  %5947 = vrcp.f32 %v1318_v17  ;;  %v1550_v18 = vpop.permute.xlu2 %1549 }
 0x4e1   :  { %v1355_v23 = vpack.c.bf16 %v1347_v61, %v1347_v61 }
 0x4e2   :  { %v1357_v14 = vpack.c.bf16 %v1349_v58, %v1349_v58 }
 0x4e3   :  { %5591 = vmatmul.msk.bf16.vlgmr.msra.gmra.mxu1 %vm177_vm1, %v1355_v23 }
 0x4e4   :  { %5593 = vmatmul.msk.bf16.vlgmr.msra.gmra.mxu3 %vm177_vm1, %v1357_v14 }
 0x4e6   :  { %v5948_v8 = vpop.eup %5947 }
 0x4e7   :  { %v1344_v21 = vmul.f32 %v5948_v8, %v6951_v42 }
 0x4e8   :  { %v1621_v45 = vpop.permute.xlu2 %1620 }
 0x4e9   :  { %v1352_v40 = vpack.c.bf16 %v1344_v21, %v1344_v21  ;;  %v1626_v27 = vsel %vm177_vm1, %v1621_v45, 0 }
 0x4ea   :  { %1635 = vmatpush.bf16.xpose.msra.mxu0 %v1626_v27 }
 0x4eb   :  { %5588 = vmatmul.msk.bf16.vlgmr.msrb.gmra.mxu2 %vm177_vm1, %v1352_v40 }
 0x4ec   :  { %1589 = vmatpush.bf16.xpose.msrb.mxu2 %v1580_v9  ;;  %v1330_v35 = vpop.xlane.xlu0 %1329 }
 0x4ed   :  { %5949 = vrcp.f32 %v1330_v35 }
 0x4f0   :  { %v1690_v57 = vpop.permute.xlu2 %1689 }
 0x4f1   :  { %v1695_v48 = vsel %vm177_vm1, %v1690_v57, 0 }
 0x4f2   :  { %1704 = vmatpush.bf16.xpose.msra.mxu3 %v1695_v48 }
 0x4f3   :  { %v5950_v12 = vpop.eup %5949  ;;  %5595 = vmatmul.msk.bf16.vlgmr.msrb.gmra.mxu1 %vm177_vm1, %v1550_v18 }
 0x4f4   :  { %v1348_v42 = vmul.f32 %v5950_v12, %v6955_v56 }
 0x4f6   :  { %v1356_v39 = vpack.c.bf16 %v1348_v42, %v1348_v42 }
 0x4f7   :  { %v1527_v25 = vpop.permute.xlu1 %1526 }
 0x4f8   :  { %5594 = vmatmul.msk.bf16.vlgmr.msrb.gmra.mxu0 %vm177_vm1, %v1527_v25  ;;  %v1665_v13 = vpop.permute.xlu2 %1664 }
 0x4fb   :  { %5592 = vmatmul.msk.bf16.vlgmr.msra.gmra.mxu2 %vm177_vm1, %v1356_v39 }
 0x4ff   :  { %v1596_v32 = vpop.permute.xlu1 %1595 }
 0x500   :  { %5597 = vmatmul.msk.bf16.vlgmr.msrb.gmra.mxu3 %vm177_vm1, %v1596_v32  ;;  %v1573_v46 = vpop.permute.xlu0 %1572 }
 0x507   :  { %v1667_v29 = vpop.permute.xlu1 %1666 }
 0x508   :  { %v1672_v38 = vsel %vm177_vm1, %v1667_v29, 0  ;;  %v1644_v50 = vpop.permute.xlu0 %1643 }
 0x509   :  { %v1649_v33 = vsel %vm177_vm1, %v1644_v50, 0  ;;  %1681 = vmatpush.bf16.xpose.msra.mxu2 %v1672_v38 }
 0x50a   :  { %1658 = vmatpush.bf16.xpose.msra.mxu1 %v1649_v33  ;;  %v1831_v33 = vunpack.c.l.b16 %v6827_v34  ;;  %v1903_v34 = vunpack.c.l.b16 %v6857_v63 }
 0x50b   :  { %5596 = vmatmul.msk.bf16.vlgmr.msrb.gmra.mxu2 %vm177_vm1, %v1573_v46 }
 0x50f   :  { %v1642_v56 = vpop.permute.xlu1 %1641 }
 0x510   :  { %v1619_v4 = vpop.permute.xlu0 %1618 }
 0x511   :  { %5598 = vmatmul.msk.bf16.vlgmr.msra.gmra.mxu0 %vm177_vm1, %v1619_v4  ;;  %5599 = vmatmul.msk.bf16.vlgmr.msra.gmra.mxu1 %vm177_vm1, %v1642_v56  ;;  %v1832_v56 = vpack.c.b16 %v1831_v33, %v1831_v33  ;;  %v1879_v4 = vunpack.c.l.b16 %v6841_v31 }
 0x518   :  { %v1688_v59 = vpop.permute.xlu0 %1687 }
 0x519   :  { %5601 = vmatmul.msk.bf16.vlgmr.msra.gmra.mxu3 %vm177_vm1, %v1688_v59  ;;  %v1807_v59 = vunpack.c.l.b16 %v6838_v36 }
 0x51b   :  { %5600 = vmatmul.msk.bf16.vlgmr.msra.gmra.mxu2 %vm177_vm1, %v1665_v13  ;;  %v1855_v13 = vunpack.c.l.b16 %v6871_v24 }
 0x548   :  { %v1400_v55 = vpop.f32.mrf.mxu1 }
 0x549   :  { %v1381_v54 = vpop.f32.mrf.mxu0  ;;  %v7016_v53 = vadd.f32 %v1400_v55, %v6894_v41  ;;  %v1880_v55 = vpack.c.b16 %v1879_v4, %v1879_v4 }
 0x54a   :  { %v7019_v15 = vadd.f32 %v1381_v54, %v6876_v1  ;;  %v1808_v54 = vpack.c.b16 %v1807_v59, %v1807_v59 }
 0x550   :  { %v1402_v16 = vpop.f32.mrf.mxu1 }
 0x551   :  { %v1383_v47 = vpop.f32.mrf.mxu0  ;;  %v1856_v16 = vpack.c.b16 %v1855_v13, %v1855_v13 }
 0x552   :  { %v1904_v47 = vpack.c.b16 %v1903_v34, %v1903_v34 }
 0x557   :  { %v1438_v7 = vpop.f32.mrf.mxu3 }
 0x558   :  { %v7025_v30 = vadd.f32 %v1438_v7, %v991_v49 }
 0x559   :  { %v1457_v0 = vpop.f32.mrf.mxu0 }
 0x55a   :  { %v7027_v43 = vadd.f32 %v1457_v0, %v1012_v22 }
 0x55f   :  { %v1440_v11 = vpop.f32.mrf.mxu3 }
 0x560   :  { %v1476_v41 = vpop.f32.mrf.mxu1 }
 0x561   :  { %v1459_v37 = vpop.f32.mrf.mxu0  ;;  %v7030_v1 = vadd.f32 %v1476_v41, %v6899_v44 }
 0x567   :  { %v1514_v60 = vpop.f32.mrf.mxu3 }
 0x568   :  { %v7033_v19 = vadd.f32 %v1514_v60, %v6905_v3  ;;  %v1478_v2 = vpop.f32.mrf.mxu1 }
 0x56e   :  { %v1419_v20 = vpop.f32.mrf.mxu2 }
 0x56f   :  { %v7037_v6 = vadd.f32 %v1419_v20, %v970_v51  ;;  %v1516_v61 = vpop.f32.mrf.mxu3 }
 0x570   :  { %v1568_v17 = vpop.f32.mrf.mxu1 }
 0x571   :  { %v1713_v58 = vsel %vm177_vm1, %v1568_v17, -inf }
 0x572   :  { %1714 = vmax.xlane.f32.xlu2 %v1713_v58 }
 0x575   :  { %v1545_v18 = vpop.f32.mrf.mxu0 }
 0x576   :  { %v1421_v23 = vpop.f32.mrf.mxu2  ;;  %v1710_v44 = vsel %vm177_vm1, %v1545_v18, -inf }
 0x577   :  { %1711 = vmax.xlane.f32.xlu1 %v1710_v44 }
 0x578   :  { %v1570_v14 = vpop.f32.mrf.mxu1 }
 0x57d   :  { %v1547_v3 = vpop.f32.mrf.mxu0 }
 0x57e   :  { %v1495_v8 = vpop.f32.mrf.mxu2 }
 0x57f   :  { %v7042_v21 = vadd.f32 %v1495_v8, %v6912_v10 }
 0x583   :  { %v7044_v28 = vpop.f32.mrf.mxu3 }
 0x584   :  { %v1719_v52 = vsel %vm177_vm1, %v7044_v28, -inf }
 0x585   :  { %1720 = vmax.xlane.f32.xlu1 %v1719_v52 }
 0x586   :  { %v1497_v45 = vpop.f32.mrf.mxu2 }
 0x58b   :  { %v1616_v40 = vpop.f32.mrf.mxu3 }
 0x58e   :  { %v7048_v27 = vpop.f32.mrf.mxu2  ;;  %v1637_v9 = vpop.f32.mrf.mxu0 }
 0x58f   :  { %v1660_v35 = vpop.f32.mrf.mxu1  ;;  %v1722_v57 = vsel %vm177_vm1, %v1637_v9, -inf  ;;  %v1716_v25 = vsel %vm177_vm1, %v7048_v27, -inf }
 0x590   :  { %1723 = vmax.xlane.f32.xlu2 %v1722_v57  ;;  %v1725_v48 = vsel %vm177_vm1, %v1660_v35, -inf }
 0x591   :  { %1726 = vmax.xlane.f32.xlu0 %v1725_v48 }
 0x596   :  { %v1593_v10 = vpop.f32.mrf.mxu2  ;;  %v1639_v12 = vpop.f32.mrf.mxu0 }
 0x597   :  { %v1662_v42 = vpop.f32.mrf.mxu1 }
 0x599   :  { %1717 = vmax.xlane.f32.xlu0 %v1716_v25  ;;  %v1951_v25 = vunpack.c.l.b16 %v6891_v62  ;;  %v1975_v62 = vunpack.c.l.b16 %v6859_v26 }
 0x59c   :  { %v1706_v39 = vpop.f32.mrf.mxu3 }
 0x59d   :  { %v1731_v32 = vsel %vm177_vm1, %v1706_v39, -inf }
 0x59e   :  { %v7055_v46 = vpop.f32.mrf.mxu2  ;;  %1732 = vmax.xlane.f32.xlu2 %v1731_v32 }
 0x59f   :  { %v1728_v29 = vsel %vm177_vm1, %v7055_v46, -inf }
 0x5a0   :  { %1729 = vmax.xlane.f32.xlu1 %v1728_v29 }
 0x5a4   :  { %v1708_v38 = vpop.f32.mrf.mxu3 }
 0x5a5   :  { %v1952_v38 = vpack.c.b16 %v1951_v25, %v1951_v25 }
 0x5a6   :  { %v1685_v50 = vpop.f32.mrf.mxu2 }
 0x5ad   :  { %1833 = vrot.lane.b32.xlu0 %v1832_v56, %s6286_s25 }
 0x5b5   :  { %1881 = vrot.lane.b32.xlu0 %v1880_v55, %s6286_s25  ;;  %v1927_v55 = vunpack.c.l.b16 %v6873_v5 }
 0x5b6   :  { %1809 = vrot.lane.b32.xlu2 %v1808_v54, %s6286_s25 }
 0x5b7   :  { %v1928_v34 = vpack.c.b16 %v1927_v55, %v1927_v55 }
 0x5b9   :  { %1857 = vrot.lane.b32.xlu1 %v1856_v16, %s6286_s25  ;;  %v1976_v16 = vpack.c.b16 %v1975_v62, %v1975_v62 }
 0x5c1   :  { %1905 = vrot.lane.b32.xlu1 %v1904_v47, %s6286_s25 }
 0x5e5   :  { %v1715_v49 = vpop.xlane.xlu2 %1714 }
 0x5e6   :  { %v1735_v31 = vsub.f32 %v1568_v17, %v1715_v49 }
 0x5e8   :  { %v1744_v7 = vmul.f32 1.442695, %v1735_v31 }
 0x5ea   :  { %5951 = vpow2.f32 %v1744_v7  ;;  %v1712_v36 = vpop.xlane.xlu1 %1711 }
 0x5eb   :  { %v1734_v24 = vsub.f32 %v1545_v18, %v1712_v36 }
 0x5ed   :  { %v1742_v22 = vmul.f32 1.442695, %v1734_v24 }
 0x5ef   :  { %5953 = vpow2.f32 %v1742_v22 }
 0x5f0   :  { %v7069_v0 = vpop.eup %5951 }
 0x5f1   :  { %v1761_v11 = vsel %vm177_vm1, %v7069_v0, 0.0 }
 0x5f2   :  { %1762 = vadd.xlane.f32.xlu1 %v1761_v11 }
 0x5f5   :  { %v7073_v41 = vpop.eup %5953 }
 0x5f6   :  { %v1758_v63 = vsel %vm177_vm1, %v7073_v41, 0.0 }
 0x5f7   :  { %1759 = vadd.xlane.f32.xlu0 %v1758_v63 }
 0x5f8   :  { %v1721_v17 = vpop.xlane.xlu1 %1720 }
 0x5f9   :  { %v1737_v14 = vsub.f32 %v7044_v28, %v1721_v17 }
 0x603   :  { %v1724_v37 = vpop.xlane.xlu2 %1723 }
 0x604   :  { %v1738_v60 = vsub.f32 %v1637_v9, %v1724_v37  ;;  %v1727_v2 = vpop.xlane.xlu0 %1726  ;;  %v1748_v9 = vmul.f32 1.442695, %v1737_v14 }
 0x605   :  { %v1739_v51 = vsub.f32 %v1660_v35, %v1727_v2 }
 0x606   :  { %v1750_v20 = vmul.f32 1.442695, %v1738_v60 }
 0x607   :  { %v1752_v61 = vmul.f32 1.442695, %v1739_v51 }
 0x608   :  { %5955 = vpow2.f32 %v1750_v20 }
 0x609   :  { %5957 = vpow2.f32 %v1752_v61 }
 0x60c   :  { %v1718_v58 = vpop.xlane.xlu0 %1717 }
 0x60d   :  { %v1736_v18 = vsub.f32 %v7048_v27, %v1718_v58 }
 0x60e   :  { %v7078_v23 = vpop.eup %5955 }
 0x60f   :  { %v7080_v44 = vpop.eup %5957  ;;  %v1746_v3 = vmul.f32 1.442695, %v1736_v18  ;;  %v1770_v8 = vsel %vm177_vm1, %v7078_v23, 0.0 }
 0x610   :  { %1771 = vadd.xlane.f32.xlu2 %v1770_v8  ;;  %v1773_v52 = vsel %vm177_vm1, %v7080_v44, 0.0 }
 0x611   :  { %5959 = vpow2.f32 %v1746_v3  ;;  %1774 = vadd.xlane.f32.xlu0 %v1773_v52  ;;  %v1733_v45 = vpop.xlane.xlu2 %1732 }
 0x612   :  { %v1741_v40 = vsub.f32 %v1706_v39, %v1733_v45 }
 0x613   :  { %v1730_v50 = vpop.xlane.xlu1 %1729 }
 0x614   :  { %v1756_v27 = vmul.f32 1.442695, %v1741_v40  ;;  %v1740_v47 = vsub.f32 %v7055_v46, %v1730_v50 }
 0x616   :  { %5961 = vpow2.f32 %v1756_v27  ;;  %v1754_v49 = vmul.f32 1.442695, %v1740_v47 }
 0x617   :  { %v7087_v35 = vpop.eup %5959  ;;  %5963 = vpow2.f32 %v1748_v9 }
 0x618   :  { %v1764_v28 = vsel %vm177_vm1, %v7087_v35, 0.0  ;;  %5965 = vpow2.f32 %v1754_v49 }
 0x619   :  { %1765 = vadd.xlane.f32.xlu1 %v1764_v28  ;;  %v1810_v57 = vpop.permute.xlu2 %1809 }
 0x61a   :  { %v1815_v48 = vsel %vm746_vm2, %v1810_v57, 0 }
 0x61b   :  { %1824 = vmatpush.bf16.msrb.mxu0 %v1815_v48 }
 0x61c   :  { %v7092_v10 = vpop.eup %5961 }
 0x61d   :  { %v7094_v12 = vpop.eup %5963  ;;  %v1779_v42 = vsel %vm177_vm1, %v7092_v10, 0.0 }
 0x61e   :  { %1780 = vadd.xlane.f32.xlu2 %v1779_v42  ;;  %v1767_v29 = vsel %vm177_vm1, %v7094_v12, 0.0  ;;  %v5966_v31 = vpop.eup %5965 }
 0x61f   :  { %v1834_v39 = vpop.permute.xlu0 %1833  ;;  %v1776_v7 = vsel %vm177_vm1, %v5966_v31, 0.0 }
 0x620   :  { %v1839_v32 = vsel %vm746_vm2, %v1834_v39, 0 }
 0x621   :  { %1768 = vadd.xlane.f32.xlu1 %v1767_v29  ;;  %1848 = vmatpush.bf16.msrb.mxu1 %v1839_v32 }
 0x625   :  { %1953 = vrot.lane.b32.xlu0 %v1952_v38, %s6286_s25  ;;  %v7130_v38 = vld [vmem:[#allocation5 + $0x1] ss:$0 sm:$0xff] }
 0x627   :  { %v1882_v33 = vpop.permute.xlu0 %1881 }
 0x628   :  { %v1887_v56 = vsel %vm746_vm2, %v1882_v33, 0 }
 0x629   :  { %1896 = vmatpush.bf16.msrb.mxu3 %v1887_v56  ;;  %v6194_v56 = vld [vmem:[%s8686_s0 + $0x8] sm:$0xff] }
 0x62b   :  { %v1858_v4 = vpop.permute.xlu1 %1857 }
 0x62c   :  { %v1863_v59 = vsel %vm746_vm2, %v1858_v4, 0 }
 0x62d   :  { %1872 = vmatpush.bf16.msrb.mxu2 %v1863_v59 }
 0x633   :  { %v1906_v13 = vpop.permute.xlu1 %1905 }
 0x634   :  { %v1911_v54 = vsel %vm746_vm2, %v1906_v13, 0 }
 0x635   :  { %1920 = vmatpush.bf16.msra.mxu0 %v1911_v54 }
 0x636   :  { %1977 = vrot.lane.b32.xlu2 %v1976_v16, %s6286_s25 }
 0x63a   :  { %1929 = vrot.lane.b32.xlu1 %v1928_v34, %s6286_s25 }
 0x664   :  { %1777 = vadd.xlane.f32.xlu1 %v1776_v7 }
 0x665   :  { %v1763_v26 = vpop.xlane.xlu1 %1762 }
 0x666   :  { %5967 = vrcp.f32 %v1763_v26 }
 0x66a   :  { %v1760_v5 = vpop.xlane.xlu0 %1759 }
 0x66b   :  { %5969 = vrcp.f32 %v1760_v5 }
 0x66c   :  { %v5968_v36 = vpop.eup %5967 }
 0x66d   :  { %v1791_v24 = vmul.f32 %v5968_v36, %v7069_v0 }
 0x66f   :  { %v1799_v22 = vpack.c.bf16 %v1791_v24, %v1791_v24 }
 0x671   :  { %v5970_v11 = vpop.eup %5969  ;;  %5603 = vmatmul.msk.bf16.vlgmr.msrb.gmra.mxu1 %vm177_vm1, %v1799_v22 }
 0x672   :  { %v1790_v63 = vmul.f32 %v5970_v11, %v7073_v41 }
 0x674   :  { %v1798_v46 = vpack.c.bf16 %v1790_v63, %v1790_v63 }
 0x676   :  { %5602 = vmatmul.msk.bf16.vlgmr.msrb.gmra.mxu0 %vm177_vm1, %v1798_v46 }
 0x683   :  { %v1772_v37 = vpop.xlane.xlu2 %1771 }
 0x684   :  { %5971 = vrcp.f32 %v1772_v37  ;;  %v1775_v61 = vpop.xlane.xlu0 %1774 }
 0x68a   :  { %v5972_v60 = vpop.eup %5971 }
 0x68b   :  { %v1794_v2 = vmul.f32 %v5972_v60, %v7078_v23 }
 0x68c   :  { %v1766_v51 = vpop.xlane.xlu1 %1765 }
 0x68d   :  { %v1802_v20 = vpack.c.bf16 %v1794_v2, %v1794_v2  ;;  %5973 = vrcp.f32 %v1766_v51 }
 0x68f   :  { %5606 = vmatmul.msk.bf16.vlgmr.msra.gmra.mxu0 %vm177_vm1, %v1802_v20 }
 0x691   :  { %v1781_v0 = vpop.xlane.xlu2 %1780 }
 0x693   :  { %v5974_v17 = vpop.eup %5973 }
 0x694   :  { %v1792_v58 = vmul.f32 %v5974_v17, %v7087_v35  ;;  %v1769_v18 = vpop.xlane.xlu1 %1768 }
 0x695   :  { %5975 = vrcp.f32 %v1769_v18 }
 0x696   :  { %v1800_v41 = vpack.c.bf16 %v1792_v58, %v1792_v58  ;;  %5977 = vrcp.f32 %v1781_v0 }
 0x697   :  { %v1954_v14 = vpop.permute.xlu0 %1953  ;;  %5979 = vrcp.f32 %v1775_v61 }
 0x698   :  { %v1959_v3 = vsel %vm746_vm2, %v1954_v14, 0  ;;  %5604 = vmatmul.msk.bf16.vlgmr.msrb.gmra.mxu2 %vm177_vm1, %v1800_v41 }
 0x699   :  { %1968 = vmatpush.bf16.msra.mxu2 %v1959_v3  ;;  %v1978_v23 = vpop.permute.xlu2 %1977 }
 0x69a   :  { %v1983_v8 = vsel %vm746_vm2, %v1978_v23, 0 }
 0x69b   :  { %v5976_v52 = vpop.eup %5975  ;;  %1992 = vmatpush.bf16.msra.mxu3 %v1983_v8 }
 0x69c   :  { %v1793_v45 = vmul.f32 %v5976_v52, %v7094_v12  ;;  %v5978_v9 = vpop.eup %5977 }
 0x69d   :  { %v5980_v27 = vpop.eup %5979  ;;  %v1797_v35 = vmul.f32 %v5978_v9, %v7092_v10  ;;  %v6295_v9 = vmov 32.0  }
 0x69e   :  { %v1801_v40 = vpack.c.bf16 %v1793_v45, %v1793_v45  ;;  %v1795_v28 = vmul.f32 %v5980_v27, %v7080_v44 }
 0x69f   :  { %v1805_v42 = vpack.c.bf16 %v1797_v35, %v1797_v35 }
 0x6a0   :  { %5605 = vmatmul.msk.bf16.vlgmr.msrb.gmra.mxu3 %vm177_vm1, %v1801_v40  ;;  %v1803_v25 = vpack.c.bf16 %v1795_v28, %v1795_v28 }
 0x6ac   :  { %v1930_v57 = vpop.permute.xlu1 %1929 }
 0x6ad   :  { %v1935_v48 = vsel %vm746_vm2, %v1930_v57, 0 }
 0x6ae   :  { %1944 = vmatpush.bf16.msra.mxu1 %v1935_v48 }
 0x6b0   :  { %5609 = vmatmul.msk.bf16.vlgmr.msra.gmra.mxu3 %vm177_vm1, %v1805_v42 }
 0x6b1   :  { %5607 = vmatmul.msk.bf16.vlgmr.msra.gmra.mxu1 %vm177_vm1, %v1803_v25 }
 0x6d7   :  { %v1778_v12 = vpop.xlane.xlu1 %1777 }
 0x6d8   :  { %5981 = vrcp.f32 %v1778_v12 }
 0x6d9   :  { %5983 = vrcp.f32 %v6295_v9 }
 0x6de   :  { %v5982_v39 = vpop.eup %5981 }
 0x6df   :  { %v1796_v32 = vmul.f32 %v5982_v39, %v5966_v31  ;;  %v6196_v31 = vld [vmem:[%s8686_s0 + $0x20] sm:$0xff] }
 0x6e1   :  { %v1804_v29 = vpack.c.bf16 %v1796_v32, %v1796_v32 }
 0x6e3   :  { %5608 = vmatmul.msk.bf16.vlgmr.msra.gmra.mxu2 %vm177_vm1, %v1804_v29  ;;  %v6201_v29 = vld [vmem:[%s8686_s0 + $0x30] sm:$0xff] }
 0x6ee   :  { %v1850_v10 = vpop.f32.mrf.mxu1 }
 0x6ef   :  { %v1999_v44 = vadd.f32 %v1850_v10, %v7016_v53  ;;  %v6195_v53 = vld [vmem:[%s8686_s0] sm:$0xff] }
 0x6f1   :  { %v2008_v50 = vadd.f32 %v7130_v38, %v1999_v44 }
 0x6f3   :  { %v1826_v33 = vpop.f32.mrf.mxu0  ;;  %v7137_v4 = vadd.f32 %v6194_v56, %v2008_v50 }
 0x6f4   :  { %v1998_v59 = vadd.f32 %v1826_v33, %v7019_v15 }
 0x6f5   :  { %v2028_v62 = vsel %vm93_vm0, %v7137_v4, 0.0 }
 0x6f6   :  { %v2007_v13 = vadd.f32 %v7130_v38, %v1998_v59  ;;  %2029 = vadd.xlane.f32.xlu2 %v2028_v62  ;;  %v1852_v55 = vpop.f32.mrf.mxu1 }
 0x6f8   :  { %v7146_v54 = vadd.f32 %v6195_v53, %v2007_v13  ;;  %v5616_v53 = vld [vmem:[%s8687_s1 + $0x2c] sm:$0xf] }
 0x6fa   :  { %v2025_v16 = vsel %vm93_vm0, %v7146_v54, 0.0 }
 0x6fb   :  { %2026 = vadd.xlane.f32.xlu0 %v2025_v16  ;;  %v1828_v34 = vpop.f32.mrf.mxu0  ;;  %v5809_v16 = vld [vmem:[%s8687_s1 + $0x3c] sm:$0xf0] }
 0x6fc   :  { %v5617_v34 = vor.u32 %v5809_v16, %v5616_v53 }
 0x70c   :  { %v1922_v47 = vpop.f32.mrf.mxu0 }
 0x70d   :  { %v2002_v15 = vadd.f32 %v1922_v47, %v7027_v43  ;;  %v6197_v43 = vld [vmem:[%s8686_s0 + $0x10] sm:$0xff] }
 0x70f   :  { %v2011_v49 = vadd.f32 %v7130_v38, %v2002_v15 }
 0x711   :  { %v7155_v7 = vadd.f32 %v6196_v31, %v2011_v49 }
 0x713   :  { %v2037_v26 = vsel %vm93_vm0, %v7155_v7, 0.0 }
 0x714   :  { %2038 = vadd.xlane.f32.xlu1 %v2037_v26  ;;  %v1924_v5 = vpop.f32.mrf.mxu0 }
 0x71b   :  { %v1874_v36 = vpop.f32.mrf.mxu2 }
 0x71c   :  { %v2000_v24 = vadd.f32 %v1874_v36, %v7037_v6  ;;  %v6198_v6 = vld [vmem:[%s8686_s0 + $0x18] sm:$0xff] }
 0x71e   :  { %v2009_v22 = vadd.f32 %v7130_v38, %v2000_v24 }
 0x720   :  { %v7164_v11 = vadd.f32 %v6197_v43, %v2009_v22 }
 0x722   :  { %v2031_v63 = vsel %vm93_vm0, %v7164_v11, 0.0 }
 0x723   :  { %v1876_v46 = vpop.f32.mrf.mxu2  ;;  %v1898_v37 = vpop.f32.mrf.mxu3  ;;  %2032 = vadd.xlane.f32.xlu1 %v2031_v63 }
 0x724   :  { %v2001_v60 = vadd.f32 %v1898_v37, %v7025_v30  ;;  %v6199_v30 = vld [vmem:[%s8686_s0 + $0x28] sm:$0xff] }
 0x726   :  { %v2010_v2 = vadd.f32 %v7130_v38, %v2001_v60 }
 0x728   :  { %v7173_v51 = vadd.f32 %v6198_v6, %v2010_v2 }
 0x72a   :  { %v2034_v20 = vsel %vm93_vm0, %v7173_v51, 0.0 }
 0x72b   :  { %v1900_v61 = vpop.f32.mrf.mxu3  ;;  %2035 = vadd.xlane.f32.xlu1 %v2034_v20 }
 0x72e   :  { %v1946_v0 = vpop.f32.mrf.mxu1 }
 0x72f   :  { %v2003_v17 = vadd.f32 %v1946_v0, %v7030_v1  ;;  %v6200_v1 = vld [vmem:[%s8686_s0 + $0x38] sm:$0xff] }
 0x731   :  { %v2012_v58 = vadd.f32 %v7130_v38, %v2003_v17 }
 0x733   :  { %v1994_v18 = vpop.f32.mrf.mxu3  ;;  %v2020_v41 = vadd.f32 %v6199_v30, %v2012_v58 }
 0x734   :  { %v2005_v14 = vadd.f32 %v1994_v18, %v7033_v19  ;;  %v5984_v19 = vpop.eup %5983 }
 0x735   :  { %v2040_v3 = vsel %vm93_vm0, %v2020_v41, 0.0  ;;  %v2050_v27 = vmul.f32 32.0, %v5984_v19  ;;  %vm2054_vm3 = vweird.f32 %v5984_v19 }
 0x736   :  { %v2014_v23 = vadd.f32 %v7130_v38, %v2005_v14  ;;  %2041 = vadd.xlane.f32.xlu1 %v2040_v3  ;;  %v1948_v8 = vpop.f32.mrf.mxu1 }
 0x737   :  { %v2051_v35 = vsub.f32 1.0, %v2050_v27 }
 0x738   :  { %v7188_v52 = vadd.f32 %v6200_v1, %v2014_v23 }
 0x739   :  { %v2052_v28 = vmul.f32 %v5984_v19, %v2051_v35 }
 0x73a   :  { %v2046_v45 = vsel %vm93_vm0, %v7188_v52, 0.0 }
 0x73b   :  { %v1996_v40 = vpop.f32.mrf.mxu3  ;;  %2047 = vadd.xlane.f32.xlu0 %v2046_v45  ;;  %v2053_v57 = vadd.f32 %v5984_v19, %v2052_v28 }
 0x73d   :  { %v7193_v25 = vsel %vm2054_vm3, %v5984_v19, %v2053_v57 }
 0x766   :  { %v1970_v48 = vpop.f32.mrf.mxu2 }
 0x767   :  { %v2004_v42 = vadd.f32 %v1970_v48, %v7042_v21 }
 0x769   :  { %v2013_v12 = vadd.f32 %v7130_v38, %v2004_v42  ;;  %v2030_v39 = vpop.xlane.xlu2 %2029 }
 0x76a   :  { %v2057_v32 = vmul.f32 %v7193_v25, %v2030_v39 }
 0x76b   :  { %v2021_v10 = vadd.f32 %v6201_v29, %v2013_v12 }
 0x76c   :  { %v7201_v44 = vsub.f32 %v7137_v4, %v2057_v32 }
 0x76d   :  { %v2043_v50 = vsel %vm93_vm0, %v2021_v10, 0.0 }
 0x76e   :  { %v1972_v33 = vpop.f32.mrf.mxu2  ;;  %2044 = vadd.xlane.f32.xlu2 %v2043_v50  ;;  %v2027_v21 = vpop.xlane.xlu0 %2026  ;;  %v2073_v56 = vmul.f32 %v7201_v44, %v7201_v44 }
 0x76f   :  { %v2056_v38 = vmul.f32 %v7193_v25, %v2027_v21 }
 0x770   :  { %v2083_v59 = vsel %vm93_vm0, %v2073_v56, 0.0 }
 0x771   :  { %v7209_v62 = vsub.f32 %v7146_v54, %v2056_v38  ;;  %2084 = vadd.xlane.f32.xlu1 %v2083_v59 }
 0x773   :  { %v2072_v4 = vmul.f32 %v7209_v62, %v7209_v62 }
 0x775   :  { %v2080_v13 = vsel %vm93_vm0, %v2072_v4, 0.0 }
 0x776   :  { %2081 = vadd.xlane.f32.xlu0 %v2080_v13 }
 0x787   :  { %v2039_v55 = vpop.xlane.xlu1 %2038 }
 0x788   :  { %v2060_v36 = vmul.f32 %v7193_v25, %v2039_v55 }
 0x78a   :  { %2245 = vrot.lane.b32.xlu0 %v5617_v34, %s6290_s9  ;;  %v7236_v43 = vsub.f32 %v7155_v7, %v2060_v36  ;;  %v5612_v7 = vld [vmem:[%s8687_s1 + $0x4] sm:$0xf] }
 0x78c   :  { %v2076_v46 = vmul.f32 %v7236_v43, %v7236_v43 }
 0x78e   :  { %v2092_v2 = vsel %vm93_vm0, %v2076_v46, 0.0 }
 0x796   :  { %v2033_v54 = vpop.xlane.xlu1 %2032 }
 0x797   :  { %v2058_v47 = vmul.f32 %v7193_v25, %v2033_v54 }
 0x799   :  { %v7223_v15 = vsub.f32 %v7164_v11, %v2058_v47 }
 0x79b   :  { %v2074_v49 = vmul.f32 %v7223_v15, %v7223_v15 }
 0x79d   :  { %v2086_v31 = vsel %vm93_vm0, %v2074_v49, 0.0 }
 0x79e   :  { %v2036_v26 = vpop.xlane.xlu1 %2035  ;;  %2087 = vadd.xlane.f32.xlu1 %v2086_v31 }
 0x79f   :  { %v2059_v5 = vmul.f32 %v7193_v25, %v2036_v26  ;;  %v7274_v26 = vld [vmem:[#allocation5 + $0x2] ss:$0 sm:$0xff] }
 0x7a1   :  { %v7231_v24 = vsub.f32 %v7173_v51, %v2059_v5  ;;  %v5808_v51 = vld [vmem:[%s8687_s1 + $0x14] sm:$0xf0] }
 0x7a2   :  { %v5613_v0 = vor.u32 %v5808_v51, %v5612_v7 }
 0x7a3   :  { %v2075_v22 = vmul.f32 %v7231_v24, %v7231_v24 }
 0x7a5   :  { %v2089_v11 = vsel %vm93_vm0, %v2075_v22, 0.0 }
 0x7a6   :  { %2090 = vadd.xlane.f32.xlu2 %v2089_v11 }
 0x7a9   :  { %v2042_v63 = vpop.xlane.xlu1 %2041 }
 0x7aa   :  { %v2061_v37 = vmul.f32 %v7193_v25, %v2042_v63 }
 0x7ac   :  { %v7242_v60 = vsub.f32 %v2020_v41, %v2061_v37 }
 0x7ae   :  { %v2048_v6 = vpop.xlane.xlu0 %2047  ;;  %2093 = vadd.xlane.f32.xlu2 %v2092_v2  ;;  %v2077_v61 = vmul.f32 %v7242_v60, %v7242_v60  ;;  %v7279_v2 = vld [vmem:[#allocation5 + $0x3] ss:$0 sm:$0xff] }
 0x7af   :  { %v2063_v20 = vmul.f32 %v7193_v25, %v2048_v6 }
 0x7b0   :  { %v2095_v58 = vsel %vm93_vm0, %v2077_v61, 0.0 }
 0x7b1   :  { %v7255_v17 = vsub.f32 %v7188_v52, %v2063_v20 }
 0x7b3   :  { %v2079_v18 = vmul.f32 %v7255_v17, %v7255_v17 }
 0x7b5   :  { %v2101_v30 = vsel %vm93_vm0, %v2079_v18, 0.0 }
 0x7b6   :  { %2096 = vadd.xlane.f32.xlu2 %v2095_v58 }
 0x7b7   :  { %2243 = vrot.lane.b32.xlu1 %v5613_v0, %s6290_s9 }
 0x7be   :  { %2102 = vadd.xlane.f32.xlu2 %v2101_v30 }
 0x7e1   :  { %v2045_v41 = vpop.xlane.xlu2 %2044 }
 0x7e2   :  { %v2062_v14 = vmul.f32 %v7193_v25, %v2045_v41 }
 0x7e4   :  { %v7263_v3 = vsub.f32 %v2021_v10, %v2062_v14  ;;  %v2085_v52 = vpop.xlane.xlu1 %2084 }
 0x7e5   :  { %v2105_v40 = vmul.f32 %v2085_v52, %v7193_v25 }
 0x7e6   :  { %v2078_v23 = vmul.f32 %v7263_v3, %v7263_v3 }
 0x7e7   :  { %v2113_v19 = vadd.f32 1e-05, %v2105_v40 }
 0x7e8   :  { %v2098_v8 = vsel %vm93_vm0, %v2078_v23, 0.0 }
 0x7e9   :  { %2099 = vadd.xlane.f32.xlu0 %v2098_v8  ;;  %v2082_v1 = vpop.xlane.xlu0 %2081  ;;  %vm2136_vm8 = vweird.f32 %v2113_v19 }
 0x7ea   :  { %v2104_v45 = vmul.f32 %v2082_v1, %v7193_v25 }
 0x7ec   :  { %v2112_v9 = vadd.f32 1e-05, %v2104_v45 }
 0x7ee   :  { %5985 = vrsqrt.f32 %v2112_v9  ;;  %vm2126_vm6 = vweird.f32 %v2112_v9 }
 0x7ef   :  { %5987 = vrsqrt.f32 %v2113_v19 }
 0x7f4   :  { %v5986_v27 = vpop.eup %5985 }
 0x7f5   :  { %v5988_v28 = vpop.eup %5987  ;;  %v2121_v57 = vmul.f32 %v5986_v27, %v2112_v9  ;;  %vm2127_vm4 = vweird.f32 %v5986_v27 }
 0x7f6   :  { %v2131_v48 = vmul.f32 %v5988_v28, %v2113_v19  ;;  %vm2137_vm5 = vweird.f32 %v5988_v28  ;;  %vm2128_vm7 = vmor %vm2126_vm6, %vm2127_vm4 }
 0x7f7   :  { %v2122_v42 = vmul.f32 %v5986_v27, %v2121_v57  ;;  %vm2138_vm9 = vmor %vm2136_vm8, %vm2137_vm5 }
 0x7f8   :  { %v2132_v12 = vmul.f32 %v5988_v28, %v2131_v48 }
 0x7f9   :  { %v2123_v39 = vmul.f32 0.5, %v2122_v42 }
 0x7fa   :  { %v2133_v29 = vmul.f32 0.5, %v2132_v12 }
 0x7fb   :  { %v2124_v50 = vsub.f32 1.5, %v2123_v39 }
 0x7fc   :  { %v2246_v35 = vpop.permute.xlu0 %2245  ;;  %v2134_v21 = vsub.f32 1.5, %v2133_v29 }
 0x7fd   :  { %2267 = vmatpush.bf16.msrb.mxu0 %v2246_v35  ;;  %v2125_v56 = vmul.f32 %v5986_v27, %v2124_v50 }
 0x7fe   :  { %v2135_v59 = vmul.f32 %v5988_v28, %v2134_v21 }
 0x7ff   :  { %v2129_v55 = vsel %vm2128_vm7, %v5986_v27, %v2125_v56 }
 0x800   :  { %v2139_v34 = vsel %vm2138_vm9, %v5988_v28, %v2135_v59  ;;  %v2200_v54 = vmul.f32 %v2129_v55, %v7209_v62 }
 0x801   :  { %v2201_v49 = vmul.f32 %v2139_v34, %v7201_v44 }
 0x802   :  { %v2208_v22 = vmul.f32 %v2200_v54, %v7274_v26 }
 0x803   :  { %v2209_v46 = vmul.f32 %v2201_v49, %v7274_v26 }
 0x804   :  { %v7282_v62 = vadd.f32 %v2208_v22, %v7279_v2 }
 0x805   :  { %v7285_v7 = vadd.f32 %v2209_v46, %v7279_v2 }
 0x807   :  { %v2224_v18 = vpack.c.bf16 %v7285_v7, %v7282_v62 }
 0x811   :  { %v2088_v32 = vpop.xlane.xlu1 %2087 }
 0x812   :  { %v2106_v10 = vmul.f32 %v2088_v32, %v7193_v25 }
 0x814   :  { %v2114_v33 = vadd.f32 1e-05, %v2106_v10 }
 0x816   :  { %5989 = vrsqrt.f32 %v2114_v33  ;;  %vm2146_vm12 = vweird.f32 %v2114_v33 }
 0x819   :  { %v2091_v38 = vpop.xlane.xlu2 %2090 }
 0x81a   :  { %v2107_v4 = vmul.f32 %v2091_v38, %v7193_v25 }
 0x81c   :  { %v5990_v13 = vpop.eup %5989  ;;  %v2115_v53 = vadd.f32 1e-05, %v2107_v4 }
 0x81d   :  { %v2141_v16 = vmul.f32 %v5990_v13, %v2114_v33  ;;  %vm2147_vm10 = vweird.f32 %v5990_v13 }
 0x81e   :  { %5991 = vrsqrt.f32 %v2115_v53  ;;  %vm2148_vm13 = vmor %vm2146_vm12, %vm2147_vm10  ;;  %vm2156_vm14 = vweird.f32 %v2115_v53 }
 0x81f   :  { %v2142_v47 = vmul.f32 %v5990_v13, %v2141_v16 }
 0x821   :  { %v2094_v31 = vpop.xlane.xlu2 %2093  ;;  %v2143_v5 = vmul.f32 0.5, %v2142_v47 }
 0x822   :  { %v2108_v36 = vmul.f32 %v2094_v31, %v7193_v25 }
 0x823   :  { %v2144_v6 = vsub.f32 1.5, %v2143_v5 }
 0x824   :  { %v5992_v11 = vpop.eup %5991  ;;  %v2116_v63 = vadd.f32 1e-05, %v2108_v36 }
 0x825   :  { %v2151_v37 = vmul.f32 %v5992_v11, %v2115_v53  ;;  %v2145_v0 = vmul.f32 %v5990_v13, %v2144_v6  ;;  %vm2157_vm11 = vweird.f32 %v5992_v11 }
 0x826   :  { %5993 = vrsqrt.f32 %v2116_v63  ;;  %vm2158_vm15 = vmor %vm2156_vm14, %vm2157_vm11  ;;  %vm2166_vm5 = vweird.f32 %v2116_v63 }
 0x827   :  { %v2152_v44 = vmul.f32 %v5992_v11, %v2151_v37  ;;  %v2149_v1 = vsel %vm2148_vm13, %v5990_v13, %v2145_v0 }
 0x828   :  { %v2202_v9 = vmul.f32 %v2149_v1, %v7223_v15  ;;  %v5812_v1 = vld [vmem:[#allocation2 + $0x24] sm:$0xf0] }
 0x829   :  { %v2153_v51 = vmul.f32 0.5, %v2152_v44  ;;  %v2097_v20 = vpop.xlane.xlu2 %2096  ;;  %v2244_v61 = vpop.permute.xlu1 %2243 }
 0x82a   :  { %v2109_v58 = vmul.f32 %v2097_v20, %v7193_v25  ;;  %2268 = vmatpush.bf16.msrb.mxu0 %v2244_v61  ;;  %v2210_v57 = vmul.f32 %v2202_v9, %v7274_v26  ;;  %v5624_v9 = vld [vmem:[#allocation2] sm:$0xf] }
 0x82b   :  { %v2154_v30 = vsub.f32 1.5, %v2153_v51 }
 0x82c   :  { %v5994_v41 = vpop.eup %5993  ;;  %v2117_v14 = vadd.f32 1e-05, %v2109_v58  ;;  %v7299_v32 = vadd.f32 %v2210_v57, %v7279_v2 }
 0x82d   :  { %v2155_v23 = vmul.f32 %v5992_v11, %v2154_v30  ;;  %v2161_v8 = vmul.f32 %v5994_v41, %v2116_v63  ;;  %5618 = vmatmul.msk.bf16.vlgmr.msrb.gmra.mxu0 %vm93_vm0, %v2224_v18  ;;  %vm2167_vm3 = vweird.f32 %v5994_v41 }
 0x82e   :  { %5995 = vrsqrt.f32 %v2117_v14  ;;  %vm2168_vm6 = vmor %vm2166_vm5, %vm2167_vm3  ;;  %vm2176_vm7 = vweird.f32 %v2117_v14 }
 0x82f   :  { %v2159_v52 = vsel %vm2158_vm15, %v5992_v11, %v2155_v23  ;;  %v2162_v45 = vmul.f32 %v5994_v41, %v2161_v8  ;;  %v5813_v23 = vld [vmem:[#allocation2 + $0x34] sm:$0xf0]  ;;  %vm2335_vm15 = vcmask 523264  }
 0x830   :  { %v2203_v40 = vmul.f32 %v2159_v52, %v7231_v24 }
 0x831   :  { %v2163_v19 = vmul.f32 0.5, %v2162_v45  ;;  %v2103_v59 = vpop.xlane.xlu2 %2102  ;;  %v5811_v45 = vld [vmem:[#allocation2 + $0x14] sm:$0xf0] }
 0x832   :  { %v2211_v27 = vmul.f32 %v2203_v40, %v7274_v26  ;;  %v2111_v13 = vmul.f32 %v2103_v59, %v7193_v25 }
 0x833   :  { %v2164_v48 = vsub.f32 1.5, %v2163_v19 }
 0x834   :  { %v5996_v35 = vpop.eup %5995  ;;  %v7296_v12 = vadd.f32 %v2211_v27, %v7279_v2  ;;  %v2119_v16 = vadd.f32 1e-05, %v2111_v13 }
 0x835   :  { %v2171_v28 = vmul.f32 %v5996_v35, %v2117_v14  ;;  %v2165_v29 = vmul.f32 %v5994_v41, %v2164_v48  ;;  %vm2177_vm4 = vweird.f32 %v5996_v35 }
 0x836   :  { %v2225_v15 = vpack.c.bf16 %v7296_v12, %v7299_v32  ;;  %vm2178_vm8 = vmor %vm2176_vm7, %vm2177_vm4  ;;  %5997 = vrsqrt.f32 %v2119_v16  ;;  %vm2196_vm10 = vweird.f32 %v2119_v16 }
 0x837   :  { %v2172_v42 = vmul.f32 %v5996_v35, %v2171_v28  ;;  %v2169_v50 = vsel %vm2168_vm6, %v5994_v41, %v2165_v29 }
 0x838   :  { %v2204_v56 = vmul.f32 %v2169_v50, %v7236_v43 }
 0x839   :  { %v2173_v39 = vmul.f32 0.5, %v2172_v42 }
 0x83a   :  { %v2212_v4 = vmul.f32 %v2204_v56, %v7274_v26 }
 0x83b   :  { %v2174_v24 = vsub.f32 1.5, %v2173_v39 }
 0x83c   :  { %v7313_v53 = vadd.f32 %v2212_v4, %v7279_v2  ;;  %v5998_v43 = vpop.eup %5997 }
 0x83d   :  { %v2175_v10 = vmul.f32 %v5996_v35, %v2174_v24  ;;  %5619 = vmatmul.msk.bf16.gmra.mxu0 %vm93_vm0, %v2225_v15  ;;  %vm2197_vm9 = vweird.f32 %v5998_v43 }
 0x83e   :  { %vm2198_vm11 = vmor %vm2196_vm10, %vm2197_vm9 }
 0x83f   :  { %v2179_v33 = vsel %vm2178_vm8, %v5996_v35, %v2175_v10  ;;  %v2232_v35 = vld [vmem:[#allocation5 + $0x4] ss:$0 sm:$0xff] }
 0x840   :  { %v2205_v21 = vmul.f32 %v2179_v33, %v7242_v60  ;;  %v2191_v60 = vmul.f32 %v5998_v43, %v2119_v16 }
 0x842   :  { %v2213_v38 = vmul.f32 %v2205_v21, %v7274_v26  ;;  %v2192_v54 = vmul.f32 %v5998_v43, %v2191_v60 }
 0x844   :  { %v7310_v55 = vadd.f32 %v2213_v38, %v7279_v2  ;;  %v2193_v5 = vmul.f32 0.5, %v2192_v54 }
 0x846   :  { %v2226_v34 = vpack.c.bf16 %v7310_v55, %v7313_v53  ;;  %v2194_v36 = vsub.f32 1.5, %v2193_v5 }
 0x848   :  { %v2195_v11 = vmul.f32 %v5998_v43, %v2194_v36 }
 0x84a   :  { %v2199_v37 = vsel %vm2198_vm11, %v5998_v43, %v2195_v11 }
 0x84b   :  { %v2207_v51 = vmul.f32 %v2199_v37, %v7255_v17  ;;  %v5636_v17 = vld [vmem:[#allocation2 + $0x30] sm:$0xf] }
 0x84c   :  { %v5637_v8 = vor.u32 %v5813_v23, %v5636_v17 }
 0x84d   :  { %5620 = vmatmul.msk.bf16.gmra.mxu0 %vm93_vm0, %v2226_v34  ;;  %v2215_v58 = vmul.f32 %v2207_v51, %v7274_v26 }
 0x84e   :  { %2352 = vmatpush.bf16.msrb.mxu1 %v5637_v8 }
 0x84f   :  { %v7327_v41 = vadd.f32 %v2215_v58, %v7279_v2 }
 0x85c   :  { %v2100_v47 = vpop.xlane.xlu0 %2099 }
 0x85d   :  { %v2110_v49 = vmul.f32 %v2100_v47, %v7193_v25 }
 0x85f   :  { %v2118_v31 = vadd.f32 1e-05, %v2110_v49 }
 0x861   :  { %5999 = vrsqrt.f32 %v2118_v31  ;;  %vm2186_vm13 = vweird.f32 %v2118_v31 }
 0x867   :  { %v6000_v22 = vpop.eup %5999 }
 0x868   :  { %v2181_v63 = vmul.f32 %v6000_v22, %v2118_v31  ;;  %vm2187_vm12 = vweird.f32 %v6000_v22 }
 0x869   :  { %vm2188_vm14 = vmor %vm2186_vm13, %vm2187_vm12 }
 0x86a   :  { %v2182_v46 = vmul.f32 %v6000_v22, %v2181_v63 }
 0x86c   :  { %v2183_v6 = vmul.f32 0.5, %v2182_v46 }
 0x86e   :  { %v2184_v44 = vsub.f32 1.5, %v2183_v6 }
 0x870   :  { %v2185_v20 = vmul.f32 %v6000_v22, %v2184_v44 }
 0x872   :  { %v2189_v61 = vsel %vm2188_vm14, %v6000_v22, %v2185_v20  ;;  %v2310_v22 = vld [vmem:[#allocation5 + $0x5] ss:$0 sm:$0xff] }
 0x873   :  { %v2206_v0 = vmul.f32 %v2189_v61, %v7263_v3  ;;  %v5632_v3 = vld [vmem:[#allocation2 + $0x20] sm:$0xf] }
 0x874   :  { %v5633_v52 = vor.u32 %v5812_v1, %v5632_v3 }
 0x875   :  { %v2214_v18 = vmul.f32 %v2206_v0, %v7274_v26  ;;  %v5628_v26 = vld [vmem:[#allocation2 + $0x10] sm:$0xf] }
 0x876   :  { %2353 = vmatpush.bf16.msrb.mxu1 %v5633_v52  ;;  %v5629_v40 = vor.u32 %v5811_v45, %v5628_v26 }
 0x877   :  { %v7324_v30 = vadd.f32 %v2214_v18, %v7279_v2  ;;  %v5810_v2 = vld [vmem:[#allocation2 + $0x4] sm:$0xf0] }
 0x878   :  { %v5625_v19 = vor.u32 %v5810_v2, %v5624_v9 }
 0x879   :  { %v2227_v14 = vpack.c.bf16 %v7327_v41, %v7324_v30 }
 0x87a   :  { %2354 = vmatpush.bf16.msrb.mxu1 %v5629_v40 }
 0x87b   :  { %5621 = vmatmul.msk.bf16.gmra.mxu0 %vm93_vm0, %v2227_v14 }
 0x87e   :  { %2355 = vmatpush.bf16.msrb.mxu1 %v5625_v19 }
 0x8aa   :  { %v2270_v27 = vpop.f32.mrf.mxu0 }
 0x8ab   :  { %v2271_v28 = vadd.f32 %v2270_v27, %v2232_v35 }
 0x8ad   :  { %v2290_v42 = vmax.f32 %v2271_v28, 0.0 }
 0x8b2   :  { %v2272_v57 = vpop.f32.mrf.mxu0 }
 0x8b3   :  { %v2273_v48 = vadd.f32 %v2272_v57, %v2232_v35 }
 0x8b5   :  { %v2291_v39 = vmax.f32 %v2273_v48, 0.0 }
 0x8b7   :  { %v2298_v29 = vpack.c.bf16 %v2291_v39, %v2290_v42 }
 0x8b9   :  { %5638 = vmatmul.msk.bf16.vlgmr.msrb.gmra.mxu1 %vm2335_vm15, %v2298_v29 }
 0x8ba   :  { %v2275_v24 = vpop.f32.mrf.mxu0 }
 0x8bb   :  { %v2276_v15 = vadd.f32 %v2275_v24, %v2232_v35 }
 0x8bd   :  { %v2292_v33 = vmax.f32 %v2276_v15, 0.0 }
 0x8c2   :  { %v2277_v10 = vpop.f32.mrf.mxu0 }
 0x8c3   :  { %v2278_v50 = vadd.f32 %v2277_v10, %v2232_v35 }
 0x8c5   :  { %v2293_v21 = vmax.f32 %v2278_v50, 0.0 }
 0x8c7   :  { %v2299_v56 = vpack.c.bf16 %v2293_v21, %v2292_v33 }
 0x8c9   :  { %5639 = vmatmul.msk.bf16.gmra.mxu1 %vm2335_vm15, %v2299_v56 }
 0x8ca   :  { %v2280_v38 = vpop.f32.mrf.mxu0 }
 0x8cb   :  { %v2281_v59 = vadd.f32 %v2280_v38, %v2232_v35 }
 0x8cd   :  { %v2294_v16 = vmax.f32 %v2281_v59, 0.0 }
 0x8d2   :  { %v2282_v4 = vpop.f32.mrf.mxu0 }
 0x8d3   :  { %v2283_v13 = vadd.f32 %v2282_v4, %v2232_v35 }
 0x8d5   :  { %v2295_v34 = vmax.f32 %v2283_v13, 0.0 }
 0x8d7   :  { %v2300_v43 = vpack.c.bf16 %v2295_v34, %v2294_v16 }
 0x8d9   :  { %5640 = vmatmul.msk.bf16.gmra.mxu1 %vm2335_vm15, %v2300_v43 }
 0x8f8   :  { %v2285_v60 = vpop.f32.mrf.mxu0 }
 0x8f9   :  { %v2286_v54 = vadd.f32 %v2285_v60, %v2232_v35 }
 0x8fb   :  { %v2296_v31 = vmax.f32 %v2286_v54, 0.0 }
 0x900   :  { %v2287_v47 = vpop.f32.mrf.mxu0 }
 0x901   :  { %v2288_v49 = vadd.f32 %v2287_v47, %v2232_v35 }
 0x903   :  { %v2297_v5 = vmax.f32 %v2288_v49, 0.0 }
 0x905   :  { %v2301_v36 = vpack.c.bf16 %v2297_v5, %v2296_v31 }
 0x907   :  { %5641 = vmatmul.msk.bf16.gmra.mxu1 %vm2335_vm15, %v2301_v36 }
 0x936   :  { %v2357_v11 = vpop.f32.mrf.mxu1 }
 0x937   :  { %v2358_v63 = vadd.f32 %v2357_v11, %v2310_v22 }
 0x939   :  { %v2377_v46 = vadd.f32 %v2358_v63, %v7282_v62 }
 0x93b   :  { %v2387_v37 = vsel %vm93_vm0, %v2377_v46, 0.0 }
 0x93c   :  { %2388 = vadd.xlane.f32.xlu1 %v2387_v37 }
 0x93e   :  { %v2359_v6 = vpop.f32.mrf.mxu1 }
 0x93f   :  { %v2360_v44 = vadd.f32 %v2359_v6, %v2310_v22  ;;  %v5652_v6 = vld [vmem:[%s8687_s1 + $0x30] sm:$0xf] }
 0x941   :  { %v2378_v51 = vadd.f32 %v2360_v44, %v7285_v7  ;;  %v5817_v44 = vld [vmem:[%s8687_s1 + $0x40] sm:$0xf0] }
 0x943   :  { %v2390_v20 = vsel %vm93_vm0, %v2378_v51, 0.0 }
 0x944   :  { %2391 = vadd.xlane.f32.xlu2 %v2390_v20  ;;  %v5653_v20 = vor.u32 %v5817_v44, %v5652_v6 }
 0x946   :  { %v2362_v61 = vpop.f32.mrf.mxu1  ;;  %2632 = vmatpush.bf16.msrb.mxu2 %v5653_v20 }
 0x947   :  { %v2363_v0 = vadd.f32 %v2362_v61, %v2310_v22  ;;  %v5654_v61 = vld [vmem:[%s8687_s1 + $0x44] sm:$0xf0] }
 0x949   :  { %v2379_v58 = vadd.f32 %v2363_v0, %v7299_v32 }
 0x94b   :  { %v2393_v18 = vsel %vm93_vm0, %v2379_v58, 0.0 }
 0x94c   :  { %2394 = vadd.xlane.f32.xlu2 %v2393_v18 }
 0x94e   :  { %v2364_v14 = vpop.f32.mrf.mxu1 }
 0x94f   :  { %v2365_v17 = vadd.f32 %v2364_v14, %v2310_v22  ;;  %v5644_v14 = vld [vmem:[%s8687_s1 + $0x8] sm:$0xf] }
 0x951   :  { %v2380_v62 = vadd.f32 %v2365_v17, %v7296_v12  ;;  %v5815_v17 = vld [vmem:[%s8687_s1 + $0x18] sm:$0xf0] }
 0x953   :  { %v2396_v23 = vsel %vm93_vm0, %v2380_v62, 0.0 }
 0x954   :  { %2397 = vadd.xlane.f32.xlu2 %v2396_v23 }
 0x956   :  { %v2367_v8 = vpop.f32.mrf.mxu1 }
 0x957   :  { %v2368_v3 = vadd.f32 %v2367_v8, %v2310_v22  ;;  %v5645_v8 = vor.u32 %v5815_v17, %v5644_v14 }
 0x959   :  { %v2381_v7 = vadd.f32 %v2368_v3, %v7313_v53  ;;  %v5646_v3 = vld [vmem:[%s8687_s1 + $0x1c] sm:$0xf0]  ;;  %2633 = vmatpush.bf16.msrb.mxu2 %v5645_v8 }
 0x95b   :  { %v2399_v1 = vsel %vm93_vm0, %v2381_v7, 0.0 }
 0x95c   :  { %2400 = vadd.xlane.f32.xlu2 %v2399_v1 }
 0x95e   :  { %v2369_v52 = vpop.f32.mrf.mxu1 }
 0x95f   :  { %v2370_v26 = vadd.f32 %v2369_v52, %v2310_v22 }
 0x961   :  { %v2382_v32 = vadd.f32 %v2370_v26, %v7310_v55 }
 0x963   :  { %v2402_v45 = vsel %vm93_vm0, %v2382_v32, 0.0 }
 0x964   :  { %2403 = vadd.xlane.f32.xlu2 %v2402_v45 }
 0x984   :  { %v2372_v40 = vpop.f32.mrf.mxu1 }
 0x985   :  { %v2373_v9 = vadd.f32 %v2372_v40, %v2310_v22 }
 0x987   :  { %v2383_v12 = vadd.f32 %v2373_v9, %v7324_v30 }
 0x989   :  { %v2405_v2 = vsel %vm93_vm0, %v2383_v12, 0.0 }
 0x98a   :  { %2406 = vadd.xlane.f32.xlu2 %v2405_v2 }
 0x98c   :  { %v2374_v35 = vpop.f32.mrf.mxu1 }
 0x98d   :  { %v2375_v55 = vadd.f32 %v2374_v35, %v2310_v22 }
 0x98f   :  { %v2384_v39 = vadd.f32 %v2375_v55, %v7327_v41 }
 0x991   :  { %v2408_v15 = vsel %vm93_vm0, %v2384_v39, 0.0 }
 0x9af   :  { %v2389_v19 = vpop.xlane.xlu1 %2388 }
 0x9b0   :  { %v2411_v53 = vmul.f32 %v2389_v19, %v7193_v25 }
 0x9b2   :  { %v7351_v27 = vsub.f32 %v2377_v46, %v2411_v53 }
 0x9b4   :  { %v2427_v28 = vmul.f32 %v7351_v27, %v7351_v27 }
 0x9b6   :  { %v2435_v57 = vsel %vm93_vm0, %v2427_v28, 0.0 }
 0x9b7   :  { %v2392_v48 = vpop.xlane.xlu2 %2391  ;;  %2436 = vadd.xlane.f32.xlu0 %v2435_v57 }
 0x9b8   :  { %v2412_v42 = vmul.f32 %v2392_v48, %v7193_v25 }
 0x9ba   :  { %v7357_v30 = vsub.f32 %v2378_v51, %v2412_v42  ;;  %v5816_v51 = vld [vmem:[%s8687_s1 + $0x34] sm:$0xf] }
 0x9bc   :  { %v2428_v29 = vmul.f32 %v7357_v30, %v7357_v30 }
 0x9be   :  { %v2438_v24 = vsel %vm93_vm0, %v2428_v29, 0.0 }
 0x9bf   :  { %v2395_v10 = vpop.xlane.xlu2 %2394  ;;  %2439 = vadd.xlane.f32.xlu1 %v2438_v24  ;;  %2409 = vadd.xlane.f32.xlu0 %v2408_v15 }
 0x9c0   :  { %v2413_v50 = vmul.f32 %v2395_v10, %v7193_v25 }
 0x9c2   :  { %v7365_v33 = vsub.f32 %v2379_v58, %v2413_v50  ;;  %v5657_v58 = vor.u32 %v5816_v51, %v5654_v61 }
 0x9c4   :  { %v2429_v21 = vmul.f32 %v7365_v33, %v7365_v33  ;;  %2661 = vmatpush.bf16.msrb.mxu3 %v5657_v58 }
 0x9c6   :  { %v2441_v56 = vsel %vm93_vm0, %v2429_v21, 0.0 }
 0x9c7   :  { %v2398_v41 = vpop.xlane.xlu2 %2397  ;;  %2442 = vadd.xlane.f32.xlu1 %v2441_v56 }
 0x9c8   :  { %v2414_v38 = vmul.f32 %v2398_v41, %v7193_v25 }
 0x9ca   :  { %v7371_v59 = vsub.f32 %v2380_v62, %v2414_v38  ;;  %v5814_v62 = vld [vmem:[%s8687_s1 + $0xc] sm:$0xf] }
 0x9cc   :  { %v2430_v4 = vmul.f32 %v7371_v59, %v7371_v59 }
 0x9ce   :  { %v2444_v13 = vsel %vm93_vm0, %v2430_v4, 0.0 }
 0x9cf   :  { %2445 = vadd.xlane.f32.xlu2 %v2444_v13  ;;  %v2401_v16 = vpop.xlane.xlu2 %2400  ;;  %v7429_v13 = vld [vmem:[#allocation5 + $0x6] ss:$0 sm:$0xff] }
 0x9d0   :  { %v2415_v34 = vmul.f32 %v2401_v16, %v7193_v25 }
 0x9d2   :  { %v7377_v43 = vsub.f32 %v2381_v7, %v2415_v34  ;;  %v5649_v7 = vor.u32 %v5814_v62, %v5646_v3 }
 0x9d4   :  { %v2431_v60 = vmul.f32 %v7377_v43, %v7377_v43  ;;  %2662 = vmatpush.bf16.msrb.mxu3 %v5649_v7 }
 0x9d6   :  { %v2447_v54 = vsel %vm93_vm0, %v2431_v60, 0.0 }
 0x9d7   :  { %v2404_v47 = vpop.xlane.xlu2 %2403  ;;  %2448 = vadd.xlane.f32.xlu0 %v2447_v54 }
 0x9d8   :  { %v2416_v49 = vmul.f32 %v2404_v47, %v7193_v25 }
 0x9da   :  { %v7383_v31 = vsub.f32 %v2382_v32, %v2416_v49 }
 0x9dc   :  { %v2432_v5 = vmul.f32 %v7383_v31, %v7383_v31 }
 0x9de   :  { %v2450_v36 = vsel %vm93_vm0, %v2432_v5, 0.0  ;;  %v7433_v5 = vld [vmem:[#allocation5 + $0x7] ss:$0 sm:$0xff] }
 0x9df   :  { %2451 = vadd.xlane.f32.xlu1 %v2450_v36 }
 0x9fd   :  { %v2407_v22 = vpop.xlane.xlu2 %2406 }
 0x9fe   :  { %v2417_v11 = vmul.f32 %v2407_v22, %v7193_v25 }
 0xa00   :  { %v7389_v63 = vsub.f32 %v2383_v12, %v2417_v11 }
 0xa02   :  { %v2433_v46 = vmul.f32 %v7389_v63, %v7389_v63 }
 0xa04   :  { %v2453_v37 = vsel %vm93_vm0, %v2433_v46, 0.0 }
 0xa05   :  { %2454 = vadd.xlane.f32.xlu2 %v2453_v37 }
 0xa2a   :  { %v2437_v0 = vpop.xlane.xlu0 %2436 }
 0xa2b   :  { %v2459_v18 = vmul.f32 %v2437_v0, %v7193_v25 }
 0xa2d   :  { %v2467_v23 = vadd.f32 1e-05, %v2459_v18 }
 0xa2f   :  { %6001 = vrsqrt.f32 %v2467_v23  ;;  %vm2481_vm4 = vweird.f32 %v2467_v23 }
 0xa32   :  { %v2410_v1 = vpop.xlane.xlu0 %2409  ;;  %v2440_v52 = vpop.xlane.xlu1 %2439 }
 0xa33   :  { %v2418_v26 = vmul.f32 %v2410_v1, %v7193_v25  ;;  %v2460_v32 = vmul.f32 %v2440_v52, %v7193_v25 }
 0xa35   :  { %v6002_v45 = vpop.eup %6001  ;;  %v7421_v40 = vsub.f32 %v2384_v39, %v2418_v26  ;;  %v2468_v9 = vadd.f32 1e-05, %v2460_v32 }
 0xa36   :  { %v2476_v12 = vmul.f32 %v6002_v45, %v2467_v23  ;;  %vm2482_vm3 = vweird.f32 %v6002_v45 }
 0xa37   :  { %6003 = vrsqrt.f32 %v2468_v9  ;;  %v2434_v2 = vmul.f32 %v7421_v40, %v7421_v40  ;;  %vm2483_vm5 = vmor %vm2481_vm4, %vm2482_vm3  ;;  %vm2491_vm7 = vweird.f32 %v2468_v9 }
 0xa38   :  { %v2477_v19 = vmul.f32 %v6002_v45, %v2476_v12 }
 0xa39   :  { %v2456_v53 = vsel %vm93_vm0, %v2434_v2, 0.0 }
 0xa3a   :  { %v2478_v35 = vmul.f32 0.5, %v2477_v19  ;;  %2457 = vadd.xlane.f32.xlu0 %v2456_v53  ;;  %v2443_v28 = vpop.xlane.xlu1 %2442 }
 0xa3b   :  { %v2461_v55 = vmul.f32 %v2443_v28, %v7193_v25 }
 0xa3c   :  { %v2479_v57 = vsub.f32 1.5, %v2478_v35 }
 0xa3d   :  { %v6004_v48 = vpop.eup %6003  ;;  %v2469_v42 = vadd.f32 1e-05, %v2461_v55 }
 0xa3e   :  { %v2480_v29 = vmul.f32 %v6002_v45, %v2479_v57  ;;  %v2486_v39 = vmul.f32 %v6004_v48, %v2468_v9  ;;  %vm2492_vm6 = vweird.f32 %v6004_v48 }
 0xa3f   :  { %6005 = vrsqrt.f32 %v2469_v42  ;;  %vm2493_vm8 = vmor %vm2491_vm7, %vm2492_vm6  ;;  %vm2501_vm10 = vweird.f32 %v2469_v42 }
 0xa40   :  { %v2487_v24 = vmul.f32 %v6004_v48, %v2486_v39  ;;  %v2484_v15 = vsel %vm2483_vm5, %v6002_v45, %v2480_v29 }
 0xa41   :  { %v2555_v38 = vmul.f32 %v2484_v15, %v7351_v27 }
 0xa42   :  { %v2488_v10 = vmul.f32 0.5, %v2487_v24  ;;  %v2446_v50 = vpop.xlane.xlu2 %2445 }
 0xa43   :  { %v2462_v21 = vmul.f32 %v2446_v50, %v7193_v25  ;;  %v2563_v47 = vmul.f32 %v2555_v38, %v7429_v13 }
 0xa44   :  { %v2489_v56 = vsub.f32 1.5, %v2488_v10 }
 0xa45   :  { %v6006_v41 = vpop.eup %6005  ;;  %v2470_v4 = vadd.f32 1e-05, %v2462_v21  ;;  %v7438_v6 = vadd.f32 %v2563_v47, %v7433_v5 }
 0xa46   :  { %v2490_v16 = vmul.f32 %v6004_v48, %v2489_v56  ;;  %v2496_v34 = vmul.f32 %v6006_v41, %v2469_v42  ;;  %vm2502_vm9 = vweird.f32 %v6006_v41 }
 0xa47   :  { %6007 = vrsqrt.f32 %v2470_v4  ;;  %vm2503_vm11 = vmor %vm2501_vm10, %vm2502_vm9  ;;  %vm2511_vm13 = vweird.f32 %v2470_v4 }
 0xa48   :  { %v2494_v60 = vsel %vm2493_vm8, %v6004_v48, %v2490_v16  ;;  %v2497_v54 = vmul.f32 %v6006_v41, %v2496_v34 }
 0xa49   :  { %v2556_v49 = vmul.f32 %v2494_v60, %v7357_v30 }
 0xa4a   :  { %v2498_v36 = vmul.f32 0.5, %v2497_v54  ;;  %v2449_v22 = vpop.xlane.xlu0 %2448 }
 0xa4b   :  { %v2564_v27 = vmul.f32 %v2556_v49, %v7429_v13  ;;  %v2463_v11 = vmul.f32 %v2449_v22, %v7193_v25 }
 0xa4c   :  { %v2499_v46 = vsub.f32 1.5, %v2498_v36 }
 0xa4d   :  { %v6008_v37 = vpop.eup %6007  ;;  %v7441_v44 = vadd.f32 %v2564_v27, %v7433_v5  ;;  %v2471_v51 = vadd.f32 1e-05, %v2463_v11 }
 0xa4e   :  { %v2500_v20 = vmul.f32 %v6006_v41, %v2499_v46  ;;  %v2506_v30 = vmul.f32 %v6008_v37, %v2470_v4  ;;  %vm2512_vm12 = vweird.f32 %v6008_v37 }
 0xa4f   :  { %v2579_v61 = vpack.c.bf16 %v7441_v44, %v7438_v6  ;;  %6009 = vrsqrt.f32 %v2471_v51  ;;  %vm2513_vm14 = vmor %vm2511_vm13, %vm2512_vm12  ;;  %vm2521_vm4 = vweird.f32 %v2471_v51 }
 0xa50   :  { %v2507_v0 = vmul.f32 %v6008_v37, %v2506_v30  ;;  %v2504_v58 = vsel %vm2503_vm11, %v6006_v41, %v2500_v20 }
 0xa51   :  { %5658 = vmatmul.msk.bf16.vlgmr.msrb.gmra.mxu2 %vm93_vm0, %v2579_v61  ;;  %5662 = vmatmul.msk.bf16.vlgmr.msrb.gmra.mxu3 %vm93_vm0, %v2579_v61  ;;  %v2557_v8 = vmul.f32 %v2504_v58, %v7365_v33 }
 0xa52   :  { %v2508_v18 = vmul.f32 0.5, %v2507_v0  ;;  %v2452_v14 = vpop.xlane.xlu1 %2451 }
 0xa53   :  { %v2464_v17 = vmul.f32 %v2452_v14, %v7193_v25  ;;  %v2565_v45 = vmul.f32 %v2557_v8, %v7429_v13 }
 0xa54   :  { %v2509_v62 = vsub.f32 1.5, %v2508_v18 }
 0xa55   :  { %v6010_v23 = vpop.eup %6009  ;;  %v2472_v3 = vadd.f32 1e-05, %v2464_v17  ;;  %v7453_v53 = vadd.f32 %v2565_v45, %v7433_v5 }
 0xa56   :  { %v2510_v7 = vmul.f32 %v6008_v37, %v2509_v62  ;;  %v2516_v1 = vmul.f32 %v6010_v23, %v2471_v51  ;;  %vm2522_vm3 = vweird.f32 %v6010_v23 }
 0xa57   :  { %6011 = vrsqrt.f32 %v2472_v3  ;;  %vm2523_vm5 = vmor %vm2521_vm4, %vm2522_vm3  ;;  %vm2531_vm7 = vweird.f32 %v2472_v3 }
 0xa58   :  { %v2514_v52 = vsel %vm2513_vm14, %v6008_v37, %v2510_v7  ;;  %v2517_v26 = vmul.f32 %v6010_v23, %v2516_v1 }
 0xa59   :  { %v2558_v32 = vmul.f32 %v2514_v52, %v7371_v59 }
 0xa5a   :  { %v2518_v9 = vmul.f32 0.5, %v2517_v26 }
 0xa5b   :  { %v2566_v12 = vmul.f32 %v2558_v32, %v7429_v13 }
 0xa5c   :  { %v2519_v2 = vsub.f32 1.5, %v2518_v9 }
 0xa5d   :  { %v6012_v19 = vpop.eup %6011  ;;  %v7456_v33 = vadd.f32 %v2566_v12, %v7433_v5 }
 0xa5e   :  { %v2520_v35 = vmul.f32 %v6010_v23, %v2519_v2  ;;  %v2526_v28 = vmul.f32 %v6012_v19, %v2472_v3  ;;  %vm2532_vm6 = vweird.f32 %v6012_v19 }
 0xa5f   :  { %v2580_v55 = vpack.c.bf16 %v7456_v33, %v7453_v53  ;;  %vm2533_vm8 = vmor %vm2531_vm7, %vm2532_vm6 }
 0xa60   :  { %v2527_v59 = vmul.f32 %v6012_v19, %v2526_v28  ;;  %v2524_v57 = vsel %vm2523_vm5, %v6010_v23, %v2520_v35 }
 0xa61   :  { %5659 = vmatmul.msk.bf16.gmra.mxu2 %vm93_vm0, %v2580_v55  ;;  %5663 = vmatmul.msk.bf16.gmra.mxu3 %vm93_vm0, %v2580_v55  ;;  %v2559_v29 = vmul.f32 %v2524_v57, %v7377_v43 }
 0xa62   :  { %v2528_v48 = vmul.f32 0.5, %v2527_v59 }
 0xa63   :  { %v2567_v10 = vmul.f32 %v2559_v29, %v7429_v13 }
 0xa64   :  { %v2529_v42 = vsub.f32 1.5, %v2528_v48 }
 0xa65   :  { %v7467_v21 = vadd.f32 %v2567_v10, %v7433_v5 }
 0xa66   :  { %v2530_v39 = vmul.f32 %v6012_v19, %v2529_v42 }
 0xa68   :  { %v2534_v24 = vsel %vm2533_vm8, %v6012_v19, %v2530_v39 }
 0xa69   :  { %v2560_v15 = vmul.f32 %v2534_v24, %v7383_v31 }
 0xa6b   :  { %v2568_v50 = vmul.f32 %v2560_v15, %v7429_v13 }
 0xa6d   :  { %v7470_v56 = vadd.f32 %v2568_v50, %v7433_v5 }
 0xa6f   :  { %v2581_v41 = vpack.c.bf16 %v7470_v56, %v7467_v21 }
 0xa71   :  { %5660 = vmatmul.msk.bf16.gmra.mxu2 %vm93_vm0, %v2581_v41  ;;  %5664 = vmatmul.msk.bf16.gmra.mxu3 %vm93_vm0, %v2581_v41 }
 0xa78   :  { %v2455_v43 = vpop.xlane.xlu2 %2454 }
 0xa79   :  { %v2465_v31 = vmul.f32 %v2455_v43, %v7193_v25 }
 0xa7b   :  { %v2473_v38 = vadd.f32 1e-05, %v2465_v31 }
 0xa7d   :  { %6013 = vrsqrt.f32 %v2473_v38  ;;  %vm2541_vm10 = vweird.f32 %v2473_v38 }
 0xa83   :  { %v6014_v4 = vpop.eup %6013 }
 0xa84   :  { %v2536_v16 = vmul.f32 %v6014_v4, %v2473_v38  ;;  %vm2542_vm9 = vweird.f32 %v6014_v4 }
 0xa85   :  { %vm2543_vm11 = vmor %vm2541_vm10, %vm2542_vm9 }
 0xa86   :  { %v2537_v34 = vmul.f32 %v6014_v4, %v2536_v16 }
 0xa88   :  { %v2538_v49 = vmul.f32 0.5, %v2537_v34 }
 0xa8a   :  { %v2539_v36 = vsub.f32 1.5, %v2538_v49 }
 0xa8c   :  { %v2540_v27 = vmul.f32 %v6014_v4, %v2539_v36 }
 0xa8e   :  { %v2544_v37 = vsel %vm2543_vm11, %v6014_v4, %v2540_v27 }
 0xa8f   :  { %v2561_v30 = vmul.f32 %v2544_v37, %v7389_v63  ;;  %v2588_v63 = vld [vmem:[#allocation5 + $0x10] ss:$8 sm:$0x3] }
 0xa90   :  { %v7492_v8 = vperm.slane %v2588_v63, 0 }
 0xa91   :  { %v2569_v18 = vmul.f32 %v2561_v30, %v7429_v13 }
 0xa93   :  { %v7483_v17 = vadd.f32 %v2569_v18, %v7433_v5 }
 0xaad   :  { %v2458_v60 = vpop.xlane.xlu0 %2457 }
 0xaae   :  { %v2466_v54 = vmul.f32 %v2458_v60, %v7193_v25 }
 0xab0   :  { %v2474_v47 = vadd.f32 1e-05, %v2466_v54 }
 0xab2   :  { %6015 = vrsqrt.f32 %v2474_v47  ;;  %vm2551_vm13 = vweird.f32 %v2474_v47 }
 0xab8   :  { %v6016_v22 = vpop.eup %6015 }
 0xab9   :  { %v2546_v11 = vmul.f32 %v6016_v22, %v2474_v47  ;;  %vm2552_vm12 = vweird.f32 %v6016_v22 }
 0xaba   :  { %vm2553_vm14 = vmor %vm2551_vm13, %vm2552_vm12 }
 0xabb   :  { %v2547_v46 = vmul.f32 %v6016_v22, %v2546_v11 }
 0xabd   :  { %v2548_v51 = vmul.f32 0.5, %v2547_v46 }
 0xabf   :  { %v2549_v20 = vsub.f32 1.5, %v2548_v51 }
 0xac1   :  { %v2550_v61 = vmul.f32 %v6016_v22, %v2549_v20 }
 0xac3   :  { %v2554_v0 = vsel %vm2553_vm14, %v6016_v22, %v2550_v61 }
 0xac4   :  { %v2562_v58 = vmul.f32 %v2554_v0, %v7421_v40  ;;  %v7494_v40 = vperm.slane %v2588_v63, 1 }
 0xac6   :  { %v2570_v14 = vmul.f32 %v2562_v58, %v7429_v13 }
 0xac8   :  { %v7486_v62 = vadd.f32 %v2570_v14, %v7433_v5 }
 0xaca   :  { %v2582_v23 = vpack.c.bf16 %v7486_v62, %v7483_v17 }
 0xacc   :  { %5661 = vmatmul.msk.bf16.gmra.mxu2 %vm93_vm0, %v2582_v23  ;;  %5665 = vmatmul.msk.bf16.gmra.mxu3 %vm93_vm0, %v2582_v23 }
 0xad4   :  { %v2635_v3 = vpop.f32.mrf.mxu2  ;;  %v2664_v13 = vpop.f32.mrf.mxu3 }
 0xad5   :  { %v2636_v7 = vadd.f32 %v2635_v3, %v7492_v8  ;;  %v7498_v1 = vadd.f32 %v2664_v13, %v7494_v40 }
 0xad7   :  { %v2684_v5 = vpack.c.bf16 %v2636_v7, %v2636_v7 }
 0xad9   :  { %v2693_v52 = vunpack.c.l.b16 %v2684_v5 }
 0xadb   :  { %v7500_v26 = vpack.c.b16 %v2693_v52, %v2693_v52 }
 0xadc   :  { %v2637_v32 = vpop.f32.mrf.mxu2  ;;  %v7502_v45 = vpop.f32.mrf.mxu3 }
 0xadd   :  { %v2638_v9 = vadd.f32 %v2637_v32, %v7492_v8  ;;  %2695 = vrot.lane.b32.xlu0 %v7500_v26, %s6286_s25 }
 0xadf   :  { %v7507_v12 = vpack.c.bf16 %v2638_v9, %v2638_v9 }
 0xae1   :  { %v2717_v2 = vunpack.c.l.b16 %v7507_v12 }
 0xae3   :  { %v7510_v19 = vpack.c.b16 %v2717_v2, %v2717_v2 }
 0xae4   :  { %v2640_v35 = vpop.f32.mrf.mxu2  ;;  %v2669_v28 = vpop.f32.mrf.mxu3 }
 0xae5   :  { %v2641_v55 = vadd.f32 %v2640_v35, %v7492_v8  ;;  %v7514_v59 = vadd.f32 %v2669_v28, %v7494_v40  ;;  %2719 = vrot.lane.b32.xlu0 %v7510_v19, %s6286_s25 }
 0xae7   :  { %v7518_v57 = vpack.c.bf16 %v2641_v55, %v2641_v55 }
 0xae9   :  { %v2741_v48 = vunpack.c.l.b16 %v7518_v57 }
 0xaeb   :  { %v7521_v42 = vpack.c.b16 %v2741_v48, %v2741_v48 }
 0xaec   :  { %v2642_v29 = vpop.f32.mrf.mxu2  ;;  %v7523_v39 = vpop.f32.mrf.mxu3 }
 0xaed   :  { %v2643_v24 = vadd.f32 %v2642_v29, %v7492_v8  ;;  %2743 = vrot.lane.b32.xlu1 %v7521_v42, %s6286_s25 }
 0xaef   :  { %v2687_v15 = vpack.c.bf16 %v2643_v24, %v2643_v24 }
 0xaf1   :  { %v2765_v10 = vunpack.c.l.b16 %v2687_v15 }
 0xaf3   :  { %v7528_v50 = vpack.c.b16 %v2765_v10, %v2765_v10 }
 0xaf4   :  { %v2645_v41 = vpop.f32.mrf.mxu2  ;;  %v2674_v43 = vpop.f32.mrf.mxu3 }
 0xaf5   :  { %v2646_v31 = vadd.f32 %v2645_v41, %v7492_v8  ;;  %v7532_v38 = vadd.f32 %v2674_v43, %v7494_v40  ;;  %2767 = vrot.lane.b32.xlu2 %v7528_v50, %s6286_s25 }
 0xaf7   :  { %v2688_v4 = vpack.c.bf16 %v2646_v31, %v2646_v31 }
 0xaf9   :  { %v2789_v16 = vunpack.c.l.b16 %v2688_v4 }
 0xafb   :  { %v7536_v34 = vpack.c.b16 %v2789_v16, %v2789_v16 }
 0xafc   :  { %v2647_v60 = vpop.f32.mrf.mxu2  ;;  %v7556_v54 = vpop.f32.mrf.mxu3 }
 0xafd   :  { %3028 = vrot.lane.b32.xlu2 %v7521_v42, %s6287_s26  ;;  %2791 = vrot.lane.b32.xlu0 %v7536_v34, %s6286_s25  ;;  %v2648_v51 = vadd.f32 %v2647_v60, %v7492_v8 }
 0xaff   :  { %v7568_v61 = vpack.c.bf16 %v2648_v51, %v2648_v51 }
 0xb01   :  { %v2813_v63 = vunpack.c.l.b16 %v7568_v61 }
 0xb03   :  { %v7579_v7 = vpack.c.b16 %v2813_v63, %v2813_v63 }
 0xb05   :  { %3005 = vrot.lane.b32.xlu2 %v7510_v19, %s6287_s26  ;;  %3051 = vrot.lane.b32.xlu0 %v7528_v50, %s6287_s26 }
 0xb0d   :  { %3026 = vrot.lane.b32.xlu0 %v7521_v42, %s6288_s27 }
 0xb15   :  { %3003 = vrot.lane.b32.xlu0 %v7510_v19, %s6288_s27 }
 0xb1d   :  { %3074 = vrot.lane.b32.xlu0 %v7536_v34, %s6287_s26 }
 0xb25   :  { %3323 = vrot.lane.b32.xlu0 %v7528_v50, %s6289_s3 }
 0xb2d   :  { %3344 = vrot.lane.b32.xlu0 %v7536_v34, %s6289_s3 }
 0xb4f   :  { %v2696_v47 = vpop.permute.xlu0 %2695  ;;  %v2768_v49 = vpop.permute.xlu2 %2767 }
 0xb50   :  { %v2701_v36 = vsel %vm177_vm1, %v2696_v47, 0  ;;  %v2773_v22 = vsel %vm177_vm1, %v2768_v49, 0  ;;  %v2650_v27 = vpop.f32.mrf.mxu2  ;;  %v2679_v11 = vpop.f32.mrf.mxu3 }
 0xb51   :  { %v2651_v46 = vadd.f32 %v2650_v27, %v7492_v8  ;;  %v7562_v37 = vadd.f32 %v2679_v11, %v7494_v40  ;;  %2710 = vmatpush.bf16.xpose.msra.mxu0 %v2701_v36  ;;  %2782 = vmatpush.bf16.xpose.msra.mxu3 %v2773_v22 }
 0xb53   :  { %v7565_v20 = vpack.c.bf16 %v2651_v46, %v2651_v46 }
 0xb55   :  { %v2837_v30 = vunpack.c.l.b16 %v7565_v20 }
 0xb57   :  { %v7570_v0 = vpack.c.b16 %v2837_v30, %v2837_v30  ;;  %v2720_v58 = vpop.permute.xlu0 %2719 }
 0xb58   :  { %v2725_v18 = vsel %vm177_vm1, %v2720_v58, 0  ;;  %v2652_v14 = vpop.f32.mrf.mxu2  ;;  %5666 = vmatmul.msk.bf16.vlgmr.msra.gmra.mxu0 %vm177_vm1, %v2684_v5  ;;  %5669 = vmatmul.msk.bf16.vlgmr.msra.gmra.mxu3 %vm177_vm1, %v2687_v15  ;;  %v7631_v16 = vpop.f32.mrf.mxu3 }
 0xb59   :  { %v2653_v23 = vadd.f32 %v2652_v14, %v7492_v8  ;;  %2839 = vrot.lane.b32.xlu1 %v7570_v0, %s6286_s25  ;;  %2734 = vmatpush.bf16.xpose.msra.mxu1 %v2725_v18 }
 0xb5b   :  { %v2691_v3 = vpack.c.bf16 %v2653_v23, %v2653_v23 }
 0xb5d   :  { %v2861_v13 = vunpack.c.l.b16 %v2691_v3 }
 0xb5f   :  { %v7581_v52 = vpack.c.b16 %v2861_v13, %v2861_v13  ;;  %v2744_v32 = vpop.permute.xlu1 %2743 }
 0xb60   :  { %v2749_v9 = vsel %vm177_vm1, %v2744_v32, 0  ;;  %5667 = vmatmul.msk.bf16.vlgmr.msra.gmra.mxu1 %vm177_vm1, %v7507_v12  ;;  %v3029_v12 = vpop.permute.xlu2 %3028 }
 0xb61   :  { %2863 = vrot.lane.b32.xlu2 %v7581_v52, %s6286_s25  ;;  %2815 = vrot.lane.b32.xlu1 %v7579_v7, %s6286_s25  ;;  %v3034_v41 = vsel %vm177_vm1, %v3029_v12, 0 }
 0xb62   :  { %3141 = vrot.lane.b32.xlu0 %v7581_v52, %s6288_s27  ;;  %2758 = vmatpush.bf16.xpose.msra.mxu2 %v2749_v9 }
 0xb68   :  { %v3006_v2 = vpop.permute.xlu2 %3005 }
 0xb69   :  { %2980 = vrot.lane.b32.xlu2 %v7500_v26, %s6288_s27  ;;  %2982 = vrot.lane.b32.xlu1 %v7500_v26, %s6287_s26  ;;  %v3011_v47 = vsel %vm177_vm1, %v3006_v2, 0 }
 0xb6a   :  { %3365 = vrot.lane.b32.xlu0 %v7579_v7, %s6289_s3  ;;  %5668 = vmatmul.msk.bf16.vlgmr.msra.gmra.mxu2 %vm177_vm1, %v7518_v57 }
 0xb6f   :  { %v2792_v8 = vpop.permute.xlu0 %2791 }
 0xb70   :  { %v2797_v5 = vsel %vm177_vm1, %v2792_v8, 0 }
 0xb71   :  { %3118 = vrot.lane.b32.xlu2 %v7570_v0, %s6288_s27  ;;  %3049 = vrot.lane.b32.xlu1 %v7528_v50, %s6288_s27 }
 0xb72   :  { %2806 = vmatpush.bf16.xpose.msrb.mxu0 %v2797_v5 }
 0xb77   :  { %v3052_v35 = vpop.permute.xlu0 %3051 }
 0xb78   :  { %v3057_v57 = vsel %vm177_vm1, %v3052_v35, 0 }
 0xb79   :  { %3095 = vrot.lane.b32.xlu2 %v7579_v7, %s6288_s27  ;;  %3120 = vrot.lane.b32.xlu1 %v7570_v0, %s6287_s26 }
 0xb7a   :  { %5670 = vmatmul.msk.bf16.vlgmr.msrb.gmra.mxu0 %vm177_vm1, %v2688_v4 }
 0xb7f   :  { %v3027_v29 = vpop.permute.xlu0 %3026 }
 0xb81   :  { %3143 = vrot.lane.b32.xlu2 %v7581_v52, %s6287_s26  ;;  %3097 = vrot.lane.b32.xlu1 %v7579_v7, %s6287_s26 }
 0xb87   :  { %v3004_v43 = vpop.permute.xlu0 %3003 }
 0xb89   :  { %3260 = vrot.lane.b32.xlu2 %v7500_v26, %s6289_s3  ;;  %3072 = vrot.lane.b32.xlu1 %v7536_v34, %s6288_s27 }
 0xb8f   :  { %v3075_v22 = vpop.permute.xlu0 %3074 }
 0xb91   :  { %3386 = vrot.lane.b32.xlu2 %v7570_v0, %s6289_s3  ;;  %3302 = vrot.lane.b32.xlu1 %v7521_v42, %s6289_s3 }
 0xb97   :  { %v3324_v63 = vpop.permute.xlu0 %3323 }
 0xb98   :  { %v3329_v9 = vsel %vm746_vm2, %v3324_v63, 0 }
 0xb99   :  { %3281 = vrot.lane.b32.xlu1 %v7510_v19, %s6289_s3 }
 0xb9f   :  { %v3345_v12 = vpop.permute.xlu0 %3344 }
 0xba1   :  { %3407 = vrot.lane.b32.xlu1 %v7581_v52, %s6289_s3 }
 0xbbb   :  { %v2864_v28 = vpop.permute.xlu2 %2863 }
 0xbbc   :  { %v2869_v55 = vsel %vm177_vm1, %v2864_v28, 0 }
 0xbbd   :  { %2878 = vmatpush.bf16.xpose.msrb.mxu3 %v2869_v55 }
 0xbc3   :  { %v2981_v48 = vpop.permute.xlu2 %2980 }
 0xbc4   :  { %5673 = vmatmul.msk.bf16.vlgmr.msrb.gmra.mxu3 %vm177_vm1, %v2691_v3 }
 0xbc5   :  { %3066 = vmatpush.bf16.xpose.msra.mxu3 %v3057_v57 }
 0xbcb   :  { %v3119_v24 = vpop.permute.xlu2 %3118  ;;  %v2840_v15 = vpop.permute.xlu1 %2839 }
 0xbcc   :  { %v2845_v10 = vsel %vm177_vm1, %v2840_v15, 0 }
 0xbcd   :  { %2854 = vmatpush.bf16.xpose.msrb.mxu2 %v2845_v10 }
 0xbd3   :  { %v3096_v31 = vpop.permute.xlu2 %3095  ;;  %v2816_v4 = vpop.permute.xlu1 %2815 }
 0xbd4   :  { %v2821_v60 = vsel %vm177_vm1, %v2816_v4, 0  ;;  %5672 = vmatmul.msk.bf16.vlgmr.msrb.gmra.mxu2 %vm177_vm1, %v7565_v20  ;;  %v3080_v20 = vsel %vm177_vm1, %v3075_v22, 0  ;;  %v3142_v57 = vpop.permute.xlu0 %3141 }
 0xbd5   :  { %3043 = vmatpush.bf16.xpose.msra.mxu2 %v3034_v41  ;;  %2830 = vmatpush.bf16.xpose.msrb.mxu1 %v2821_v60  ;;  %v7637_v49 = vpop.f32.mrf.mxu0 }
 0xbd6   :  { %v2884_v36 = vsel %vm177_vm1, %v7637_v49, -inf }
 0xbd7   :  { %2885 = vmax.xlane.f32.xlu2 %v2884_v36 }
 0xbdb   :  { %v3144_v27 = vpop.permute.xlu2 %3143  ;;  %v2983_v11 = vpop.permute.xlu1 %2982 }
 0xbdc   :  { %v3149_v46 = vsel %vm177_vm1, %v3144_v27, 0  ;;  %v2988_v51 = vsel %vm177_vm1, %v2983_v11, 0  ;;  %v7643_v30 = vpop.f32.mrf.mxu3  ;;  %5671 = vmatmul.msk.bf16.vlgmr.msrb.gmra.mxu1 %vm177_vm1, %v7568_v61  ;;  %v3366_v22 = vpop.permute.xlu0 %3365 }
 0xbdd   :  { %3020 = vmatpush.bf16.xpose.msra.mxu1 %v3011_v47  ;;  %2997 = vmatpush.bf16.xpose.msra.mxu0 %v2988_v51  ;;  %v2714_v58 = vpop.f32.mrf.mxu0  ;;  %v7648_v18 = vpop.f32.mrf.mxu1  ;;  %v2893_v14 = vsel %vm177_vm1, %v7643_v30, -inf }
 0xbde   :  { %3158 = vmatpush.bf16.xpose.msrb.mxu3 %v3149_v46  ;;  %2894 = vmax.xlane.f32.xlu0 %v2893_v14  ;;  %v2887_v23 = vsel %vm177_vm1, %v7648_v18, -inf  ;;  %v3371_v46 = vsel %vm746_vm2, %v3366_v22, 0 }
 0xbdf   :  { %2888 = vmax.xlane.f32.xlu1 %v2887_v23 }
 0xbe3   :  { %v3261_v3 = vpop.permute.xlu2 %3260  ;;  %v3050_v13 = vpop.permute.xlu1 %3049 }
 0xbe4   :  { %v3266_v61 = vsel %vm746_vm2, %v3261_v3, 0  ;;  %v2786_v32 = vpop.f32.mrf.mxu3  ;;  %5674 = vmatmul.msk.bf16.vlgmr.msra.gmra.mxu0 %vm177_vm1, %v2981_v48  ;;  %5676 = vmatmul.msk.bf16.vlgmr.msra.gmra.mxu2 %vm177_vm1, %v3027_v29 }
 0xbe5   :  { %3089 = vmatpush.bf16.xpose.msrb.mxu0 %v3080_v20  ;;  %5677 = vmatmul.msk.bf16.vlgmr.msra.gmra.mxu3 %vm177_vm1, %v3050_v13  ;;  %v2738_v8 = vpop.f32.mrf.mxu1 }
 0xbe6   :  { %3338 = vmatpush.bf16.msra.mxu3 %v3329_v9 }
 0xbeb   :  { %v3121_v5 = vpop.permute.xlu1 %3120 }
 0xbec   :  { %v3126_v2 = vsel %vm177_vm1, %v3121_v5, 0  ;;  %5675 = vmatmul.msk.bf16.vlgmr.msra.gmra.mxu1 %vm177_vm1, %v3004_v43  ;;  %v3350_v43 = vsel %vm746_vm2, %v3345_v12, 0 }
 0xbed   :  { %3275 = vmatpush.bf16.msra.mxu0 %v3266_v61  ;;  %v7661_v35 = vpop.f32.mrf.mxu2  ;;  %3135 = vmatpush.bf16.xpose.msrb.mxu2 %v3126_v2 }
 0xbee   :  { %v2890_v28 = vsel %vm177_vm1, %v7661_v35, -inf }
 0xbef   :  { %2891 = vmax.xlane.f32.xlu1 %v2890_v28 }
 0xbf3   :  { %v3098_v55 = vpop.permute.xlu1 %3097 }
 0xbf4   :  { %v3103_v48 = vsel %vm177_vm1, %v3098_v55, 0  ;;  %5680 = vmatmul.msk.bf16.vlgmr.msrb.gmra.mxu2 %vm177_vm1, %v3119_v24  ;;  %v3387_v24 = vpop.permute.xlu2 %3386 }
 0xbf5   :  { %v2762_v29 = vpop.f32.mrf.mxu2  ;;  %5681 = vmatmul.msk.bf16.vlgmr.msrb.gmra.mxu3 %vm177_vm1, %v3142_v57  ;;  %3112 = vmatpush.bf16.xpose.msrb.mxu1 %v3103_v48  ;;  %v3392_v36 = vsel %vm746_vm2, %v3387_v24, 0 }
 0xbf7   :  { %v7668_v15 = vpop.f32.mrf.mxu0 }
 0xbf8   :  { %v2896_v10 = vsel %vm177_vm1, %v7668_v15, -inf }
 0xbf9   :  { %2897 = vmax.xlane.f32.xlu1 %v2896_v10 }
 0xbfb   :  { %v3073_v41 = vpop.permute.xlu1 %3072 }
 0xbfc   :  { %5678 = vmatmul.msk.bf16.vlgmr.msrb.gmra.mxu0 %vm177_vm1, %v3073_v41  ;;  %5679 = vmatmul.msk.bf16.vlgmr.msrb.gmra.mxu1 %vm177_vm1, %v3096_v31 }
 0xbfd   :  { %3359 = vmatpush.bf16.msrb.mxu0 %v3350_v43 }
 0xbff   :  { %v2810_v4 = vpop.f32.mrf.mxu0 }
 0xc03   :  { %v3303_v60 = vpop.permute.xlu1 %3302 }
 0xc04   :  { %v3308_v47 = vsel %vm746_vm2, %v3303_v60, 0 }
 0xc05   :  { %3317 = vmatpush.bf16.msra.mxu2 %v3308_v47 }
 0xc09   :  { %3401 = vmatpush.bf16.msrb.mxu2 %v3392_v36 }
 0xc0b   :  { %v3282_v27 = vpop.permute.xlu1 %3281 }
 0xc0c   :  { %v3287_v11 = vsel %vm746_vm2, %v3282_v27, 0 }
 0xc0d   :  { %3296 = vmatpush.bf16.msra.mxu1 %v3287_v11 }
 0xc11   :  { %3380 = vmatpush.bf16.msrb.mxu1 %v3371_v46 }
 0xc13   :  { %v3408_v51 = vpop.permute.xlu1 %3407 }
 0xc14   :  { %v3413_v31 = vsel %vm746_vm2, %v3408_v51, 0 }
 0xc15   :  { %3422 = vmatpush.bf16.msrb.mxu3 %v3413_v31 }
 0xc47   :  { %v7680_v20 = vpop.f32.mrf.mxu3 }
 0xc48   :  { %v2905_v57 = vsel %vm177_vm1, %v7680_v20, -inf }
 0xc4a   :  { %v2886_v24 = vpop.xlane.xlu2 %2885 }
 0xc4b   :  { %v2908_v36 = vsub.f32 %v7637_v49, %v2886_v24 }
 0xc4d   :  { %v2916_v51 = vmul.f32 1.442695, %v2908_v36 }
 0xc4f   :  { %v2882_v58 = vpop.f32.mrf.mxu3 }
 0xc52   :  { %v2889_v48 = vpop.xlane.xlu1 %2888 }
 0xc53   :  { %v2909_v41 = vsub.f32 %v7648_v18, %v2889_v48 }
 0xc55   :  { %v2918_v4 = vmul.f32 1.442695, %v2909_v41 }
 0xc57   :  { %v7682_v14 = vpop.f32.mrf.mxu2  ;;  %6017 = vpow2.f32 %v2918_v4 }
 0xc58   :  { %v2902_v32 = vsel %vm177_vm1, %v7682_v14, -inf  ;;  %6019 = vpow2.f32 %v2916_v51 }
 0xc59   :  { %v7684_v23 = vpop.f32.mrf.mxu1 }
 0xc5a   :  { %v2899_v63 = vsel %vm177_vm1, %v7684_v23, -inf }
 0xc5b   :  { %2900 = vmax.xlane.f32.xlu0 %v2899_v63 }
 0xc5d   :  { %v7722_v31 = vpop.eup %6017 }
 0xc5f   :  { %v2858_v3 = vpop.f32.mrf.mxu2 }
 0xc61   :  { %v2834_v13 = vpop.f32.mrf.mxu1  ;;  %v7688_v61 = vpop.f32.mrf.mxu0 }
 0xc62   :  { %v3164_v9 = vsel %vm177_vm1, %v7688_v61, -inf }
 0xc63   :  { %2903 = vmax.xlane.f32.xlu0 %v2902_v32  ;;  %3165 = vmax.xlane.f32.xlu2 %v3164_v9  ;;  %v2935_v32 = vsel %vm177_vm1, %v7722_v31, 0.0  ;;  %v7728_v9 = vpop.eup %6019 }
 0xc67   :  { %v7694_v8 = vpop.f32.mrf.mxu2 }
 0xc68   :  { %v7696_v5 = vpop.f32.mrf.mxu3  ;;  %v3170_v13 = vsel %vm177_vm1, %v7694_v8, -inf }
 0xc69   :  { %v3001_v12 = vpop.f32.mrf.mxu0  ;;  %v7698_v2 = vpop.f32.mrf.mxu1  ;;  %v3173_v28 = vsel %vm177_vm1, %v7696_v5, -inf }
 0xc6a   :  { %3174 = vmax.xlane.f32.xlu1 %v3173_v28  ;;  %v3167_v55 = vsel %vm177_vm1, %v7698_v2, -inf  ;;  %v2932_v12 = vsel %vm177_vm1, %v7728_v9, 0.0 }
 0xc6b   :  { %3168 = vmax.xlane.f32.xlu0 %v3167_v55  ;;  %2906 = vmax.xlane.f32.xlu2 %v2905_v57  ;;  %v2895_v55 = vpop.xlane.xlu0 %2894 }
 0xc6c   :  { %v2911_v57 = vsub.f32 %v7643_v30, %v2895_v55 }
 0xc6e   :  { %v2922_v48 = vmul.f32 1.442695, %v2911_v57 }
 0xc6f   :  { %v3047_v29 = vpop.f32.mrf.mxu2 }
 0xc70   :  { %v3070_v10 = vpop.f32.mrf.mxu3  ;;  %6021 = vpow2.f32 %v2922_v48  ;;  %v2892_v29 = vpop.xlane.xlu1 %2891 }
 0xc71   :  { %v3024_v43 = vpop.f32.mrf.mxu1  ;;  %v2910_v41 = vsub.f32 %v7661_v35, %v2892_v29 }
 0xc73   :  { %v2920_v4 = vmul.f32 1.442695, %v2910_v41 }
 0xc75   :  { %6023 = vpow2.f32 %v2920_v4 }
 0xc76   :  { %v7743_v10 = vpop.eup %6021 }
 0xc77   :  { %v7707_v60 = vpop.f32.mrf.mxu2  ;;  %v2941_v43 = vsel %vm177_vm1, %v7743_v10, 0.0 }
 0xc78   :  { %v7709_v47 = vpop.f32.mrf.mxu3  ;;  %v3182_v28 = vsel %vm177_vm1, %v7707_v60, -inf }
 0xc79   :  { %v3185_v22 = vsel %vm177_vm1, %v7709_v47, -inf  ;;  %v7714_v27 = vpop.f32.mrf.mxu0  ;;  %v7716_v11 = vpop.f32.mrf.mxu1 }
 0xc7a   :  { %3186 = vmax.xlane.f32.xlu1 %v3185_v22  ;;  %v3179_v18 = vsel %vm177_vm1, %v7716_v11, -inf  ;;  %v3176_v46 = vsel %vm177_vm1, %v7714_v27, -inf }
 0xc7b   :  { %3180 = vmax.xlane.f32.xlu2 %v3179_v18  ;;  %3177 = vmax.xlane.f32.xlu0 %v3176_v46  ;;  %v7748_v24 = vpop.eup %6023 }
 0xc7c   :  { %v2938_v36 = vsel %vm177_vm1, %v7748_v24, 0.0 }
 0xc7f   :  { %v3139_v49 = vpop.f32.mrf.mxu2 }
 0xc80   :  { %v3162_v58 = vpop.f32.mrf.mxu3 }
 0xc81   :  { %v3093_v63 = vpop.f32.mrf.mxu0  ;;  %v3116_v3 = vpop.f32.mrf.mxu1 }
 0xc83   :  { %3171 = vmax.xlane.f32.xlu0 %v3170_v13  ;;  %2936 = vadd.xlane.f32.xlu2 %v2935_v32  ;;  %v2898_v32 = vpop.xlane.xlu1 %2897 }
 0xc84   :  { %v2912_v29 = vsub.f32 %v7668_v15, %v2898_v32 }
 0xc8b   :  { %2933 = vadd.xlane.f32.xlu0 %v2932_v12  ;;  %3183 = vmax.xlane.f32.xlu2 %v3182_v28 }
 0xc93   :  { %3470 = vrot.lane.b32.xlu1 %v7521_v42, %s6290_s9 }
 0xc9f   :  { %3428 = vrot.lane.b32.xlu0 %v7500_v26, %s6290_s9 }
 0xca3   :  { %3491 = vrot.lane.b32.xlu2 %v7528_v50, %s6290_s9 }
 0xca7   :  { %3449 = vrot.lane.b32.xlu0 %v7510_v19, %s6290_s9 }
 0xcbd   :  { %2942 = vadd.xlane.f32.xlu1 %v2941_v43 }
 0xccc   :  { %2939 = vadd.xlane.f32.xlu2 %v2938_v36  ;;  %v2924_v36 = vmul.f32 1.442695, %v2912_v29 }
 0xcce   :  { %v2901_v30 = vpop.xlane.xlu0 %2900 }
 0xcd6   :  { %v2904_v22 = vpop.xlane.xlu0 %2903  ;;  %v3166_v18 = vpop.xlane.xlu2 %3165 }
 0xcd7   :  { %v3188_v46 = vsub.f32 %v7688_v61, %v3166_v18  ;;  %v2914_v15 = vsub.f32 %v7682_v14, %v2904_v22  ;;  %v2913_v14 = vsub.f32 %v7684_v23, %v2901_v30 }
 0xcd9   :  { %v3196_v51 = vmul.f32 1.442695, %v3188_v46 }
 0xcdb   :  { %6025 = vpow2.f32 %v3196_v51 }
 0xcdd   :  { %v3175_v57 = vpop.xlane.xlu1 %3174 }
 0xcde   :  { %v3169_v35 = vpop.xlane.xlu0 %3168  ;;  %v2907_v13 = vpop.xlane.xlu2 %2906  ;;  %v3191_v4 = vsub.f32 %v7696_v5, %v3175_v57 }
 0xcdf   :  { %v3189_v49 = vsub.f32 %v7698_v2, %v3169_v35 }
 0xce0   :  { %v3202_v18 = vmul.f32 1.442695, %v3191_v4 }
 0xce1   :  { %v3198_v58 = vmul.f32 1.442695, %v3189_v49  ;;  %v7754_v63 = vpop.eup %6025 }
 0xce2   :  { %v3212_v3 = vsel %vm177_vm1, %v7754_v63, 0.0 }
 0xce3   :  { %6027 = vpow2.f32 %v3198_v58  ;;  %3213 = vadd.xlane.f32.xlu0 %v3212_v3  ;;  %v2928_v3 = vmul.f32 1.442695, %v2914_v15 }
 0xce9   :  { %v7758_v12 = vpop.eup %6027 }
 0xcea   :  { %v3215_v61 = vsel %vm177_vm1, %v7758_v12, 0.0 }
 0xceb   :  { %3216 = vadd.xlane.f32.xlu2 %v3215_v61 }
 0xcee   :  { %v3181_v28 = vpop.xlane.xlu2 %3180  ;;  %v3178_v55 = vpop.xlane.xlu0 %3177 }
 0xcef   :  { %v3193_v2 = vsub.f32 %v7716_v11, %v3181_v28  ;;  %v3192_v48 = vsub.f32 %v7714_v27, %v3178_v55  ;;  %v2915_v11 = vsub.f32 %v7680_v20, %v2907_v13  ;;  %v2926_v55 = vmul.f32 1.442695, %v2913_v14 }
 0xcf1   :  { %v3206_v41 = vmul.f32 1.442695, %v3193_v2  ;;  %v3204_v43 = vmul.f32 1.442695, %v3192_v48 }
 0xcf3   :  { %6029 = vpow2.f32 %v3206_v41 }
 0xcf4   :  { %6031 = vpow2.f32 %v3204_v43 }
 0xcf5   :  { %6033 = vpow2.f32 %v2924_v36 }
 0xcf6   :  { %v3172_v46 = vpop.xlane.xlu0 %3171  ;;  %6035 = vpow2.f32 %v3202_v18  ;;  %v7804_v41 = vpop.xlane.xlu2 %2936 }
 0xcf7   :  { %v3190_v51 = vsub.f32 %v7694_v8, %v3172_v46  ;;  %v2930_v8 = vmul.f32 1.442695, %v2915_v11  ;;  %v3187_v18 = vpop.xlane.xlu1 %3186 }
 0xcf8   :  { %v3195_v46 = vsub.f32 %v7709_v47, %v3187_v18 }
 0xcf9   :  { %v7767_v35 = vpop.eup %6029  ;;  %v3200_v49 = vmul.f32 1.442695, %v3190_v51 }
 0xcfa   :  { %v7770_v27 = vpop.eup %6031  ;;  %v3227_v5 = vsel %vm177_vm1, %v7767_v35, 0.0 }
 0xcfb   :  { %6037 = vpow2.f32 %v3200_v49  ;;  %3228 = vadd.xlane.f32.xlu0 %v3227_v5  ;;  %v3224_v58 = vsel %vm177_vm1, %v7770_v27, 0.0  ;;  %v7777_v32 = vpop.eup %6033  ;;  %v3210_v49 = vmul.f32 1.442695, %v3195_v46 }
 0xcfc   :  { %3225 = vadd.xlane.f32.xlu1 %v3224_v58  ;;  %v7779_v20 = vpop.eup %6035  ;;  %6039 = vpow2.f32 %v2930_v8  ;;  %v2944_v61 = vsel %vm177_vm1, %v7777_v32, 0.0 }
 0xcfd   :  { %6041 = vpow2.f32 %v2928_v3  ;;  %v3221_v28 = vsel %vm177_vm1, %v7779_v20, 0.0 }
 0xcfe   :  { %6043 = vpow2.f32 %v2926_v55  ;;  %v3184_v43 = vpop.xlane.xlu2 %3183  ;;  %v2934_v11 = vpop.xlane.xlu0 %2933 }
 0xcff   :  { %v3194_v4 = vsub.f32 %v7707_v60, %v3184_v43 }
 0xd01   :  { %v7781_v13 = vpop.eup %6037  ;;  %v3208_v36 = vmul.f32 1.442695, %v3194_v4 }
 0xd02   :  { %v3218_v22 = vsel %vm177_vm1, %v7781_v13, 0.0  ;;  %v7790_v57 = vpop.eup %6039 }
 0xd03   :  { %3219 = vadd.xlane.f32.xlu2 %v3218_v22  ;;  %2945 = vadd.xlane.f32.xlu0 %v2944_v61  ;;  %v7792_v2 = vpop.eup %6041  ;;  %v2953_v23 = vsel %vm177_vm1, %v7790_v57, 0.0  ;;  %6045 = vpow2.f32 %v3208_v36 }
 0xd04   :  { %3222 = vadd.xlane.f32.xlu1 %v3221_v28  ;;  %v2950_v30 = vsel %vm177_vm1, %v7792_v2, 0.0  ;;  %v7798_v48 = vpop.eup %6043  ;;  %6047 = vpow2.f32 %v3210_v49 }
 0xd05   :  { %v2947_v29 = vsel %vm177_vm1, %v7798_v48, 0.0  ;;  %v3471_v28 = vpop.permute.xlu1 %3470 }
 0xd06   :  { %v7828_v58 = vpop.permute.xlu2 %3491 }
 0xd09   :  { %v7814_v51 = vpop.eup %6045 }
 0xd0a   :  { %v3230_v15 = vsel %vm177_vm1, %v7814_v51, 0.0  ;;  %v7822_v5 = vpop.eup %6047 }
 0xd0b   :  { %2954 = vadd.xlane.f32.xlu2 %v2953_v23  ;;  %v3233_v47 = vsel %vm177_vm1, %v7822_v5, 0.0 }
 0xd0c   :  { %2951 = vadd.xlane.f32.xlu1 %v2950_v30 }
 0xd11   :  { %v3429_v60 = vpop.permute.xlu0 %3428 }
 0xd12   :  { %v3434_v30 = vsel %vm746_vm2, %v3429_v60, 0 }
 0xd14   :  { %2948 = vadd.xlane.f32.xlu1 %v2947_v29 }
 0xd17   :  { %3575 = vrot.lane.b32.xlu0 %v7581_v52, %s6290_s9 }
 0xd19   :  { %v3450_v8 = vpop.permute.xlu0 %3449 }
 0xd23   :  { %3554 = vrot.lane.b32.xlu2 %v7570_v0, %s6290_s9 }
 0xd2d   :  { %3512 = vrot.lane.b32.xlu1 %v7536_v34, %s6290_s9 }
 0xd30   :  { %v7848_v4 = vpop.xlane.xlu1 %2942 }
 0xd35   :  { %3667 = vrot.lane.b32.xlu1 %v7528_v50, %s6291_s10 }
 0xd3d   :  { %3642 = vrot.lane.b32.xlu1 %v7521_v42, %s6292_s11 }
 0xd3f   :  { %v7834_v3 = vpop.xlane.xlu2 %2939 }
 0xd41   :  { %3231 = vadd.xlane.f32.xlu0 %v3230_v15 }
 0xd45   :  { %3619 = vrot.lane.b32.xlu1 %v7510_v19, %s6292_s11 }
 0xd4c   :  { %3234 = vadd.xlane.f32.xlu2 %v3233_v47 }
 0xd4d   :  { %3690 = vrot.lane.b32.xlu1 %v7536_v34, %s6291_s10 }
 0xd55   :  { %3757 = vrot.lane.b32.xlu1 %v7581_v52, %s6292_s11  ;;  %3644 = vrot.lane.b32.xlu0 %v7521_v42, %s6291_s10 }
 0xd56   :  { %v3214_v14 = vpop.xlane.xlu0 %3213 }
 0xd57   :  { %6049 = vrcp.f32 %v3214_v14 }
 0xd5d   :  { %4046 = vrot.lane.b32.xlu1 %v7500_v26, %s6293_s12  ;;  %3621 = vrot.lane.b32.xlu0 %v7510_v19, %s6291_s10  ;;  %v6050_v22 = vpop.eup %6049 }
 0xd5e   :  { %v3217_v61 = vpop.xlane.xlu2 %3216  ;;  %v3244_v55 = vmul.f32 %v6050_v22, %v7754_v63  ;;  %v3455_v63 = vsel %vm746_vm2, %v3450_v8, 0 }
 0xd5f   :  { %6051 = vrcp.f32 %v3217_v61 }
 0xd60   :  { %v3252_v23 = vpack.c.bf16 %v3244_v55, %v3244_v55 }
 0xd62   :  { %5682 = vmatmul.msk.bf16.vlgmr.msra.gmra.mxu0 %vm177_vm1, %v3252_v23 }
 0xd63   :  { %3443 = vmatpush.bf16.msra.mxu0 %v3434_v30 }
 0xd64   :  { %3533 = vrot.lane.b32.xlu2 %v7579_v7, %s6290_s9 }
 0xd65   :  { %v6052_v29 = vpop.eup %6051  ;;  %3596 = vrot.lane.b32.xlu0 %v7500_v26, %s6292_s11 }
 0xd66   :  { %v3245_v43 = vmul.f32 %v6052_v29, %v7758_v12 }
 0xd68   :  { %v3253_v36 = vpack.c.bf16 %v3245_v43, %v3245_v43 }
 0xd6a   :  { %5683 = vmatmul.msk.bf16.vlgmr.msra.gmra.mxu1 %vm177_vm1, %v3253_v36  ;;  %v3497_v36 = vsel %vm746_vm2, %v7828_v58, 0 }
 0xd6b   :  { %3464 = vmatpush.bf16.msra.mxu1 %v3455_v63 }
 0xd6c   :  { %3598 = vrot.lane.b32.xlu2 %v7500_v26, %s6291_s10 }
 0xd6d   :  { %3759 = vrot.lane.b32.xlu0 %v7581_v52, %s6291_s10 }
 0xd6e   :  { %v3229_v18 = vpop.xlane.xlu0 %3228 }
 0xd6f   :  { %6053 = vrcp.f32 %v3229_v18  ;;  %v3226_v46 = vpop.xlane.xlu1 %3225 }
 0xd70   :  { %6055 = vrcp.f32 %v3226_v46 }
 0xd74   :  { %3665 = vrot.lane.b32.xlu2 %v7528_v50, %s6292_s11 }
 0xd75   :  { %v6054_v12 = vpop.eup %6053  ;;  %3734 = vrot.lane.b32.xlu0 %v7570_v0, %s6292_s11 }
 0xd76   :  { %v6056_v49 = vpop.eup %6055  ;;  %v3249_v15 = vmul.f32 %v6054_v12, %v7767_v35  ;;  %v3220_v60 = vpop.xlane.xlu2 %3219 }
 0xd77   :  { %v3248_v47 = vmul.f32 %v6056_v49, %v7770_v27  ;;  %6057 = vrcp.f32 %v3220_v60  ;;  %v3223_v8 = vpop.xlane.xlu1 %3222  ;;  %v2946_v58 = vpop.xlane.xlu0 %2945 }
 0xd78   :  { %v3257_v14 = vpack.c.bf16 %v3249_v15, %v3249_v15  ;;  %6059 = vrcp.f32 %v3223_v8 }
 0xd79   :  { %v3256_v22 = vpack.c.bf16 %v3248_v47, %v3248_v47  ;;  %6061 = vrcp.f32 %v7804_v41  ;;  %v3476_v41 = vsel %vm746_vm2, %v3471_v28, 0 }
 0xd7a   :  { %5687 = vmatmul.msk.bf16.vlgmr.msrb.gmra.mxu1 %vm177_vm1, %v3257_v14  ;;  %6063 = vrcp.f32 %v2934_v11 }
 0xd7b   :  { %5686 = vmatmul.msk.bf16.vlgmr.msrb.gmra.mxu0 %vm177_vm1, %v3256_v22  ;;  %6065 = vrcp.f32 %v2946_v58 }
 0xd7c   :  { %3736 = vrot.lane.b32.xlu2 %v7570_v0, %s6291_s10 }
 0xd7d   :  { %v6058_v61 = vpop.eup %6057  ;;  %3711 = vrot.lane.b32.xlu0 %v7579_v7, %s6292_s11 }
 0xd7e   :  { %v3246_v35 = vmul.f32 %v6058_v61, %v7781_v13  ;;  %v6060_v27 = vpop.eup %6059  ;;  %v2955_v60 = vpop.xlane.xlu2 %2954 }
 0xd7f   :  { %v3247_v23 = vmul.f32 %v6060_v27, %v7779_v20  ;;  %v6062_v30 = vpop.eup %6061 }
 0xd80   :  { %v3254_v55 = vpack.c.bf16 %v3246_v35, %v3246_v35  ;;  %v6064_v29 = vpop.eup %6063  ;;  %v2965_v11 = vmul.f32 %v6062_v30, %v7722_v31  ;;  %v2952_v31 = vpop.xlane.xlu1 %2951 }
 0xd81   :  { %v3255_v43 = vpack.c.bf16 %v3247_v23, %v3247_v23  ;;  %v2964_v20 = vmul.f32 %v6064_v29, %v7728_v9  ;;  %v6066_v18 = vpop.eup %6065 }
 0xd82   :  { %5684 = vmatmul.msk.bf16.vlgmr.msra.gmra.mxu2 %vm177_vm1, %v3254_v55  ;;  %v2973_v13 = vpack.c.bf16 %v2965_v11, %v2965_v11  ;;  %v2968_v9 = vmul.f32 %v6066_v18, %v7777_v32 }
 0xd83   :  { %3485 = vmatpush.bf16.msra.mxu2 %v3476_v41  ;;  %5685 = vmatmul.msk.bf16.vlgmr.msra.gmra.mxu3 %vm177_vm1, %v3255_v43  ;;  %v2972_v28 = vpack.c.bf16 %v2964_v20, %v2964_v20 }
 0xd84   :  { %3713 = vrot.lane.b32.xlu2 %v7579_v7, %s6291_s10  ;;  %3506 = vmatpush.bf16.msra.mxu3 %v3497_v36  ;;  %v2976_v49 = vpack.c.bf16 %v2968_v9, %v2968_v9 }
 0xd85   :  { %4069 = vrot.lane.b32.xlu0 %v7510_v19, %s6293_s12 }
 0xd86   :  { %v3555_v14 = vpop.permute.xlu2 %3554 }
 0xd87   :  { %v3560_v55 = vsel %vm746_vm2, %v3555_v14, 0 }
 0xd88   :  { %v2949_v63 = vpop.xlane.xlu1 %2948 }
 0xd89   :  { %v3576_v15 = vpop.permute.xlu0 %3575 }
 0xd8a   :  { %5691 = vmatmul.msk.bf16.vlgmr.msra.gmra.mxu1 %vm177_vm1, %v2973_v13 }
 0xd8b   :  { %5690 = vmatmul.msk.bf16.vlgmr.msra.gmra.mxu0 %vm177_vm1, %v2972_v28 }
 0xd8c   :  { %3688 = vrot.lane.b32.xlu2 %v7536_v34, %s6292_s11 }
 0xd9f   :  { %v3513_v46 = vpop.permute.xlu1 %3512 }
 0xda0   :  { %v3518_v12 = vsel %vm746_vm2, %v3513_v46, 0 }
 0xda1   :  { %3527 = vmatpush.bf16.msrb.mxu0 %v3518_v12 }
 0xda4   :  { %5694 = vmatmul.msk.bf16.vlgmr.msrb.gmra.mxu0 %vm177_vm1, %v2976_v49  ;;  %v7910_v49 = vpack.c.bf16 %v7498_v1, %v7498_v1 }
 0xda7   :  { %v3668_v47 = vpop.permute.xlu1 %3667 }
 0xdaf   :  { %v7889_v61 = vpop.permute.xlu1 %3642 }
 0xdb4   :  { %v3232_v8 = vpop.xlane.xlu0 %3231 }
 0xdb5   :  { %6067 = vrcp.f32 %v3232_v8 }
 0xdb6   :  { %6069 = vrcp.f32 %v2949_v63 }
 0xdb7   :  { %v3620_v30 = vpop.permute.xlu1 %3619 }
 0xdbb   :  { %v6068_v22 = vpop.eup %6067 }
 0xdbc   :  { %v3250_v35 = vmul.f32 %v6068_v22, %v7814_v51  ;;  %v6070_v23 = vpop.eup %6069 }
 0xdbd   :  { %v2969_v43 = vmul.f32 %v6070_v23, %v7798_v48 }
 0xdbe   :  { %v3258_v32 = vpack.c.bf16 %v3250_v35, %v3250_v35 }
 0xdbf   :  { %v3235_v27 = vpop.xlane.xlu2 %3234  ;;  %v2977_v58 = vpack.c.bf16 %v2969_v43, %v2969_v43 }
 0xdc0   :  { %6071 = vrcp.f32 %v3235_v27  ;;  %5688 = vmatmul.msk.bf16.vlgmr.msrb.gmra.mxu2 %vm177_vm1, %v3258_v32  ;;  %v3673_v27 = vsel %vm177_vm1, %v3668_v47, 0 }
 0xdc1   :  { %6073 = vrcp.f32 %v7834_v3  ;;  %3569 = vmatpush.bf16.msrb.mxu2 %v3560_v55  ;;  %v3581_v3 = vsel %vm746_vm2, %v3576_v15, 0 }
 0xdc2   :  { %6075 = vrcp.f32 %v7848_v4 }
 0xdc3   :  { %6077 = vrcp.f32 %v2952_v31  ;;  %v3888_v31 = vsel %vm746_vm2, %v7910_v49, 0 }
 0xdc4   :  { %6079 = vrcp.f32 %v2955_v60 }
 0xdc6   :  { %v6072_v29 = vpop.eup %6071 }
 0xdc7   :  { %v6074_v41 = vpop.eup %6073  ;;  %v3251_v11 = vmul.f32 %v6072_v29, %v7822_v5  ;;  %v3645_v51 = vpop.permute.xlu0 %3644 }
 0xdc8   :  { %v3534_v36 = vpop.permute.xlu2 %3533  ;;  %v2966_v28 = vmul.f32 %v6074_v41, %v7748_v24  ;;  %v3691_v5 = vpop.permute.xlu1 %3690  ;;  %v3650_v18 = vsel %vm177_vm1, %v3645_v51, 0 }
 0xdc9   :  { %v3259_v20 = vpack.c.bf16 %v3251_v11, %v3251_v11  ;;  %v3539_v13 = vsel %vm746_vm2, %v3534_v36, 0  ;;  %v6076_v12 = vpop.eup %6075  ;;  %v3696_v4 = vsel %vm177_vm1, %v3691_v5, 0 }
 0xdca   :  { %3548 = vmatpush.bf16.msrb.mxu1 %v3539_v13  ;;  %v2974_v48 = vpack.c.bf16 %v2966_v28, %v2966_v28  ;;  %v2967_v15 = vmul.f32 %v6076_v12, %v7743_v10  ;;  %v6078_v8 = vpop.eup %6077  ;;  %v2677_v13 = vadd.f32 %v7556_v54, %v7494_v40  ;;  %v7965_v12 = vpack.c.bf16 %v7562_v37, %v7562_v37 }
 0xdcb   :  { %5689 = vmatmul.msk.bf16.vlgmr.msrb.gmra.mxu3 %vm177_vm1, %v3259_v20  ;;  %v2970_v32 = vmul.f32 %v6078_v8, %v7792_v2  ;;  %v6080_v41 = vpop.eup %6079  ;;  %v2667_v2 = vadd.f32 %v7502_v45, %v7494_v40  ;;  %v2682_v8 = vadd.f32 %v7631_v16, %v7494_v40 }
 0xdcc   :  { %3590 = vmatpush.bf16.msrb.mxu3 %v3581_v3  ;;  %v2975_v35 = vpack.c.bf16 %v2967_v15, %v2967_v15  ;;  %v2971_v47 = vmul.f32 %v6080_v41, %v7790_v57  ;;  %v7936_v57 = vpack.c.bf16 %v7514_v59, %v7514_v59  ;;  %v7942_v3 = vpack.c.bf16 %v2677_v13, %v2677_v13 }
 0xdcd   :  { %5695 = vmatmul.msk.bf16.vlgmr.msrb.gmra.mxu1 %vm177_vm1, %v2977_v58  ;;  %v2978_v1 = vpack.c.bf16 %v2970_v32, %v2970_v32  ;;  %v7925_v43 = vpack.c.bf16 %v2667_v2, %v2667_v2  ;;  %v7940_v58 = vpack.c.bf16 %v7532_v38, %v7532_v38  ;;  %v2672_v38 = vadd.f32 %v7523_v39, %v7494_v40 }
 0xdce   :  { %v2979_v36 = vpack.c.bf16 %v2971_v47, %v2971_v47  ;;  %v3983_v59 = vsel %vm746_vm2, %v7942_v3, 0  ;;  %v4002_v39 = vsel %vm746_vm2, %v7965_v12, 0 }
 0xdcf   :  { %v3622_v63 = vpop.permute.xlu0 %3621  ;;  %v3907_v28 = vsel %vm746_vm2, %v7925_v43, 0 }
 0xdd0   :  { %v3627_v9 = vsel %vm177_vm1, %v3622_v63, 0  ;;  %v3599_v46 = vpop.permute.xlu2 %3598  ;;  %5692 = vmatmul.msk.bf16.vlgmr.msra.gmra.mxu2 %vm177_vm1, %v2974_v48  ;;  %v3926_v63 = vsel %vm746_vm2, %v7936_v57, 0 }
 0xdd1   :  { %v3604_v24 = vsel %vm177_vm1, %v3599_v46, 0  ;;  %3659 = vmatpush.bf16.xpose.msra.mxu2 %v3650_v18  ;;  %3636 = vmatpush.bf16.xpose.msra.mxu1 %v3627_v9  ;;  %v3964_v18 = vsel %vm746_vm2, %v7940_v58, 0 }
 0xdd2   :  { %3613 = vmatpush.bf16.xpose.msra.mxu0 %v3604_v24 }
 0xdd7   :  { %v3597_v14 = vpop.permute.xlu0 %3596 }
 0xdd8   :  { %v3666_v22 = vpop.permute.xlu2 %3665 }
 0xdd9   :  { %5698 = vmatmul.msk.bf16.vlgmr.msra.gmra.mxu0 %vm177_vm1, %v3597_v14 }
 0xdda   :  { %3705 = vmatpush.bf16.xpose.msrb.mxu0 %v3696_v4 }
 0xddb   :  { %5693 = vmatmul.msk.bf16.vlgmr.msra.gmra.mxu3 %vm177_vm1, %v2975_v35 }
 0xddc   :  { %3682 = vmatpush.bf16.xpose.msra.mxu3 %v3673_v27 }
 0xddd   :  { %5699 = vmatmul.msk.bf16.vlgmr.msra.gmra.mxu1 %vm177_vm1, %v3620_v30 }
 0xddf   :  { %v3760_v10 = vpop.permute.xlu0 %3759  ;;  %v3277_v55 = vpop.f32.mrf.mxu0 }
 0xde0   :  { %v3737_v23 = vpop.permute.xlu2 %3736  ;;  %5696 = vmatmul.msk.bf16.vlgmr.msrb.gmra.mxu2 %vm177_vm1, %v2978_v1  ;;  %v3765_v45 = vsel %vm177_vm1, %v3760_v10, 0  ;;  %v3758_v1 = vpop.permute.xlu1 %3757 }
 0xde1   :  { %v3742_v29 = vsel %vm177_vm1, %v3737_v23, 0 }
 0xde2   :  { %3897 = vmatpush.bf16.msra.mxu0 %v3888_v31  ;;  %3751 = vmatpush.bf16.xpose.msrb.mxu2 %v3742_v29 }
 0xde7   :  { %v3298_v60 = vpop.f32.mrf.mxu1  ;;  %v3735_v11 = vpop.permute.xlu0 %3734 }
 0xde8   :  { %v3279_v30 = vpop.f32.mrf.mxu0  ;;  %v3714_v51 = vpop.permute.xlu2 %3713 }
 0xde9   :  { %v3719_v20 = vsel %vm177_vm1, %v3714_v51, 0 }
 0xdea   :  { %3728 = vmatpush.bf16.xpose.msrb.mxu1 %v3719_v20 }
 0xdeb   :  { %5697 = vmatmul.msk.bf16.vlgmr.msrb.gmra.mxu3 %vm177_vm1, %v2979_v36 }
 0xdec   :  { %3774 = vmatpush.bf16.xpose.msrb.mxu3 %v3765_v45 }
 0xdef   :  { %v3300_v54 = vpop.f32.mrf.mxu1  ;;  %v3712_v48 = vpop.permute.xlu0 %3711 }
 0xdf0   :  { %v3689_v5 = vpop.permute.xlu2 %3688  ;;  %5700 = vmatmul.msk.bf16.vlgmr.msra.gmra.mxu2 %vm177_vm1, %v7889_v61  ;;  %v7956_v61 = vpack.c.bf16 %v2672_v38, %v2672_v38 }
 0xdf1   :  { %5702 = vmatmul.msk.bf16.vlgmr.msrb.gmra.mxu0 %vm177_vm1, %v3689_v5  ;;  %5703 = vmatmul.msk.bf16.vlgmr.msrb.gmra.mxu1 %vm177_vm1, %v3712_v48 }
 0xdf2   :  { %3916 = vmatpush.bf16.msra.mxu1 %v3907_v28  ;;  %3935 = vmatpush.bf16.msra.mxu2 %v3926_v63  ;;  %v3945_v24 = vsel %vm746_vm2, %v7956_v61, 0 }
 0xdf3   :  { %3973 = vmatpush.bf16.msrb.mxu0 %v3964_v18 }
 0xdf6   :  { %3992 = vmatpush.bf16.msrb.mxu1 %v3983_v59 }
 0xdf7   :  { %v7958_v9 = vpop.f32.mrf.mxu1 }
 0xdf8   :  { %v3361_v46 = vpop.f32.mrf.mxu0 }
 0xdfb   :  { %5701 = vmatmul.msk.bf16.vlgmr.msra.gmra.mxu3 %vm177_vm1, %v3666_v22  ;;  %v7974_v22 = vpack.c.bf16 %v2682_v8, %v2682_v8 }
 0xdfc   :  { %3954 = vmatpush.bf16.msra.mxu3 %v3945_v24 }
 0xdfd   :  { %v4021_v10 = vsel %vm746_vm2, %v7974_v22, 0 }
 0xdff   :  { %v3384_v4 = vpop.f32.mrf.mxu1 }
 0xe00   :  { %v3363_v15 = vpop.f32.mrf.mxu0  ;;  %5704 = vmatmul.msk.bf16.vlgmr.msrb.gmra.mxu2 %vm177_vm1, %v3735_v11 }
 0xe01   :  { %4011 = vmatpush.bf16.msrb.mxu2 %v4002_v39 }
 0xe05   :  { %v7972_v14 = vpop.f32.mrf.mxu2 }
 0xe06   :  { %v7976_v31 = vpop.f32.mrf.mxu3 }
 0xe07   :  { %v3466_v37 = vpop.f32.mrf.mxu1 }
 0xe08   :  { %v3445_v35 = vpop.f32.mrf.mxu0  ;;  %v7978_v32 = vadd.f32 %v3466_v37, %v3298_v60 }
 0xe09   :  { %v7980_v27 = vadd.f32 %v3445_v35, %v3277_v55 }
 0xe0b   :  { %5705 = vmatmul.msk.bf16.vlgmr.msrb.gmra.mxu3 %vm177_vm1, %v3758_v1 }
 0xe0c   :  { %4030 = vmatpush.bf16.msrb.mxu3 %v4021_v10 }
 0xe0d   :  { %v3321_v40 = vpop.f32.mrf.mxu2 }
 0xe0e   :  { %v3342_v16 = vpop.f32.mrf.mxu3 }
 0xe0f   :  { %v3468_v23 = vpop.f32.mrf.mxu1 }
 0xe10   :  { %v3447_v29 = vpop.f32.mrf.mxu0 }
 0xe21   :  { %v3529_v41 = vpop.f32.mrf.mxu0 }
 0xe22   :  { %v7985_v2 = vadd.f32 %v3529_v41, %v3361_v46 }
 0xe29   :  { %v3531_v47 = vpop.f32.mrf.mxu0 }
 0xe43   :  { %v3403_v11 = vpop.f32.mrf.mxu2 }
 0xe4a   :  { %v7987_v60 = vpop.f32.mrf.mxu1 }
 0xe4b   :  { %v3405_v55 = vpop.f32.mrf.mxu2 }
 0xe4e   :  { %v3424_v30 = vpop.f32.mrf.mxu3 }
 0xe52   :  { %v3552_v51 = vpop.f32.mrf.mxu1 }
 0xe53   :  { %v7989_v36 = vpop.f32.mrf.mxu2 }
 0xe56   :  { %v3615_v20 = vpop.f32.mrf.mxu0  ;;  %v3426_v13 = vpop.f32.mrf.mxu3 }
 0xe57   :  { %v3780_v28 = vsel %vm177_vm1, %v3615_v20, -inf }
 0xe58   :  { %3781 = vmax.xlane.f32.xlu1 %v3780_v28 }
 0xe5a   :  { %v3638_v45 = vpop.f32.mrf.mxu1 }
 0xe5b   :  { %v3489_v54 = vpop.f32.mrf.mxu2  ;;  %v3783_v48 = vsel %vm177_vm1, %v3638_v45, -inf }
 0xe5c   :  { %3784 = vmax.xlane.f32.xlu2 %v3783_v48  ;;  %v8011_v48 = vpop.permute.xlu1 %4046 }
 0xe5e   :  { %v3617_v5 = vpop.f32.mrf.mxu0  ;;  %v7993_v63 = vpop.f32.mrf.mxu3 }
 0xe62   :  { %v3640_v18 = vpop.f32.mrf.mxu1 }
 0xe63   :  { %v3571_v59 = vpop.f32.mrf.mxu2 }
 0xe64   :  { %v7995_v38 = vadd.f32 %v3571_v59, %v3403_v11 }
 0xe66   :  { %v3510_v46 = vpop.f32.mrf.mxu3 }
 0xe6b   :  { %v3573_v24 = vpop.f32.mrf.mxu2 }
 0xe6e   :  { %v3707_v4 = vpop.f32.mrf.mxu0  ;;  %v3730_v39 = vpop.f32.mrf.mxu1 }
 0xe6f   :  { %v3592_v15 = vpop.f32.mrf.mxu3  ;;  %v3795_v8 = vsel %vm177_vm1, %v3730_v39, -inf  ;;  %v3792_v37 = vsel %vm177_vm1, %v3707_v4, -inf }
 0xe70   :  { %v7999_v35 = vadd.f32 %v3592_v15, %v3424_v30  ;;  %3796 = vmax.xlane.f32.xlu0 %v3795_v8  ;;  %3793 = vmax.xlane.f32.xlu1 %v3792_v37 }
 0xe73   :  { %v3661_v1 = vpop.f32.mrf.mxu2 }
 0xe74   :  { %v3786_v23 = vsel %vm177_vm1, %v3661_v1, -inf }
 0xe76   :  { %v3709_v10 = vpop.f32.mrf.mxu0  ;;  %v3732_v40 = vpop.f32.mrf.mxu1 }
 0xe77   :  { %v3594_v16 = vpop.f32.mrf.mxu3  ;;  %v8019_v40 = vpop.permute.xlu0 %4069 }
 0xe78   :  { %3787 = vmax.xlane.f32.xlu0 %v3786_v23 }
 0xe7b   :  { %v3663_v29 = vpop.f32.mrf.mxu2 }
 0xe7f   :  { %v3684_v41 = vpop.f32.mrf.mxu3 }
 0xe80   :  { %v3789_v47 = vsel %vm177_vm1, %v3684_v41, -inf }
 0xe81   :  { %3790 = vmax.xlane.f32.xlu2 %v3789_v47 }
 0xe83   :  { %v3753_v11 = vpop.f32.mrf.mxu2 }
 0xe84   :  { %v3798_v51 = vsel %vm177_vm1, %v3753_v11, -inf }
 0xe87   :  { %v3686_v55 = vpop.f32.mrf.mxu3 }
 0xe89   :  { %3799 = vmax.xlane.f32.xlu2 %v3798_v51 }
 0xe8b   :  { %v3755_v30 = vpop.f32.mrf.mxu2 }
 0xe8c   :  { %4115 = vrot.lane.b32.xlu0 %v7528_v50, %s6293_s12 }
 0xe8f   :  { %v3776_v13 = vpop.f32.mrf.mxu3 }
 0xe90   :  { %v3801_v28 = vsel %vm177_vm1, %v3776_v13, -inf }
 0xe91   :  { %3802 = vmax.xlane.f32.xlu1 %v3801_v28 }
 0xe97   :  { %v3778_v54 = vpop.f32.mrf.mxu3 }
 0xea1   :  { %4092 = vrot.lane.b32.xlu2 %v7521_v42, %s6293_s12 }
 0xeaa   :  { %4044 = vrot.lane.b32.xlu1 %v7500_v26, %s6294_s13 }
 0xecb   :  { %v3782_v5 = vpop.xlane.xlu1 %3781 }
 0xecc   :  { %v3804_v18 = vsub.f32 %v3615_v20, %v3782_v5 }
 0xece   :  { %v3812_v59 = vmul.f32 1.442695, %v3804_v18 }
 0xecf   :  { %v3785_v46 = vpop.xlane.xlu2 %3784 }
 0xed0   :  { %6081 = vpow2.f32 %v3812_v59  ;;  %v3805_v24 = vsub.f32 %v3638_v45, %v3785_v46 }
 0xed2   :  { %v3814_v15 = vmul.f32 1.442695, %v3805_v24 }
 0xed4   :  { %6083 = vpow2.f32 %v3814_v15 }
 0xed6   :  { %v8013_v8 = vpop.eup %6081 }
 0xed7   :  { %v3828_v37 = vsel %vm177_vm1, %v8013_v8, 0.0 }
 0xed8   :  { %3829 = vadd.xlane.f32.xlu0 %v3828_v37 }
 0xeda   :  { %v8017_v10 = vpop.eup %6083 }
 0xedb   :  { %v3831_v26 = vsel %vm177_vm1, %v8017_v10, 0.0 }
 0xedc   :  { %3832 = vadd.xlane.f32.xlu2 %v3831_v26 }
 0xee3   :  { %v3797_v20 = vpop.xlane.xlu0 %3796  ;;  %v3794_v16 = vpop.xlane.xlu1 %3793 }
 0xee4   :  { %v3809_v23 = vsub.f32 %v3730_v39, %v3797_v20  ;;  %v3808_v45 = vsub.f32 %v3707_v4, %v3794_v16 }
 0xee6   :  { %v3822_v29 = vmul.f32 1.442695, %v3809_v23  ;;  %v3820_v47 = vmul.f32 1.442695, %v3808_v45 }
 0xee8   :  { %6085 = vpow2.f32 %v3822_v29 }
 0xee9   :  { %6087 = vpow2.f32 %v3820_v47 }
 0xeeb   :  { %v3788_v55 = vpop.xlane.xlu0 %3787 }
 0xeec   :  { %v3806_v51 = vsub.f32 %v3661_v1, %v3788_v55 }
 0xeee   :  { %v8023_v30 = vpop.eup %6085  ;;  %v3816_v28 = vmul.f32 1.442695, %v3806_v51 }
 0xeef   :  { %v8025_v54 = vpop.eup %6087  ;;  %v3843_v5 = vsel %vm177_vm1, %v8023_v30, 0.0 }
 0xef0   :  { %6089 = vpow2.f32 %v3816_v28  ;;  %3844 = vadd.xlane.f32.xlu1 %v3843_v5  ;;  %v3840_v39 = vsel %vm177_vm1, %v8025_v54, 0.0 }
 0xef1   :  { %3841 = vadd.xlane.f32.xlu2 %v3840_v39  ;;  %v4075_v39 = vsel %vm177_vm1, %v8019_v40, 0 }
 0xef4   :  { %v3791_v4 = vpop.xlane.xlu2 %3790 }
 0xef5   :  { %v3807_v18 = vsub.f32 %v3684_v41, %v3791_v4 }
 0xef6   :  { %v8031_v59 = vpop.eup %6089 }
 0xef7   :  { %v3818_v46 = vmul.f32 1.442695, %v3807_v18  ;;  %v3834_v1 = vsel %vm177_vm1, %v8031_v59, 0.0 }
 0xef8   :  { %3835 = vadd.xlane.f32.xlu1 %v3834_v1 }
 0xef9   :  { %6091 = vpow2.f32 %v3818_v46 }
 0xefc   :  { %v3800_v24 = vpop.xlane.xlu2 %3799 }
 0xefd   :  { %v3810_v15 = vsub.f32 %v3753_v11, %v3800_v24 }
 0xeff   :  { %v8035_v37 = vpop.eup %6091  ;;  %v3824_v26 = vmul.f32 1.442695, %v3810_v15 }
 0xf00   :  { %v3837_v20 = vsel %vm177_vm1, %v8035_v37, 0.0 }
 0xf01   :  { %6093 = vpow2.f32 %v3824_v26  ;;  %3838 = vadd.xlane.f32.xlu0 %v3837_v20 }
 0xf04   :  { %v3803_v16 = vpop.xlane.xlu1 %3802 }
 0xf05   :  { %v3811_v41 = vsub.f32 %v3776_v13, %v3803_v16  ;;  %v4093_v13 = vpop.permute.xlu2 %4092 }
 0xf07   :  { %v8039_v23 = vpop.eup %6093  ;;  %v3826_v45 = vmul.f32 1.442695, %v3811_v41 }
 0xf08   :  { %v3846_v29 = vsel %vm177_vm1, %v8039_v23, 0.0 }
 0xf09   :  { %6095 = vpow2.f32 %v3826_v45  ;;  %3847 = vadd.xlane.f32.xlu0 %v3846_v29  ;;  %v4098_v45 = vsel %vm177_vm1, %v4093_v13, 0 }
 0xf0f   :  { %v8043_v47 = vpop.eup %6095 }
 0xf10   :  { %v3849_v11 = vsel %vm177_vm1, %v8043_v47, 0.0 }
 0xf11   :  { %4113 = vrot.lane.b32.xlu1 %v7528_v50, %s6294_s13  ;;  %3850 = vadd.xlane.f32.xlu2 %v3849_v11 }
 0xf19   :  { %4184 = vrot.lane.b32.xlu1 %v7570_v0, %s6293_s12 }
 0xf1c   :  { %v4045_v4 = vpop.permute.xlu1 %4044 }
 0xf1d   :  { %4067 = vrot.lane.b32.xlu0 %v7510_v19, %s6294_s13  ;;  %v4325_v19 = vunpack.c.l.b16 %v7910_v49 }
 0xf1f   :  { %v4326_v50 = vpack.c.b16 %v4325_v19, %v4325_v19 }
 0xf21   :  { %4159 = vrot.lane.b32.xlu1 %v7579_v7, %s6294_s13 }
 0xf25   :  { %4138 = vrot.lane.b32.xlu0 %v7536_v34, %s6293_s12 }
 0xf29   :  { %4090 = vrot.lane.b32.xlu2 %v7521_v42, %s6294_s13  ;;  %v4116_v42 = vpop.permute.xlu0 %4115 }
 0xf2a   :  { %v4121_v19 = vsel %vm177_vm1, %v4116_v42, 0 }
 0xf2d   :  { %4207 = vrot.lane.b32.xlu0 %v7581_v52, %s6293_s12 }
 0xf31   :  { %4161 = vrot.lane.b32.xlu2 %v7579_v7, %s6293_s12 }
 0xf35   :  { %4182 = vrot.lane.b32.xlu0 %v7570_v0, %s6294_s13 }
 0xf39   :  { %4136 = vrot.lane.b32.xlu2 %v7536_v34, %s6294_s13  ;;  %v4052_v34 = vsel %vm177_vm1, %v8011_v48, 0 }
 0xf3d   :  { %4327 = vrot.lane.b32.xlu0 %v4326_v50, %s6286_s25 }
 0xf41   :  { %4205 = vrot.lane.b32.xlu2 %v7581_v52, %s6294_s13 }
 0xf4b   :  { %v3830_v55 = vpop.xlane.xlu0 %3829 }
 0xf4c   :  { %6097 = vrcp.f32 %v3830_v55 }
 0xf4f   :  { %v3833_v51 = vpop.xlane.xlu2 %3832 }
 0xf50   :  { %6099 = vrcp.f32 %v3833_v51 }
 0xf52   :  { %v6098_v7 = vpop.eup %6097 }
 0xf53   :  { %v3860_v0 = vmul.f32 %v6098_v7, %v8013_v8 }
 0xf55   :  { %v3868_v28 = vpack.c.bf16 %v3860_v0, %v3860_v0 }
 0xf56   :  { %v6100_v49 = vpop.eup %6099 }
 0xf57   :  { %v3861_v5 = vmul.f32 %v6100_v49, %v8017_v10  ;;  %5706 = vmatmul.msk.bf16.vlgmr.msra.gmra.mxu0 %vm177_vm1, %v3868_v28 }
 0xf58   :  { %4061 = vmatpush.bf16.xpose.msra.mxu0 %v4052_v34 }
 0xf59   :  { %v3869_v52 = vpack.c.bf16 %v3861_v5, %v3861_v5 }
 0xf5b   :  { %5707 = vmatmul.msk.bf16.vlgmr.msra.gmra.mxu1 %vm177_vm1, %v3869_v52 }
 0xf5c   :  { %4084 = vmatpush.bf16.xpose.msra.mxu1 %v4075_v39 }
 0xf63   :  { %v3845_v18 = vpop.xlane.xlu1 %3844 }
 0xf64   :  { %v3842_v8 = vpop.xlane.xlu2 %3841  ;;  %6101 = vrcp.f32 %v3845_v18 }
 0xf65   :  { %6103 = vrcp.f32 %v3842_v8 }
 0xf6a   :  { %v6102_v46 = vpop.eup %6101 }
 0xf6b   :  { %v6104_v1 = vpop.eup %6103  ;;  %v3865_v48 = vmul.f32 %v6102_v46, %v8023_v30  ;;  %v3836_v10 = vpop.xlane.xlu1 %3835 }
 0xf6c   :  { %v3864_v24 = vmul.f32 %v6104_v1, %v8025_v54  ;;  %6105 = vrcp.f32 %v3836_v10 }
 0xf6d   :  { %v3873_v15 = vpack.c.bf16 %v3865_v48, %v3865_v48 }
 0xf6e   :  { %v3872_v26 = vpack.c.bf16 %v3864_v24, %v3864_v24 }
 0xf6f   :  { %5711 = vmatmul.msk.bf16.vlgmr.msrb.gmra.mxu1 %vm177_vm1, %v3873_v15 }
 0xf70   :  { %5710 = vmatmul.msk.bf16.vlgmr.msrb.gmra.mxu0 %vm177_vm1, %v3872_v26 }
 0xf72   :  { %v6106_v40 = vpop.eup %6105 }
 0xf73   :  { %v3862_v20 = vmul.f32 %v6106_v40, %v8031_v59 }
 0xf74   :  { %v3839_v16 = vpop.xlane.xlu0 %3838 }
 0xf75   :  { %v3870_v41 = vpack.c.bf16 %v3862_v20, %v3862_v20  ;;  %6107 = vrcp.f32 %v3839_v16 }
 0xf77   :  { %5708 = vmatmul.msk.bf16.vlgmr.msra.gmra.mxu2 %vm177_vm1, %v3870_v41  ;;  %v3551_v41 = vadd.f32 %v7987_v60, %v7958_v9  ;;  %v3509_v9 = vadd.f32 %v7993_v63, %v7976_v31 }
 0xf78   :  { %4107 = vmatpush.bf16.xpose.msra.mxu2 %v4098_v45 }
 0xf7b   :  { %v6108_v30 = vpop.eup %6107 }
 0xf7c   :  { %v3863_v54 = vmul.f32 %v6108_v30, %v8035_v37  ;;  %v3848_v29 = vpop.xlane.xlu0 %3847 }
 0xf7d   :  { %6109 = vrcp.f32 %v3848_v29 }
 0xf7e   :  { %v3871_v11 = vpack.c.bf16 %v3863_v54, %v3863_v54 }
 0xf80   :  { %5714 = vmatmul.msk.bf16.vlgmr.msra.gmra.mxu0 %vm177_vm1, %v4045_v4  ;;  %5709 = vmatmul.msk.bf16.vlgmr.msra.gmra.mxu3 %vm177_vm1, %v3871_v11 }
 0xf81   :  { %4130 = vmatpush.bf16.xpose.msra.mxu3 %v4121_v19 }
 0xf83   :  { %v6110_v59 = vpop.eup %6109  ;;  %v4114_v50 = vpop.permute.xlu1 %4113 }
 0xf84   :  { %v3866_v13 = vmul.f32 %v6110_v59, %v8039_v23  ;;  %v3851_v55 = vpop.xlane.xlu2 %3850 }
 0xf85   :  { %6111 = vrcp.f32 %v3851_v55 }
 0xf86   :  { %v3874_v51 = vpack.c.bf16 %v3866_v13, %v3866_v13 }
 0xf88   :  { %5712 = vmatmul.msk.bf16.vlgmr.msrb.gmra.mxu2 %vm177_vm1, %v3874_v51 }
 0xf8b   :  { %v6112_v37 = vpop.eup %6111  ;;  %v4185_v7 = vpop.permute.xlu1 %4184 }
 0xf8c   :  { %v3867_v0 = vmul.f32 %v6112_v37, %v8043_v47  ;;  %v4190_v42 = vsel %vm177_vm1, %v4185_v7, 0  ;;  %v4091_v28 = vpop.permute.xlu2 %4090 }
 0xf8d   :  { %4199 = vmatpush.bf16.xpose.msrb.mxu2 %v4190_v42  ;;  %v4373_v42 = vunpack.c.l.b16 %v7936_v57 }
 0xf8e   :  { %v3875_v49 = vpack.c.bf16 %v3867_v0, %v3867_v0 }
 0xf8f   :  { %v4068_v34 = vpop.permute.xlu0 %4067 }
 0xf90   :  { %5713 = vmatmul.msk.bf16.vlgmr.msrb.gmra.mxu3 %vm177_vm1, %v3875_v49  ;;  %5715 = vmatmul.msk.bf16.vlgmr.msra.gmra.mxu1 %vm177_vm1, %v4068_v34  ;;  %v4374_v34 = vpack.c.b16 %v4373_v42, %v4373_v42 }
 0xf93   :  { %v4160_v18 = vpop.permute.xlu1 %4159 }
 0xf94   :  { %v4162_v23 = vpop.permute.xlu2 %4161 }
 0xf95   :  { %v4167_v5 = vsel %vm177_vm1, %v4162_v23, 0 }
 0xf96   :  { %4176 = vmatpush.bf16.xpose.msrb.mxu1 %v4167_v5 }
 0xf97   :  { %v4139_v52 = vpop.permute.xlu0 %4138 }
 0xf98   :  { %v4144_v39 = vsel %vm177_vm1, %v4139_v52, 0  ;;  %5716 = vmatmul.msk.bf16.vlgmr.msra.gmra.mxu2 %vm177_vm1, %v4091_v28 }
 0xf99   :  { %4153 = vmatpush.bf16.xpose.msrb.mxu0 %v4144_v39 }
 0xf9c   :  { %v4137_v47 = vpop.permute.xlu2 %4136 }
 0xf9f   :  { %v4208_v4 = vpop.permute.xlu0 %4207 }
 0xfa0   :  { %v4213_v8 = vsel %vm177_vm1, %v4208_v4, 0  ;;  %5717 = vmatmul.msk.bf16.vlgmr.msra.gmra.mxu3 %vm177_vm1, %v4114_v50  ;;  %5718 = vmatmul.msk.bf16.vlgmr.msrb.gmra.mxu0 %vm177_vm1, %v4137_v47 }
 0xfa1   :  { %5719 = vmatmul.msk.bf16.vlgmr.msrb.gmra.mxu1 %vm177_vm1, %v4160_v18  ;;  %4222 = vmatpush.bf16.xpose.msrb.mxu3 %v4213_v8 }
 0xfa4   :  { %v4206_v1 = vpop.permute.xlu2 %4205 }
 0xfa7   :  { %v4183_v46 = vpop.permute.xlu0 %4182 }
 0xfa8   :  { %5720 = vmatmul.msk.bf16.vlgmr.msrb.gmra.mxu2 %vm177_vm1, %v4183_v46 }
 0xfaf   :  { %v4328_v48 = vpop.permute.xlu0 %4327 }
 0xfb0   :  { %v4333_v10 = vsel %vm746_vm2, %v4328_v48, 0  ;;  %5721 = vmatmul.msk.bf16.vlgmr.msrb.gmra.mxu3 %vm177_vm1, %v4206_v1 }
 0xfb1   :  { %4342 = vmatpush.bf16.msra.mxu0 %v4333_v10 }
 0xfd4   :  { %v3899_v24 = vpop.f32.mrf.mxu0 }
 0xfd5   :  { %v8107_v15 = vadd.f32 %v3899_v24, %v7980_v27  ;;  %v3488_v27 = vadd.f32 %v7989_v36, %v7972_v14 }
 0xfd8   :  { %v3918_v26 = vpop.f32.mrf.mxu1 }
 0xfd9   :  { %v8110_v40 = vadd.f32 %v3918_v26, %v7978_v32  ;;  %v4349_v26 = vunpack.c.l.b16 %v7925_v43 }
 0xfdc   :  { %v3901_v20 = vpop.f32.mrf.mxu0 }
 0xfe0   :  { %v3920_v16 = vpop.f32.mrf.mxu1 }
 0xfe1   :  { %v4350_v16 = vpack.c.b16 %v4349_v26, %v4349_v26  ;;  %v4469_v26 = vunpack.c.l.b16 %v7965_v12 }
 0xfec   :  { %v3994_v45 = vpop.f32.mrf.mxu1 }
 0xfed   :  { %v3975_v30 = vpop.f32.mrf.mxu0  ;;  %v8114_v54 = vadd.f32 %v3994_v45, %v3551_v41  ;;  %v4397_v45 = vunpack.c.l.b16 %v7956_v61 }
 0xfee   :  { %v8117_v29 = vadd.f32 %v3975_v30, %v7985_v2 }
 0xfef   :  { %v4398_v30 = vpack.c.b16 %v4397_v45, %v4397_v45 }
 0xff4   :  { %v3996_v11 = vpop.f32.mrf.mxu1 }
 0xff5   :  { %v3977_v19 = vpop.f32.mrf.mxu0 }
 0xff6   :  { %v4421_v19 = vunpack.c.l.b16 %v7940_v58 }
 0xff8   :  { %v4422_v43 = vpack.c.b16 %v4421_v19, %v4421_v19 }
 0xffa   :  { %v3937_v59 = vpop.f32.mrf.mxu2 }
 0xffb   :  { %v8121_v32 = vadd.f32 %v3937_v59, %v3488_v27 }
 0xffd   :  { %v4063_v50 = vpop.f32.mrf.mxu0 }
 0xffe   :  { %v4228_v13 = vsel %vm177_vm1, %v4063_v50, -inf }
 0xfff   :  { %4229 = vmax.xlane.f32.xlu1 %v4228_v13 }
0x1002   :  { %v3939_v60 = vpop.f32.mrf.mxu2 }
0x1003   :  { %v3956_v55 = vpop.f32.mrf.mxu3 }
0x1004   :  { %v8126_v51 = vadd.f32 %v3956_v55, %v3509_v9 }
0x1005   :  { %v4065_v2 = vpop.f32.mrf.mxu0 }
0x100b   :  { %v3958_v37 = vpop.f32.mrf.mxu3  ;;  %v4013_v7 = vpop.f32.mrf.mxu2 }
0x100c   :  { %v8129_v0 = vadd.f32 %v4013_v7, %v7995_v38 }
0x100d   :  { %v4086_v14 = vpop.f32.mrf.mxu1 }
0x100e   :  { %v4231_v36 = vsel %vm177_vm1, %v4086_v14, -inf }
0x100f   :  { %4232 = vmax.xlane.f32.xlu0 %v4231_v36 }
0x1013   :  { %v4015_v28 = vpop.f32.mrf.mxu2  ;;  %v4032_v49 = vpop.f32.mrf.mxu3 }
0x1014   :  { %v8134_v31 = vadd.f32 %v4032_v49, %v7999_v35 }
0x1015   :  { %v4088_v63 = vpop.f32.mrf.mxu1 }
0x1018   :  { %4375 = vrot.lane.b32.xlu1 %v4374_v34, %s6286_s25 }
0x101b   :  { %v4034_v23 = vpop.f32.mrf.mxu3  ;;  %v4109_v5 = vpop.f32.mrf.mxu2 }
0x101c   :  { %v4234_v8 = vsel %vm177_vm1, %v4109_v5, -inf }
0x101d   :  { %v4155_v52 = vpop.f32.mrf.mxu0 }
0x101e   :  { %v4178_v38 = vpop.f32.mrf.mxu1  ;;  %v4240_v39 = vsel %vm177_vm1, %v4155_v52, -inf }
0x101f   :  { %4241 = vmax.xlane.f32.xlu0 %v4240_v39  ;;  %v4243_v47 = vsel %vm177_vm1, %v4178_v38, -inf }
0x1020   :  { %4244 = vmax.xlane.f32.xlu2 %v4243_v47 }
0x1023   :  { %v4111_v57 = vpop.f32.mrf.mxu2  ;;  %v8139_v4 = vpop.f32.mrf.mxu3 }
0x1024   :  { %v4237_v41 = vsel %vm177_vm1, %v8139_v4, -inf }
0x1025   :  { %v4157_v18 = vpop.f32.mrf.mxu0 }
0x1026   :  { %v4180_v35 = vpop.f32.mrf.mxu1 }
0x1028   :  { %4235 = vmax.xlane.f32.xlu2 %v4234_v8 }
0x102b   :  { %v4134_v46 = vpop.f32.mrf.mxu3  ;;  %v8142_v1 = vpop.f32.mrf.mxu2 }
0x102c   :  { %v4246_v11 = vsel %vm177_vm1, %v8142_v1, -inf }
0x1033   :  { %v4203_v48 = vpop.f32.mrf.mxu2  ;;  %v4224_v10 = vpop.f32.mrf.mxu3 }
0x1034   :  { %v4249_v24 = vsel %vm177_vm1, %v4224_v10, -inf }
0x1035   :  { %4250 = vmax.xlane.f32.xlu0 %v4249_v24 }
0x103b   :  { %v4226_v20 = vpop.f32.mrf.mxu3 }
0x103c   :  { %v4470_v20 = vpack.c.b16 %v4469_v26, %v4469_v26 }
0x1040   :  { %4351 = vrot.lane.b32.xlu2 %v4350_v16, %s6286_s25 }
0x1042   :  { %4238 = vmax.xlane.f32.xlu1 %v4237_v41 }
0x1049   :  { %4399 = vrot.lane.b32.xlu0 %v4398_v30, %s6286_s25 }
0x104a   :  { %4247 = vmax.xlane.f32.xlu1 %v4246_v11 }
0x1063   :  { %4423 = vrot.lane.b32.xlu1 %v4422_v43, %s6286_s25 }
0x1072   :  { %v4230_v27 = vpop.xlane.xlu1 %4229 }
0x1073   :  { %v4252_v59 = vsub.f32 %v4063_v50, %v4230_v27  ;;  %v4493_v27 = vunpack.c.l.b16 %v7974_v22 }
0x1075   :  { %v4260_v13 = vmul.f32 1.442695, %v4252_v59  ;;  %v4494_v59 = vpack.c.b16 %v4493_v27, %v4493_v27 }
0x1077   :  { %6113 = vpow2.f32 %v4260_v13 }
0x107d   :  { %v8155_v9 = vpop.eup %6113 }
0x107e   :  { %v4276_v61 = vsel %vm177_vm1, %v8155_v9, 0.0 }
0x107f   :  { %4277 = vadd.xlane.f32.xlu2 %v4276_v61  ;;  %v4445_v61 = vunpack.c.l.b16 %v7942_v3 }
0x1082   :  { %v4233_v60 = vpop.xlane.xlu0 %4232 }
0x1083   :  { %v4253_v55 = vsub.f32 %v4086_v14, %v4233_v60 }
0x1085   :  { %v4262_v2 = vmul.f32 1.442695, %v4253_v55  ;;  %v4446_v55 = vpack.c.b16 %v4445_v61, %v4445_v61 }
0x1087   :  { %6115 = vpow2.f32 %v4262_v2 }
0x108a   :  { %v4376_v37 = vpop.permute.xlu1 %4375 }
0x108b   :  { %v4381_v58 = vsel %vm746_vm2, %v4376_v37, 0 }
0x108c   :  { %4390 = vmatpush.bf16.msra.mxu2 %v4381_v58 }
0x108d   :  { %v8160_v7 = vpop.eup %6115 }
0x108e   :  { %v4279_v50 = vsel %vm177_vm1, %v8160_v7, 0.0 }
0x108f   :  { %4280 = vadd.xlane.f32.xlu1 %v4279_v50 }
0x1092   :  { %v4242_v36 = vpop.xlane.xlu0 %4241 }
0x1093   :  { %v4256_v42 = vsub.f32 %v4155_v52, %v4242_v36  ;;  %v4245_v28 = vpop.xlane.xlu2 %4244 }
0x1094   :  { %v4257_v49 = vsub.f32 %v4178_v38, %v4245_v28 }
0x1095   :  { %v4268_v63 = vmul.f32 1.442695, %v4256_v42 }
0x1096   :  { %v4270_v34 = vmul.f32 1.442695, %v4257_v49 }
0x1097   :  { %6117 = vpow2.f32 %v4268_v63 }
0x1098   :  { %6119 = vpow2.f32 %v4270_v34 }
0x109b   :  { %v4236_v14 = vpop.xlane.xlu2 %4235 }
0x109c   :  { %v4254_v23 = vsub.f32 %v4109_v5, %v4236_v14 }
0x109d   :  { %v8164_v39 = vpop.eup %6117 }
0x109e   :  { %v8166_v47 = vpop.eup %6119  ;;  %v4264_v57 = vmul.f32 1.442695, %v4254_v23  ;;  %v4288_v18 = vsel %vm177_vm1, %v8164_v39, 0.0 }
0x109f   :  { %v4291_v35 = vsel %vm177_vm1, %v8166_v47, 0.0  ;;  %4289 = vadd.xlane.f32.xlu2 %v4288_v18 }
0x10a0   :  { %6121 = vpow2.f32 %v4264_v57  ;;  %4292 = vadd.xlane.f32.xlu0 %v4291_v35 }
0x10a3   :  { %v4352_v52 = vpop.permute.xlu2 %4351 }
0x10a4   :  { %v4357_v38 = vsel %vm746_vm2, %v4352_v52, 0 }
0x10a5   :  { %4366 = vmatpush.bf16.msra.mxu1 %v4357_v38 }
0x10a6   :  { %v6122_v8 = vpop.eup %6121 }
0x10a7   :  { %v4282_v5 = vsel %vm177_vm1, %v6122_v8, 0.0 }
0x10a8   :  { %4283 = vadd.xlane.f32.xlu1 %v4282_v5  ;;  %v4251_v46 = vpop.xlane.xlu0 %4250 }
0x10a9   :  { %v4259_v48 = vsub.f32 %v4224_v10, %v4251_v46 }
0x10ab   :  { %v4274_v24 = vmul.f32 1.442695, %v4259_v48 }
0x10ad   :  { %6123 = vpow2.f32 %v4274_v24 }
0x10b3   :  { %v8175_v16 = vpop.eup %6123 }
0x10b4   :  { %4471 = vrot.lane.b32.xlu0 %v4470_v20, %s6286_s25  ;;  %v4297_v41 = vsel %vm177_vm1, %v8175_v16, 0.0 }
0x10b5   :  { %v4239_v45 = vpop.xlane.xlu1 %4238  ;;  %4298 = vadd.xlane.f32.xlu2 %v4297_v41 }
0x10b6   :  { %v4255_v30 = vsub.f32 %v8139_v4, %v4239_v45 }
0x10b8   :  { %v4266_v11 = vmul.f32 1.442695, %v4255_v30 }
0x10ba   :  { %6125 = vpow2.f32 %v4266_v11 }
0x10bb   :  { %v4400_v19 = vpop.permute.xlu0 %4399 }
0x10bc   :  { %v4405_v10 = vsel %vm746_vm2, %v4400_v19, 0 }
0x10bd   :  { %4414 = vmatpush.bf16.msra.mxu3 %v4405_v10  ;;  %v4248_v13 = vpop.xlane.xlu1 %4247 }
0x10be   :  { %v4258_v37 = vsub.f32 %v8142_v1, %v4248_v13  ;;  %v8205_v13 = vld [vmem:[#allocation5 + $0x11] ss:$0 sm:$0xff] }
0x10c0   :  { %v6126_v43 = vpop.eup %6125  ;;  %v4272_v58 = vmul.f32 1.442695, %v4258_v37 }
0x10c1   :  { %v4285_v12 = vsel %vm177_vm1, %v6126_v43, 0.0 }
0x10c2   :  { %4286 = vadd.xlane.f32.xlu1 %v4285_v12 }
0x10cd   :  { %4495 = vrot.lane.b32.xlu2 %v4494_v59, %s6286_s25 }
0x10d5   :  { %v4424_v60 = vpop.permute.xlu1 %4423 }
0x10d6   :  { %v4429_v4 = vsel %vm746_vm2, %v4424_v60, 0 }
0x10d7   :  { %4438 = vmatpush.bf16.msrb.mxu0 %v4429_v4 }
0x10db   :  { %4447 = vrot.lane.b32.xlu1 %v4446_v55, %s6286_s25 }
0x10f2   :  { %v4278_v2 = vpop.xlane.xlu2 %4277 }
0x10f3   :  { %6127 = vrcp.f32 %v4278_v2 }
0x10f4   :  { %6129 = vpow2.f32 %v4272_v58 }
0x10f9   :  { %v6128_v50 = vpop.eup %6127 }
0x10fa   :  { %v4308_v22 = vmul.f32 %v6128_v50, %v8155_v9  ;;  %v6130_v3 = vpop.eup %6129 }
0x10fb   :  { %v4294_v28 = vsel %vm177_vm1, %v6130_v3, 0.0 }
0x10fc   :  { %v4316_v36 = vpack.c.bf16 %v4308_v22, %v4308_v22 }
0x10fe   :  { %5722 = vmatmul.msk.bf16.vlgmr.msra.gmra.mxu0 %vm177_vm1, %v4316_v36 }
0x1102   :  { %v4281_v42 = vpop.xlane.xlu1 %4280 }
0x1103   :  { %6131 = vrcp.f32 %v4281_v42 }
0x1105   :  { %4295 = vadd.xlane.f32.xlu1 %v4294_v28 }
0x1109   :  { %v6132_v49 = vpop.eup %6131 }
0x110a   :  { %v4309_v63 = vmul.f32 %v6132_v49, %v8160_v7 }
0x110c   :  { %v4317_v34 = vpack.c.bf16 %v4309_v63, %v4309_v63 }
0x110e   :  { %5723 = vmatmul.msk.bf16.vlgmr.msra.gmra.mxu1 %vm177_vm1, %v4317_v34 }
0x1112   :  { %v4290_v1 = vpop.xlane.xlu2 %4289 }
0x1113   :  { %6133 = vrcp.f32 %v4290_v1  ;;  %v4293_v18 = vpop.xlane.xlu0 %4292 }
0x1119   :  { %v6134_v14 = vpop.eup %6133 }
0x111a   :  { %v4312_v9 = vmul.f32 %v6134_v14, %v8164_v39 }
0x111b   :  { %v4284_v23 = vpop.xlane.xlu1 %4283 }
0x111c   :  { %v4320_v57 = vpack.c.bf16 %v4312_v9, %v4312_v9  ;;  %6135 = vrcp.f32 %v4284_v23 }
0x111e   :  { %5726 = vmatmul.msk.bf16.vlgmr.msrb.gmra.mxu0 %vm177_vm1, %v4320_v57 }
0x1122   :  { %v6136_v35 = vpop.eup %6135 }
0x1123   :  { %v4310_v52 = vmul.f32 %v6136_v35, %v6122_v8 }
0x1125   :  { %v4318_v38 = vpack.c.bf16 %v4310_v52, %v4310_v52 }
0x1126   :  { %v4472_v5 = vpop.permute.xlu0 %4471 }
0x1127   :  { %v4477_v7 = vsel %vm746_vm2, %v4472_v5, 0  ;;  %5724 = vmatmul.msk.bf16.vlgmr.msra.gmra.mxu2 %vm177_vm1, %v4318_v38 }
0x1128   :  { %4486 = vmatpush.bf16.msrb.mxu2 %v4477_v7  ;;  %v4299_v46 = vpop.xlane.xlu2 %4298 }
0x1130   :  { %v4496_v48 = vpop.permute.xlu2 %4495 }
0x1131   :  { %v4501_v24 = vsel %vm746_vm2, %v4496_v48, 0 }
0x1132   :  { %4510 = vmatpush.bf16.msrb.mxu3 %v4501_v24 }
0x1135   :  { %v4287_v39 = vpop.xlane.xlu1 %4286 }
0x1136   :  { %6137 = vrcp.f32 %v4287_v39 }
0x1137   :  { %6139 = vrcp.f32 %v4299_v46 }
0x1138   :  { %6141 = vrcp.f32 %v4293_v18 }
0x113c   :  { %v6138_v26 = vpop.eup %6137 }
0x113d   :  { %v4311_v20 = vmul.f32 %v6138_v26, %v6126_v43  ;;  %v6140_v8 = vpop.eup %6139 }
0x113e   :  { %v6142_v45 = vpop.eup %6141  ;;  %v4315_v30 = vmul.f32 %v6140_v8, %v8175_v16 }
0x113f   :  { %v4319_v41 = vpack.c.bf16 %v4311_v20, %v4311_v20  ;;  %v4313_v11 = vmul.f32 %v6142_v45, %v8166_v47 }
0x1140   :  { %v4323_v12 = vpack.c.bf16 %v4315_v30, %v4315_v30 }
0x1141   :  { %5725 = vmatmul.msk.bf16.vlgmr.msra.gmra.mxu3 %vm177_vm1, %v4319_v41  ;;  %v4321_v27 = vpack.c.bf16 %v4313_v11, %v4313_v11 }
0x114d   :  { %v4448_v19 = vpop.permute.xlu1 %4447 }
0x114e   :  { %v4453_v10 = vsel %vm746_vm2, %v4448_v19, 0 }
0x114f   :  { %4462 = vmatpush.bf16.msrb.mxu1 %v4453_v10 }
0x1151   :  { %5729 = vmatmul.msk.bf16.vlgmr.msrb.gmra.mxu3 %vm177_vm1, %v4323_v12 }
0x1152   :  { %5727 = vmatmul.msk.bf16.vlgmr.msrb.gmra.mxu1 %vm177_vm1, %v4321_v27 }
0x1178   :  { %v4296_v43 = vpop.xlane.xlu1 %4295 }
0x1179   :  { %6143 = vrcp.f32 %v4296_v43 }
0x117b   :  { %v4344_v59 = vpop.f32.mrf.mxu0 }
0x117c   :  { %v4516_v61 = vadd.f32 %v4344_v59, %v8107_v15 }
0x117e   :  { %v4525_v16 = vadd.f32 %v8205_v13, %v4516_v61 }
0x117f   :  { %v6144_v47 = vpop.eup %6143 }
0x1180   :  { %v4314_v60 = vmul.f32 %v6144_v47, %v6130_v3  ;;  %v4533_v4 = vadd.f32 %v4525_v16, %v7438_v6 }
0x1182   :  { %v4322_v55 = vpack.c.bf16 %v4314_v60, %v4314_v60  ;;  %v4543_v2 = vsel %vm93_vm0, %v4533_v4, 0.0 }
0x1183   :  { %4544 = vadd.xlane.f32.xlu0 %v4543_v2  ;;  %v4346_v37 = vpop.f32.mrf.mxu0 }
0x1184   :  { %5728 = vmatmul.msk.bf16.vlgmr.msrb.gmra.mxu2 %vm177_vm1, %v4322_v55  ;;  %v5732_v37 = vld [vmem:[%s8687_s1 + $0xc] sm:$0xf] }
0x118b   :  { %v4368_v58 = vpop.f32.mrf.mxu1 }
0x118c   :  { %v4517_v50 = vadd.f32 %v4368_v58, %v8110_v40  ;;  %v5818_v58 = vld [vmem:[%s8687_s1 + $0x1c] sm:$0xf0] }
0x118e   :  { %v4526_v22 = vadd.f32 %v8205_v13, %v4517_v50 }
0x1190   :  { %v4534_v15 = vadd.f32 %v4526_v22, %v7441_v44 }
0x1192   :  { %v4546_v36 = vsel %vm93_vm0, %v4534_v15, 0.0 }
0x1193   :  { %4547 = vadd.xlane.f32.xlu2 %v4546_v36  ;;  %v4370_v3 = vpop.f32.mrf.mxu1  ;;  %v5733_v36 = vor.u32 %v5818_v58, %v5732_v37  ;;  %v8313_v37 = vld [vmem:[#allocation5 + $0x12] ss:$0 sm:$0xff] }
0x119b   :  { %v4440_v42 = vpop.f32.mrf.mxu0 }
0x119c   :  { %v4520_v6 = vadd.f32 %v4440_v42, %v8117_v29 }
0x119e   :  { %v4529_v28 = vadd.f32 %v8205_v13, %v4520_v6 }
0x11a0   :  { %v8219_v49 = vadd.f32 %v4529_v28, %v7467_v21 }
0x11a2   :  { %v4555_v63 = vsel %vm93_vm0, %v8219_v49, 0.0 }
0x11a3   :  { %4556 = vadd.xlane.f32.xlu1 %v4555_v63  ;;  %v4442_v40 = vpop.f32.mrf.mxu0 }
0x11aa   :  { %v4392_v34 = vpop.f32.mrf.mxu2 }
0x11ab   :  { %v4518_v44 = vadd.f32 %v4392_v34, %v8121_v32 }
0x11ad   :  { %v4527_v1 = vadd.f32 %v8205_v13, %v4518_v44 }
0x11af   :  { %v4535_v14 = vadd.f32 %v4527_v1, %v7453_v53 }
0x11b1   :  { %v4549_v9 = vsel %vm93_vm0, %v4535_v14, 0.0 }
0x11b2   :  { %4550 = vadd.xlane.f32.xlu1 %v4549_v9  ;;  %v4394_v29 = vpop.f32.mrf.mxu2 }
0x11c4   :  { %v4416_v23 = vpop.f32.mrf.mxu3 }
0x11c5   :  { %v4519_v21 = vadd.f32 %v4416_v23, %v8126_v51 }
0x11c7   :  { %v4528_v57 = vadd.f32 %v8205_v13, %v4519_v21 }
0x11c9   :  { %v4536_v18 = vadd.f32 %v4528_v57, %v7456_v33 }
0x11cb   :  { %v4552_v35 = vsel %vm93_vm0, %v4536_v18, 0.0 }
0x11cc   :  { %4553 = vadd.xlane.f32.xlu1 %v4552_v35  ;;  %v4418_v52 = vpop.f32.mrf.mxu3 }
0x11cf   :  { %v4464_v32 = vpop.f32.mrf.mxu1 }
0x11d0   :  { %v4521_v38 = vadd.f32 %v4464_v32, %v8114_v54 }
0x11d2   :  { %v4530_v53 = vadd.f32 %v8205_v13, %v4521_v38 }
0x11d4   :  { %v4512_v5 = vpop.f32.mrf.mxu3  ;;  %v4538_v7 = vadd.f32 %v4530_v53, %v7470_v56 }
0x11d5   :  { %v4523_v46 = vadd.f32 %v4512_v5, %v8134_v31 }
0x11d6   :  { %v4558_v51 = vsel %vm93_vm0, %v4538_v7, 0.0 }
0x11d7   :  { %v4532_v48 = vadd.f32 %v8205_v13, %v4523_v46  ;;  %4559 = vadd.xlane.f32.xlu1 %v4558_v51  ;;  %v4466_v33 = vpop.f32.mrf.mxu1 }
0x11d9   :  { %v4540_v24 = vadd.f32 %v4532_v48, %v7486_v62 }
0x11db   :  { %v4564_v39 = vsel %vm93_vm0, %v4540_v24, 0.0 }
0x11dc   :  { %4565 = vadd.xlane.f32.xlu0 %v4564_v39  ;;  %v4514_v26 = vpop.f32.mrf.mxu3 }
0x11f6   :  { %v4545_v54 = vpop.xlane.xlu0 %4544 }
0x11f7   :  { %v4567_v20 = vmul.f32 %v4545_v54, %v7193_v25 }
0x11f9   :  { %v8240_v41 = vsub.f32 %v4533_v4, %v4567_v20 }
0x11fb   :  { %v4583_v56 = vmul.f32 %v8240_v41, %v8240_v41 }
0x11fd   :  { %v4591_v31 = vsel %vm93_vm0, %v4583_v56, 0.0 }
0x11fe   :  { %4592 = vadd.xlane.f32.xlu0 %v4591_v31  ;;  %v5756_v31 = vld [vmem:[#allocation2 + $0x30] sm:$0xf] }
0x1206   :  { %v4548_v8 = vpop.xlane.xlu2 %4547 }
0x1207   :  { %v4568_v45 = vmul.f32 %v4548_v8, %v7193_v25  ;;  %v4488_v30 = vpop.f32.mrf.mxu2  ;;  %v5823_v8 = vld [vmem:[#allocation2 + $0x34] sm:$0xf0] }
0x1208   :  { %v4522_v62 = vadd.f32 %v4488_v30, %v8129_v0  ;;  %v5736_v0 = vld [vmem:[%s8687_s1 + $0x34] sm:$0xf]  ;;  %v5757_v30 = vor.u32 %v5823_v8, %v5756_v31 }
0x1209   :  { %v8247_v11 = vsub.f32 %v4534_v15, %v4568_v45 }
0x120a   :  { %v4531_v19 = vadd.f32 %v8205_v13, %v4522_v62  ;;  %v5819_v13 = vld [vmem:[%s8687_s1 + $0x44] sm:$0xf0] }
0x120b   :  { %v4584_v10 = vmul.f32 %v8247_v11, %v8247_v11  ;;  %v5737_v16 = vor.u32 %v5819_v13, %v5736_v0 }
0x120c   :  { %v4539_v12 = vadd.f32 %v4531_v19, %v7483_v17 }
0x120d   :  { %v4594_v27 = vsel %vm93_vm0, %v4584_v10, 0.0 }
0x120e   :  { %4595 = vadd.xlane.f32.xlu1 %v4594_v27  ;;  %v4561_v43 = vsel %vm93_vm0, %v4539_v12, 0.0 }
0x120f   :  { %4562 = vadd.xlane.f32.xlu2 %v4561_v43  ;;  %v4490_v59 = vpop.f32.mrf.mxu2  ;;  %v5748_v43 = vld [vmem:[#allocation2 + $0x10] sm:$0xf] }
0x1210   :  { %v5821_v59 = vld [vmem:[#allocation2 + $0x14] sm:$0xf0] }
0x1211   :  { %v5749_v13 = vor.u32 %v5821_v59, %v5748_v43 }
0x1212   :  { %4756 = vrot.lane.b32.xlu0 %v5737_v16, %s6290_s9 }
0x1216   :  { %v4557_v61 = vpop.xlane.xlu1 %4556 }
0x1217   :  { %v4571_v22 = vmul.f32 %v4557_v61, %v7193_v25 }
0x1219   :  { %v8281_v42 = vsub.f32 %v8219_v49, %v4571_v22 }
0x121b   :  { %v4587_v63 = vmul.f32 %v8281_v42, %v8281_v42 }
0x121d   :  { %v4603_v44 = vsel %vm93_vm0, %v4587_v63, 0.0 }
0x1225   :  { %v4551_v17 = vpop.xlane.xlu1 %4550 }
0x1226   :  { %v4569_v47 = vmul.f32 %v4551_v17, %v7193_v25 }
0x1228   :  { %v8263_v60 = vsub.f32 %v4535_v14, %v4569_v47 }
0x122a   :  { %v4585_v4 = vmul.f32 %v8263_v60, %v8263_v60 }
0x122c   :  { %v4597_v55 = vsel %vm93_vm0, %v4585_v4, 0.0 }
0x122d   :  { %4598 = vadd.xlane.f32.xlu1 %v4597_v55  ;;  %v5744_v55 = vld [vmem:[#allocation2] sm:$0xf] }
0x123f   :  { %v4554_v2 = vpop.xlane.xlu1 %4553 }
0x1240   :  { %v4570_v50 = vmul.f32 %v4554_v2, %v7193_v25  ;;  %v5820_v2 = vld [vmem:[#allocation2 + $0x4] sm:$0xf0] }
0x1241   :  { %v5745_v58 = vor.u32 %v5820_v2, %v5744_v55 }
0x1242   :  { %v8276_v15 = vsub.f32 %v4536_v18, %v4570_v50 }
0x1244   :  { %v4586_v3 = vmul.f32 %v8276_v15, %v8276_v15 }
0x1246   :  { %4754 = vrot.lane.b32.xlu1 %v5733_v36, %s6290_s9  ;;  %v4600_v6 = vsel %vm93_vm0, %v4586_v3, 0.0  ;;  %v8318_v3 = vld [vmem:[#allocation5 + $0x13] ss:$0 sm:$0xff] }
0x1247   :  { %4601 = vadd.xlane.f32.xlu2 %v4600_v6 }
0x124a   :  { %v4560_v28 = vpop.xlane.xlu1 %4559 }
0x124b   :  { %v4572_v40 = vmul.f32 %v4560_v28, %v7193_v25 }
0x124d   :  { %v8288_v34 = vsub.f32 %v4538_v7, %v4572_v40 }
0x124e   :  { %4848 = vrot.lane.b32.xlu1 %v5757_v30, %s6286_s25 }
0x124f   :  { %v4566_v1 = vpop.xlane.xlu0 %4565  ;;  %4604 = vadd.xlane.f32.xlu2 %v4603_v44  ;;  %v4588_v14 = vmul.f32 %v8288_v34, %v8288_v34 }
0x1250   :  { %v4574_v49 = vmul.f32 %v4566_v1, %v7193_v25 }
0x1251   :  { %v4606_v29 = vsel %vm93_vm0, %v4588_v14, 0.0 }
0x1252   :  { %v8294_v9 = vsub.f32 %v4540_v24, %v4574_v49 }
0x1254   :  { %v4590_v23 = vmul.f32 %v8294_v9, %v8294_v9 }
0x1256   :  { %v4612_v21 = vsel %vm93_vm0, %v4590_v23, 0.0  ;;  %4844 = vrot.lane.b32.xlu1 %v5749_v13, %s6286_s25  ;;  %v5822_v23 = vld [vmem:[#allocation2 + $0x24] sm:$0xf0] }
0x1257   :  { %4607 = vadd.xlane.f32.xlu2 %v4606_v29  ;;  %v5752_v29 = vld [vmem:[#allocation2 + $0x20] sm:$0xf] }
0x125e   :  { %4842 = vrot.lane.b32.xlu1 %v5745_v58, %s6286_s25 }
0x125f   :  { %4613 = vadd.xlane.f32.xlu2 %v4612_v21  ;;  %v5753_v21 = vor.u32 %v5822_v23, %v5752_v29 }
0x1271   :  { %v4593_v52 = vpop.xlane.xlu0 %4592 }
0x1272   :  { %v4615_v5 = vmul.f32 %v4593_v52, %v7193_v25 }
0x1274   :  { %v4623_v51 = vadd.f32 1e-05, %v4615_v5 }
0x1276   :  { %vm4637_vm5 = vweird.f32 %v4623_v51 }
0x1277   :  { %4846 = vrot.lane.b32.xlu2 %v5753_v21, %s6286_s25 }
0x1281   :  { %v4596_v35 = vpop.xlane.xlu1 %4595 }
0x1282   :  { %v4563_v57 = vpop.xlane.xlu2 %4562  ;;  %v4616_v38 = vmul.f32 %v4596_v35, %v7193_v25 }
0x1283   :  { %v4573_v18 = vmul.f32 %v4563_v57, %v7193_v25 }
0x1284   :  { %v4624_v46 = vadd.f32 1e-05, %v4616_v38  ;;  %v4757_v33 = vpop.permute.xlu0 %4756 }
0x1285   :  { %v8301_v32 = vsub.f32 %v4539_v12, %v4573_v18  ;;  %4778 = vmatpush.bf16.msra.mxu0 %v4757_v33 }
0x1286   :  { %6145 = vrsqrt.f32 %v4624_v46  ;;  %vm4647_vm3 = vweird.f32 %v4624_v46 }
0x1287   :  { %v4589_v53 = vmul.f32 %v8301_v32, %v8301_v32  ;;  %6147 = vrsqrt.f32 %v4623_v51 }
0x1289   :  { %v4609_v7 = vsel %vm93_vm0, %v4589_v53, 0.0 }
0x128a   :  { %4610 = vadd.xlane.f32.xlu0 %v4609_v7 }
0x128c   :  { %v6146_v48 = vpop.eup %6145 }
0x128d   :  { %v6148_v24 = vpop.eup %6147  ;;  %v4642_v39 = vmul.f32 %v6146_v48, %v4624_v46  ;;  %vm4648_vm1 = vweird.f32 %v6146_v48 }
0x128e   :  { %v4632_v26 = vmul.f32 %v6148_v24, %v4623_v51  ;;  %vm4638_vm2 = vweird.f32 %v6148_v24  ;;  %vm4649_vm4 = vmor %vm4647_vm3, %vm4648_vm1 }
0x128f   :  { %v4643_v54 = vmul.f32 %v6146_v48, %v4642_v39  ;;  %vm4639_vm6 = vmor %vm4637_vm5, %vm4638_vm2 }
0x1290   :  { %v4633_v20 = vmul.f32 %v6148_v24, %v4632_v26 }
0x1291   :  { %v4644_v56 = vmul.f32 0.5, %v4643_v54 }
0x1292   :  { %v4634_v45 = vmul.f32 0.5, %v4633_v20 }
0x1293   :  { %v4645_v19 = vsub.f32 1.5, %v4644_v56 }
0x1294   :  { %v4635_v10 = vsub.f32 1.5, %v4634_v45 }
0x1295   :  { %v4646_v27 = vmul.f32 %v6146_v48, %v4645_v19 }
0x1296   :  { %v4636_v61 = vmul.f32 %v6148_v24, %v4635_v10 }
0x1297   :  { %v4650_v16 = vsel %vm4649_vm4, %v6146_v48, %v4646_v27 }
0x1298   :  { %v4640_v17 = vsel %vm4639_vm6, %v6148_v24, %v4636_v61  ;;  %v4712_v47 = vmul.f32 %v4650_v16, %v8247_v11 }
0x1299   :  { %v4711_v4 = vmul.f32 %v4640_v17, %v8240_v41 }
0x129a   :  { %v4720_v50 = vmul.f32 %v4712_v47, %v8313_v37 }
0x129b   :  { %v4719_v36 = vmul.f32 %v4711_v4, %v8313_v37 }
0x129c   :  { %v8321_v6 = vadd.f32 %v4720_v50, %v8318_v3 }
0x129d   :  { %v8324_v41 = vadd.f32 %v4719_v36, %v8318_v3 }
0x129f   :  { %v4735_v63 = vpack.c.bf16 %v8321_v6, %v8324_v41 }
0x12a0   :  { %v4599_v62 = vpop.xlane.xlu1 %4598 }
0x12a1   :  { %v4617_v12 = vmul.f32 %v4599_v62, %v7193_v25 }
0x12a3   :  { %v4625_v0 = vadd.f32 1e-05, %v4617_v12 }
0x12a5   :  { %6149 = vrsqrt.f32 %v4625_v0  ;;  %vm4657_vm8 = vweird.f32 %v4625_v0 }
0x12ab   :  { %v6150_v22 = vpop.eup %6149 }
0x12ac   :  { %v4652_v11 = vmul.f32 %v6150_v22, %v4625_v0  ;;  %vm4658_vm7 = vweird.f32 %v6150_v22 }
0x12ad   :  { %vm4659_vm9 = vmor %vm4657_vm8, %vm4658_vm7 }
0x12ae   :  { %v4653_v40 = vmul.f32 %v6150_v22, %v4652_v11 }
0x12b0   :  { %v4654_v14 = vmul.f32 0.5, %v4653_v40 }
0x12b2   :  { %v4655_v57 = vsub.f32 1.5, %v4654_v14 }
0x12b4   :  { %v4656_v53 = vmul.f32 %v6150_v22, %v4655_v57 }
0x12b6   :  { %v4660_v46 = vsel %vm4659_vm9, %v6150_v22, %v4656_v53 }
0x12b7   :  { %v4713_v26 = vmul.f32 %v4660_v46, %v8263_v60 }
0x12b8   :  { %v4755_v28 = vpop.permute.xlu1 %4754 }
0x12b9   :  { %4779 = vmatpush.bf16.msra.mxu0 %v4755_v28  ;;  %v4721_v30 = vmul.f32 %v4713_v26, %v8313_v37 }
0x12ba   :  { %v4602_v44 = vpop.xlane.xlu2 %4601 }
0x12bb   :  { %v4618_v1 = vmul.f32 %v4602_v44, %v7193_v25  ;;  %v8338_v27 = vadd.f32 %v4721_v30, %v8318_v3 }
0x12bc   :  { %5738 = vmatmul.msk.bf16.vlgmr.msra.gmra.mxu0 %vm93_vm0, %v4735_v63 }
0x12bd   :  { %v4626_v49 = vadd.f32 1e-05, %v4618_v1 }
0x12bf   :  { %6151 = vrsqrt.f32 %v4626_v49  ;;  %vm4667_vm11 = vweird.f32 %v4626_v49 }
0x12c2   :  { %v4605_v18 = vpop.xlane.xlu2 %4604 }
0x12c3   :  { %v4619_v35 = vmul.f32 %v4605_v18, %v7193_v25 }
0x12c5   :  { %v6152_v52 = vpop.eup %6151  ;;  %v4627_v38 = vadd.f32 1e-05, %v4619_v35 }
0x12c6   :  { %v4662_v5 = vmul.f32 %v6152_v52, %v4626_v49  ;;  %vm4668_vm10 = vweird.f32 %v6152_v52 }
0x12c7   :  { %6153 = vrsqrt.f32 %v4627_v38  ;;  %vm4669_vm12 = vmor %vm4667_vm11, %vm4668_vm10  ;;  %vm4677_vm14 = vweird.f32 %v4627_v38 }
0x12c8   :  { %v4663_v7 = vmul.f32 %v6152_v52, %v4662_v5 }
0x12ca   :  { %v4664_v51 = vmul.f32 0.5, %v4663_v7  ;;  %v4608_v48 = vpop.xlane.xlu2 %4607 }
0x12cb   :  { %v4620_v33 = vmul.f32 %v4608_v48, %v7193_v25  ;;  %v4849_v48 = vpop.permute.xlu1 %4848 }
0x12cc   :  { %v4665_v24 = vsub.f32 1.5, %v4664_v51  ;;  %4870 = vmatpush.bf16.msra.mxu1 %v4849_v48 }
0x12cd   :  { %v6154_v39 = vpop.eup %6153  ;;  %v4628_v54 = vadd.f32 1e-05, %v4620_v33 }
0x12ce   :  { %v4666_v20 = vmul.f32 %v6152_v52, %v4665_v24  ;;  %v4672_v56 = vmul.f32 %v6154_v39, %v4627_v38  ;;  %vm4678_vm13 = vweird.f32 %v6154_v39 }
0x12cf   :  { %6155 = vrsqrt.f32 %v4628_v54  ;;  %vm4679_vm1 = vmor %vm4677_vm14, %vm4678_vm13  ;;  %vm4687_vm3 = vweird.f32 %v4628_v54 }
0x12d0   :  { %v4670_v31 = vsel %vm4669_vm12, %v6152_v52, %v4666_v20  ;;  %v4673_v8 = vmul.f32 %v6154_v39, %v4672_v56 }
0x12d1   :  { %v4714_v45 = vmul.f32 %v4670_v31, %v8276_v15 }
0x12d2   :  { %v4674_v62 = vmul.f32 0.5, %v4673_v8  ;;  %v4614_v50 = vpop.xlane.xlu2 %4613 }
0x12d3   :  { %v4722_v19 = vmul.f32 %v4714_v45, %v8313_v37  ;;  %v4622_v11 = vmul.f32 %v4614_v50, %v7193_v25 }
0x12d4   :  { %v4675_v10 = vsub.f32 1.5, %v4674_v62 }
0x12d5   :  { %v6156_v12 = vpop.eup %6155  ;;  %v8341_v60 = vadd.f32 %v4722_v19, %v8318_v3  ;;  %v4630_v28 = vadd.f32 1e-05, %v4622_v11 }
0x12d6   :  { %v4676_v43 = vmul.f32 %v6154_v39, %v4675_v10  ;;  %v4682_v59 = vmul.f32 %v6156_v12, %v4628_v54  ;;  %vm4688_vm2 = vweird.f32 %v6156_v12  ;;  %v4845_v54 = vpop.permute.xlu1 %4844 }
0x12d7   :  { %v4736_v61 = vpack.c.bf16 %v8341_v60, %v8338_v27  ;;  %vm4689_vm4 = vmor %vm4687_vm3, %vm4688_vm2  ;;  %6157 = vrsqrt.f32 %v4630_v28  ;;  %vm4707_vm6 = vweird.f32 %v4630_v28 }
0x12d8   :  { %v4683_v15 = vmul.f32 %v6156_v12, %v4682_v59  ;;  %v4680_v0 = vsel %vm4679_vm1, %v6154_v39, %v4676_v43 }
0x12d9   :  { %5739 = vmatmul.msk.bf16.gmra.mxu0 %vm93_vm0, %v4736_v61  ;;  %v4715_v17 = vmul.f32 %v4680_v0, %v8281_v42 }
0x12da   :  { %v4684_v13 = vmul.f32 0.5, %v4683_v15  ;;  %v4847_v26 = vpop.permute.xlu2 %4846 }
0x12db   :  { %v4723_v2 = vmul.f32 %v4715_v17, %v8313_v37  ;;  %4871 = vmatpush.bf16.msra.mxu1 %v4847_v26 }
0x12dc   :  { %v4685_v16 = vsub.f32 1.5, %v4684_v13 }
0x12dd   :  { %v8351_v22 = vadd.f32 %v4723_v2, %v8318_v3 }
0x12de   :  { %v4686_v47 = vmul.f32 %v6156_v12, %v4685_v16 }
0x12df   :  { %4872 = vmatpush.bf16.msra.mxu1 %v4845_v54 }
0x12e0   :  { %v4690_v4 = vsel %vm4689_vm4, %v6156_v12, %v4686_v47 }
0x12e1   :  { %v4716_v55 = vmul.f32 %v4690_v4, %v8288_v34  ;;  %v6158_v34 = vpop.eup %6157 }
0x12e2   :  { %v4702_v63 = vmul.f32 %v6158_v34, %v4630_v28  ;;  %vm4708_vm5 = vweird.f32 %v6158_v34 }
0x12e3   :  { %v4724_v58 = vmul.f32 %v4716_v55, %v8313_v37  ;;  %vm4709_vm7 = vmor %vm4707_vm6, %vm4708_vm5 }
0x12e4   :  { %v4703_v40 = vmul.f32 %v6158_v34, %v4702_v63 }
0x12e5   :  { %v8354_v36 = vadd.f32 %v4724_v58, %v8318_v3 }
0x12e6   :  { %v4704_v14 = vmul.f32 0.5, %v4703_v40 }
0x12e7   :  { %v4737_v42 = vpack.c.bf16 %v8354_v36, %v8351_v22 }
0x12e8   :  { %v4705_v29 = vsub.f32 1.5, %v4704_v14 }
0x12e9   :  { %5740 = vmatmul.msk.bf16.gmra.mxu0 %vm93_vm0, %v4737_v42 }
0x12ea   :  { %v4706_v21 = vmul.f32 %v6158_v34, %v4705_v29 }
0x12ec   :  { %v4710_v35 = vsel %vm4709_vm7, %v6158_v34, %v4706_v21  ;;  %v4821_v34 = vld [vmem:[#allocation5 + $0x15] ss:$0 sm:$0xff] }
0x12ed   :  { %v4718_v53 = vmul.f32 %v4710_v35, %v8294_v9 }
0x12ef   :  { %v4726_v51 = vmul.f32 %v4718_v53, %v8313_v37 }
0x12f1   :  { %v8369_v39 = vadd.f32 %v4726_v51, %v8318_v3 }
0x12fd   :  { %v4611_v44 = vpop.xlane.xlu0 %4610 }
0x12fe   :  { %v4621_v1 = vmul.f32 %v4611_v44, %v7193_v25 }
0x1300   :  { %v4629_v49 = vadd.f32 1e-05, %v4621_v1 }
0x1302   :  { %6159 = vrsqrt.f32 %v4629_v49  ;;  %vm4697_vm9 = vweird.f32 %v4629_v49 }
0x1308   :  { %v6160_v23 = vpop.eup %6159 }
0x1309   :  { %v4692_v57 = vmul.f32 %v6160_v23, %v4629_v49  ;;  %vm4698_vm8 = vweird.f32 %v6160_v23 }
0x130a   :  { %vm4699_vm10 = vmor %vm4697_vm9, %vm4698_vm8 }
0x130b   :  { %v4693_v18 = vmul.f32 %v6160_v23, %v4692_v57 }
0x130d   :  { %v4694_v52 = vmul.f32 0.5, %v4693_v18 }
0x130f   :  { %v4695_v38 = vsub.f32 1.5, %v4694_v52 }
0x1311   :  { %v4696_v5 = vmul.f32 %v6160_v23, %v4695_v38 }
0x1313   :  { %v4700_v7 = vsel %vm4699_vm10, %v6160_v23, %v4696_v5 }
0x1314   :  { %v4717_v46 = vmul.f32 %v4700_v7, %v8301_v32  ;;  %v4843_v32 = vpop.permute.xlu1 %4842 }
0x1315   :  { %4873 = vmatpush.bf16.msra.mxu1 %v4843_v32 }
0x1316   :  { %v4725_v33 = vmul.f32 %v4717_v46, %v8313_v37  ;;  %v4743_v37 = vld [vmem:[#allocation5 + $0x14] ss:$0 sm:$0xff] }
0x1318   :  { %v8366_v24 = vadd.f32 %v4725_v33, %v8318_v3 }
0x131a   :  { %v4738_v9 = vpack.c.bf16 %v8369_v39, %v8366_v24 }
0x131c   :  { %5741 = vmatmul.msk.bf16.gmra.mxu0 %vm93_vm0, %v4738_v9 }
0x1339   :  { %v4781_v20 = vpop.f32.mrf.mxu0 }
0x133a   :  { %v4782_v56 = vadd.f32 %v4781_v20, %v4743_v37 }
0x133c   :  { %v4801_v45 = vmax.f32 %v4782_v56, 0.0 }
0x1341   :  { %v4783_v31 = vpop.f32.mrf.mxu0 }
0x1342   :  { %v4784_v8 = vadd.f32 %v4783_v31, %v4743_v37 }
0x1344   :  { %v4802_v30 = vmax.f32 %v4784_v8, 0.0 }
0x1346   :  { %v4809_v3 = vpack.c.bf16 %v4802_v30, %v4801_v45 }
0x1348   :  { %5758 = vmatmul.msk.bf16.vlgmr.msra.gmra.mxu1 %vm2335_vm15, %v4809_v3 }
0x1356   :  { %v4786_v62 = vpop.f32.mrf.mxu0 }
0x1357   :  { %v4787_v19 = vadd.f32 %v4786_v62, %v4743_v37 }
0x1359   :  { %v4803_v43 = vmax.f32 %v4787_v19, 0.0 }
0x135e   :  { %v4788_v10 = vpop.f32.mrf.mxu0 }
0x135f   :  { %v4789_v12 = vadd.f32 %v4788_v10, %v4743_v37 }
0x1361   :  { %v4804_v59 = vmax.f32 %v4789_v12, 0.0 }
0x1363   :  { %v4810_v61 = vpack.c.bf16 %v4804_v59, %v4803_v43 }
0x1365   :  { %5759 = vmatmul.msk.bf16.gmra.mxu1 %vm2335_vm15, %v4810_v61 }
0x1366   :  { %v4791_v15 = vpop.f32.mrf.mxu0 }
0x1367   :  { %v4792_v0 = vadd.f32 %v4791_v15, %v4743_v37 }
0x1369   :  { %v4805_v17 = vmax.f32 %v4792_v0, 0.0 }
0x136e   :  { %v4793_v13 = vpop.f32.mrf.mxu0 }
0x136f   :  { %v4794_v16 = vadd.f32 %v4793_v13, %v4743_v37 }
0x1371   :  { %v4806_v47 = vmax.f32 %v4794_v16, 0.0 }
0x1373   :  { %v4811_v4 = vpack.c.bf16 %v4806_v47, %v4805_v17 }
0x1375   :  { %5760 = vmatmul.msk.bf16.gmra.mxu1 %vm2335_vm15, %v4811_v4 }
0x1399   :  { %v4796_v55 = vpop.f32.mrf.mxu0 }
0x139a   :  { %v4797_v2 = vadd.f32 %v4796_v55, %v4743_v37 }
0x139c   :  { %v4807_v42 = vmax.f32 %v4797_v2, 0.0 }
0x13a1   :  { %v4798_v58 = vpop.f32.mrf.mxu0 }
0x13a2   :  { %v4799_v50 = vadd.f32 %v4798_v58, %v4743_v37 }
0x13a4   :  { %v4808_v11 = vmax.f32 %v4799_v50, 0.0 }
0x13a6   :  { %v4812_v28 = vpack.c.bf16 %v4808_v11, %v4807_v42 }
0x13a8   :  { %5761 = vmatmul.msk.bf16.gmra.mxu1 %vm2335_vm15, %v4812_v28 }
0x13c5   :  { %v4875_v63 = vpop.f32.mrf.mxu1 }
0x13c6   :  { %v4876_v40 = vadd.f32 %v4875_v63, %v4821_v34 }
0x13c8   :  { %v4895_v44 = vadd.f32 %v4876_v40, %v8324_v41 }
0x13ca   :  { %v4905_v1 = vsel %vm93_vm0, %v4895_v44, 0.0 }
0x13cb   :  { %4906 = vadd.xlane.f32.xlu1 %v4905_v1 }
0x13cd   :  { %v4877_v49 = vpop.f32.mrf.mxu1 }
0x13ce   :  { %v4878_v14 = vadd.f32 %v4877_v49, %v4821_v34 }
0x13d0   :  { %v4896_v29 = vadd.f32 %v4878_v14, %v8321_v6 }
0x13d2   :  { %v4908_v23 = vsel %vm93_vm0, %v4896_v29, 0.0 }
0x13d3   :  { %4909 = vadd.xlane.f32.xlu2 %v4908_v23 }
0x13e2   :  { %v4880_v21 = vpop.f32.mrf.mxu1 }
0x13e3   :  { %v4881_v57 = vadd.f32 %v4880_v21, %v4821_v34 }
0x13e5   :  { %v4897_v18 = vadd.f32 %v4881_v57, %v8338_v27 }
0x13e7   :  { %v4911_v35 = vsel %vm93_vm0, %v4897_v18, 0.0 }
0x13e8   :  { %4912 = vadd.xlane.f32.xlu0 %v4911_v35 }
0x13ea   :  { %v4882_v52 = vpop.f32.mrf.mxu1 }
0x13eb   :  { %v4883_v38 = vadd.f32 %v4882_v52, %v4821_v34 }
0x13ed   :  { %v4898_v41 = vadd.f32 %v4883_v38, %v8341_v60 }
0x13ef   :  { %v4914_v53 = vsel %vm93_vm0, %v4898_v41, 0.0 }
0x13f0   :  { %4915 = vadd.xlane.f32.xlu0 %v4914_v53 }
0x13f2   :  { %v4885_v5 = vpop.f32.mrf.mxu1 }
0x13f3   :  { %v4886_v7 = vadd.f32 %v4885_v5, %v4821_v34 }
0x13f5   :  { %v4899_v6 = vadd.f32 %v4886_v7, %v8351_v22 }
0x13f7   :  { %v4917_v46 = vsel %vm93_vm0, %v4899_v6, 0.0 }
0x13f8   :  { %4918 = vadd.xlane.f32.xlu0 %v4917_v46 }
0x13fa   :  { %v4887_v51 = vpop.f32.mrf.mxu1 }
0x13fb   :  { %v4888_v48 = vadd.f32 %v4887_v51, %v4821_v34 }
0x13fd   :  { %v4900_v27 = vadd.f32 %v4888_v48, %v8354_v36 }
0x13ff   :  { %v4920_v33 = vsel %vm93_vm0, %v4900_v27, 0.0 }
0x1400   :  { %4921 = vadd.xlane.f32.xlu0 %v4920_v33 }
0x1425   :  { %v4890_v9 = vpop.f32.mrf.mxu1 }
0x1426   :  { %v4891_v26 = vadd.f32 %v4890_v9, %v4821_v34  ;;  %v8444_v9 = vld [vmem:[#allocation5 + $0x16] ss:$0 sm:$0xff] }
0x1428   :  { %v4901_v60 = vadd.f32 %v4891_v26, %v8366_v24 }
0x142a   :  { %v4923_v54 = vsel %vm93_vm0, %v4901_v60, 0.0 }
0x142b   :  { %4924 = vadd.xlane.f32.xlu1 %v4923_v54 }
0x142d   :  { %v4892_v32 = vpop.f32.mrf.mxu1 }
0x142e   :  { %v4893_v20 = vadd.f32 %v4892_v32, %v4821_v34  ;;  %v8447_v32 = vld [vmem:[#allocation5 + $0x17] ss:$0 sm:$0xff] }
0x1430   :  { %v4902_v22 = vadd.f32 %v4893_v20, %v8369_v39 }
0x1432   :  { %v4926_v37 = vsel %vm93_vm0, %v4902_v22, 0.0 }
0x1433   :  { %4927 = vadd.xlane.f32.xlu0 %v4926_v37 }
0x143e   :  { %v4907_v56 = vpop.xlane.xlu1 %4906 }
0x143f   :  { %v4929_v36 = vmul.f32 %v4907_v56, %v7193_v25 }
0x1441   :  { %v8395_v31 = vsub.f32 %v4895_v44, %v4929_v36 }
0x1443   :  { %v4945_v8 = vmul.f32 %v8395_v31, %v8395_v31 }
0x1445   :  { %v4953_v24 = vsel %vm93_vm0, %v4945_v8, 0.0 }
0x1446   :  { %v4910_v45 = vpop.xlane.xlu2 %4909  ;;  %4954 = vadd.xlane.f32.xlu2 %v4953_v24 }
0x1447   :  { %v4930_v30 = vmul.f32 %v4910_v45, %v7193_v25 }
0x1449   :  { %v8401_v3 = vsub.f32 %v4896_v29, %v4930_v30 }
0x144b   :  { %v4946_v39 = vmul.f32 %v8401_v3, %v8401_v3 }
0x144d   :  { %v4956_v62 = vsel %vm93_vm0, %v4946_v39, 0.0 }
0x144e   :  { %4957 = vadd.xlane.f32.xlu1 %v4956_v62 }
0x145b   :  { %v4913_v19 = vpop.xlane.xlu0 %4912 }
0x145c   :  { %v4931_v10 = vmul.f32 %v4913_v19, %v7193_v25 }
0x145e   :  { %v8407_v12 = vsub.f32 %v4897_v18, %v4931_v10 }
0x1460   :  { %v4947_v43 = vmul.f32 %v8407_v12, %v8407_v12 }
0x1462   :  { %v4959_v59 = vsel %vm93_vm0, %v4947_v43, 0.0 }
0x1463   :  { %4960 = vadd.xlane.f32.xlu0 %v4959_v59  ;;  %v4916_v61 = vpop.xlane.xlu0 %4915 }
0x1464   :  { %v4932_v15 = vmul.f32 %v4916_v61, %v7193_v25 }
0x1466   :  { %v8413_v0 = vsub.f32 %v4898_v41, %v4932_v15 }
0x1468   :  { %v4948_v13 = vmul.f32 %v8413_v0, %v8413_v0 }
0x146a   :  { %v4962_v16 = vsel %vm93_vm0, %v4948_v13, 0.0 }
0x146b   :  { %v4919_v17 = vpop.xlane.xlu0 %4918  ;;  %4963 = vadd.xlane.f32.xlu2 %v4962_v16 }
0x146c   :  { %v4933_v47 = vmul.f32 %v4919_v17, %v7193_v25 }
0x146e   :  { %v8419_v4 = vsub.f32 %v4899_v6, %v4933_v47 }
0x1470   :  { %v4949_v55 = vmul.f32 %v8419_v4, %v8419_v4 }
0x1472   :  { %v4965_v2 = vsel %vm93_vm0, %v4949_v55, 0.0 }
0x1473   :  { %v4922_v58 = vpop.xlane.xlu0 %4921  ;;  %4966 = vadd.xlane.f32.xlu1 %v4965_v2 }
0x1474   :  { %v4934_v50 = vmul.f32 %v4922_v58, %v7193_v25 }
0x1476   :  { %v8425_v42 = vsub.f32 %v4900_v27, %v4934_v50 }
0x1478   :  { %v4950_v11 = vmul.f32 %v8425_v42, %v8425_v42 }
0x147a   :  { %v4968_v28 = vsel %vm93_vm0, %v4950_v11, 0.0 }
0x147b   :  { %4969 = vadd.xlane.f32.xlu0 %v4968_v28 }
0x149e   :  { %v4925_v34 = vpop.xlane.xlu1 %4924 }
0x149f   :  { %v4935_v63 = vmul.f32 %v4925_v34, %v7193_v25 }
0x14a1   :  { %v8431_v40 = vsub.f32 %v4901_v60, %v4935_v63 }
0x14a3   :  { %v4951_v44 = vmul.f32 %v8431_v40, %v8431_v40 }
0x14a5   :  { %v4971_v1 = vsel %vm93_vm0, %v4951_v44, 0.0 }
0x14a6   :  { %v4928_v49 = vpop.xlane.xlu0 %4927  ;;  %4972 = vadd.xlane.f32.xlu2 %v4971_v1 }
0x14a7   :  { %v4936_v14 = vmul.f32 %v4928_v49, %v7193_v25 }
0x14a9   :  { %v8437_v29 = vsub.f32 %v4902_v22, %v4936_v14 }
0x14ab   :  { %v4952_v23 = vmul.f32 %v8437_v29, %v8437_v29 }
0x14ad   :  { %v4974_v21 = vsel %vm93_vm0, %v4952_v23, 0.0 }
0x14ae   :  { %4975 = vadd.xlane.f32.xlu1 %v4974_v21 }
0x14b9   :  { %v4955_v57 = vpop.xlane.xlu2 %4954 }
0x14ba   :  { %v4977_v18 = vmul.f32 %v4955_v57, %v7193_v25 }
0x14bc   :  { %v4985_v35 = vadd.f32 1e-05, %v4977_v18 }
0x14be   :  { %6161 = vrsqrt.f32 %v4985_v35  ;;  %vm4999_vm12 = vweird.f32 %v4985_v35 }
0x14c1   :  { %v4958_v52 = vpop.xlane.xlu1 %4957 }
0x14c2   :  { %v4978_v38 = vmul.f32 %v4958_v52, %v7193_v25 }
0x14c4   :  { %v6162_v41 = vpop.eup %6161  ;;  %v4986_v53 = vadd.f32 1e-05, %v4978_v38 }
0x14c5   :  { %v4994_v5 = vmul.f32 %v6162_v41, %v4985_v35  ;;  %vm5000_vm11 = vweird.f32 %v6162_v41 }
0x14c6   :  { %6163 = vrsqrt.f32 %v4986_v53  ;;  %vm5001_vm13 = vmor %vm4999_vm12, %vm5000_vm11  ;;  %vm5009_vm1 = vweird.f32 %v4986_v53 }
0x14c7   :  { %v4995_v7 = vmul.f32 %v6162_v41, %v4994_v5 }
0x14c9   :  { %v4996_v6 = vmul.f32 0.5, %v4995_v7 }
0x14cb   :  { %v4997_v46 = vsub.f32 1.5, %v4996_v6 }
0x14cc   :  { %v6164_v51 = vpop.eup %6163 }
0x14cd   :  { %v4998_v48 = vmul.f32 %v6162_v41, %v4997_v46  ;;  %v5004_v27 = vmul.f32 %v6164_v51, %v4986_v53  ;;  %vm5010_vm14 = vweird.f32 %v6164_v51 }
0x14ce   :  { %vm5011_vm2 = vmor %vm5009_vm1, %vm5010_vm14 }
0x14cf   :  { %v5005_v33 = vmul.f32 %v6164_v51, %v5004_v27  ;;  %v5002_v26 = vsel %vm5001_vm13, %v6162_v41, %v4998_v48 }
0x14d0   :  { %v5073_v60 = vmul.f32 %v5002_v26, %v8395_v31 }
0x14d1   :  { %v5006_v54 = vmul.f32 0.5, %v5005_v33 }
0x14d2   :  { %v5081_v20 = vmul.f32 %v5073_v60, %v8444_v9 }
0x14d3   :  { %v5007_v22 = vsub.f32 1.5, %v5006_v54 }
0x14d4   :  { %v8451_v37 = vadd.f32 %v5081_v20, %v8447_v32 }
0x14d5   :  { %v5008_v56 = vmul.f32 %v6164_v51, %v5007_v22 }
0x14d6   :  { %v4961_v36 = vpop.xlane.xlu0 %4960  ;;  %v5099_v8 = vsel %vm93_vm0, %v8451_v37, 0.0 }
0x14d7   :  { %v4979_v24 = vmul.f32 %v4961_v36, %v7193_v25  ;;  %5100 = vadd.xlane.f32.xlu0 %v5099_v8  ;;  %v5012_v31 = vsel %vm5011_vm2, %v6164_v51, %v5008_v56 }
0x14d8   :  { %v5074_v45 = vmul.f32 %v5012_v31, %v8401_v3 }
0x14d9   :  { %v4987_v30 = vadd.f32 1e-05, %v4979_v24 }
0x14da   :  { %v5082_v39 = vmul.f32 %v5074_v45, %v8444_v9 }
0x14db   :  { %6165 = vrsqrt.f32 %v4987_v30  ;;  %vm5019_vm4 = vweird.f32 %v4987_v30 }
0x14dc   :  { %v8459_v62 = vadd.f32 %v5082_v39, %v8447_v32 }
0x14de   :  { %v4964_v19 = vpop.xlane.xlu2 %4963  ;;  %v5102_v10 = vsel %vm93_vm0, %v8459_v62, 0.0 }
0x14df   :  { %v4980_v43 = vmul.f32 %v4964_v19, %v7193_v25  ;;  %5103 = vadd.xlane.f32.xlu2 %v5102_v10 }
0x14e1   :  { %v6166_v59 = vpop.eup %6165  ;;  %v4988_v61 = vadd.f32 1e-05, %v4980_v43 }
0x14e2   :  { %v5014_v15 = vmul.f32 %v6166_v59, %v4987_v30  ;;  %vm5020_vm3 = vweird.f32 %v6166_v59 }
0x14e3   :  { %6167 = vrsqrt.f32 %v4988_v61  ;;  %vm5021_vm5 = vmor %vm5019_vm4, %vm5020_vm3  ;;  %vm5029_vm7 = vweird.f32 %v4988_v61 }
0x14e4   :  { %v5015_v13 = vmul.f32 %v6166_v59, %v5014_v15 }
0x14e6   :  { %v5016_v3 = vmul.f32 0.5, %v5015_v13  ;;  %v4967_v16 = vpop.xlane.xlu1 %4966 }
0x14e7   :  { %v4981_v17 = vmul.f32 %v4967_v16, %v7193_v25 }
0x14e8   :  { %v5017_v47 = vsub.f32 1.5, %v5016_v3 }
0x14e9   :  { %v6168_v55 = vpop.eup %6167  ;;  %v4989_v2 = vadd.f32 1e-05, %v4981_v17 }
0x14ea   :  { %v5018_v58 = vmul.f32 %v6166_v59, %v5017_v47  ;;  %v5024_v50 = vmul.f32 %v6168_v55, %v4988_v61  ;;  %vm5030_vm6 = vweird.f32 %v6168_v55 }
0x14eb   :  { %6169 = vrsqrt.f32 %v4989_v2  ;;  %vm5031_vm8 = vmor %vm5029_vm7, %vm5030_vm6  ;;  %vm5039_vm10 = vweird.f32 %v4989_v2 }
0x14ec   :  { %v5025_v11 = vmul.f32 %v6168_v55, %v5024_v50  ;;  %v5022_v28 = vsel %vm5021_vm5, %v6166_v59, %v5018_v58 }
0x14ed   :  { %v5075_v34 = vmul.f32 %v5022_v28, %v8407_v12 }
0x14ee   :  { %v5026_v63 = vmul.f32 0.5, %v5025_v11  ;;  %v4970_v44 = vpop.xlane.xlu0 %4969 }
0x14ef   :  { %v4982_v1 = vmul.f32 %v4970_v44, %v7193_v25  ;;  %v5083_v49 = vmul.f32 %v5075_v34, %v8444_v9 }
0x14f0   :  { %v5027_v14 = vsub.f32 1.5, %v5026_v63 }
0x14f1   :  { %v6170_v23 = vpop.eup %6169  ;;  %v4990_v21 = vadd.f32 1e-05, %v4982_v1  ;;  %v8469_v57 = vadd.f32 %v5083_v49, %v8447_v32 }
0x14f2   :  { %v5028_v18 = vmul.f32 %v6168_v55, %v5027_v14  ;;  %v5034_v35 = vmul.f32 %v6170_v23, %v4989_v2  ;;  %vm5040_vm9 = vweird.f32 %v6170_v23 }
0x14f3   :  { %6171 = vrsqrt.f32 %v4990_v21  ;;  %v5105_v12 = vsel %vm93_vm0, %v8469_v57, 0.0  ;;  %vm5041_vm11 = vmor %vm5039_vm10, %vm5040_vm9  ;;  %vm5049_vm13 = vweird.f32 %v4990_v21 }
0x14f4   :  { %v5035_v52 = vmul.f32 %v6170_v23, %v5034_v35  ;;  %5106 = vadd.xlane.f32.xlu1 %v5105_v12  ;;  %v5032_v38 = vsel %vm5031_vm8, %v6168_v55, %v5028_v18 }
0x14f5   :  { %v5076_v41 = vmul.f32 %v5032_v38, %v8413_v0 }
0x14f6   :  { %v5036_v53 = vmul.f32 0.5, %v5035_v52 }
0x14f7   :  { %v5084_v5 = vmul.f32 %v5076_v41, %v8444_v9 }
0x14f8   :  { %v5037_v7 = vsub.f32 1.5, %v5036_v53 }
0x14f9   :  { %v6172_v6 = vpop.eup %6171  ;;  %v8476_v46 = vadd.f32 %v5084_v5, %v8447_v32 }
0x14fa   :  { %v5038_v51 = vmul.f32 %v6170_v23, %v5037_v7  ;;  %v5044_v48 = vmul.f32 %v6172_v6, %v4990_v21  ;;  %vm5050_vm12 = vweird.f32 %v6172_v6 }
0x14fb   :  { %v5108_v27 = vsel %vm93_vm0, %v8476_v46, 0.0  ;;  %vm5051_vm14 = vmor %vm5049_vm13, %vm5050_vm12 }
0x14fc   :  { %v5045_v33 = vmul.f32 %v6172_v6, %v5044_v48  ;;  %5109 = vadd.xlane.f32.xlu0 %v5108_v27  ;;  %v5042_v26 = vsel %vm5041_vm11, %v6170_v23, %v5038_v51 }
0x14fd   :  { %v5077_v0 = vmul.f32 %v5042_v26, %v8419_v4 }
0x14fe   :  { %v5046_v60 = vmul.f32 0.5, %v5045_v33 }
0x14ff   :  { %v5085_v54 = vmul.f32 %v5077_v0, %v8444_v9 }
0x1500   :  { %v5047_v20 = vsub.f32 1.5, %v5046_v60 }
0x1501   :  { %v8483_v22 = vadd.f32 %v5085_v54, %v8447_v32 }
0x1502   :  { %v5048_v56 = vmul.f32 %v6172_v6, %v5047_v20 }
0x1503   :  { %v5111_v36 = vsel %vm93_vm0, %v8483_v22, 0.0 }
0x1504   :  { %5112 = vadd.xlane.f32.xlu2 %v5111_v36  ;;  %v5052_v8 = vsel %vm5051_vm14, %v6172_v6, %v5048_v56 }
0x1505   :  { %v5078_v24 = vmul.f32 %v5052_v8, %v8425_v42 }
0x1507   :  { %v5086_v4 = vmul.f32 %v5078_v24, %v8444_v9 }
0x1509   :  { %v8490_v31 = vadd.f32 %v5086_v4, %v8447_v32 }
0x150b   :  { %v5114_v45 = vsel %vm93_vm0, %v8490_v31, 0.0 }
0x150c   :  { %5115 = vadd.xlane.f32.xlu1 %v5114_v45 }
0x1519   :  { %v4973_v30 = vpop.xlane.xlu2 %4972 }
0x151a   :  { %v4983_v39 = vmul.f32 %v4973_v30, %v7193_v25 }
0x151c   :  { %v4991_v19 = vadd.f32 1e-05, %v4983_v39 }
0x151e   :  { %6173 = vrsqrt.f32 %v4991_v19  ;;  %vm5059_vm2 = vweird.f32 %v4991_v19 }
0x1521   :  { %v4976_v10 = vpop.xlane.xlu1 %4975 }
0x1522   :  { %v4984_v43 = vmul.f32 %v4976_v10, %v7193_v25 }
0x1524   :  { %v6174_v59 = vpop.eup %6173  ;;  %v4992_v61 = vadd.f32 1e-05, %v4984_v43 }
0x1525   :  { %v5054_v42 = vmul.f32 %v6174_v59, %v4991_v19  ;;  %vm5060_vm1 = vweird.f32 %v6174_v59 }
0x1526   :  { %6175 = vrsqrt.f32 %v4992_v61  ;;  %vm5061_vm3 = vmor %vm5059_vm2, %vm5060_vm1  ;;  %vm5069_vm5 = vweird.f32 %v4992_v61 }
0x1527   :  { %v5055_v15 = vmul.f32 %v6174_v59, %v5054_v42 }
0x1529   :  { %v5056_v13 = vmul.f32 0.5, %v5055_v15 }
0x152b   :  { %v5057_v3 = vsub.f32 1.5, %v5056_v13 }
0x152c   :  { %v6176_v16 = vpop.eup %6175 }
0x152d   :  { %v5058_v17 = vmul.f32 %v6174_v59, %v5057_v3  ;;  %v5064_v47 = vmul.f32 %v6176_v16, %v4992_v61  ;;  %vm5070_vm4 = vweird.f32 %v6176_v16 }
0x152e   :  { %vm5071_vm6 = vmor %vm5069_vm5, %vm5070_vm4 }
0x152f   :  { %v5065_v55 = vmul.f32 %v6176_v16, %v5064_v47  ;;  %v5062_v2 = vsel %vm5061_vm3, %v6174_v59, %v5058_v17 }
0x1530   :  { %v5079_v58 = vmul.f32 %v5062_v2, %v8431_v40 }
0x1531   :  { %v5066_v50 = vmul.f32 0.5, %v5065_v55 }
0x1532   :  { %v5087_v11 = vmul.f32 %v5079_v58, %v8444_v9 }
0x1533   :  { %v5067_v28 = vsub.f32 1.5, %v5066_v50 }
0x1534   :  { %v5095_v34 = vadd.f32 %v5087_v11, %v8447_v32 }
0x1535   :  { %v5068_v63 = vmul.f32 %v6176_v16, %v5067_v28 }
0x1536   :  { %v5117_v44 = vsel %vm93_vm0, %v5095_v34, 0.0 }
0x1537   :  { %5118 = vadd.xlane.f32.xlu0 %v5117_v44  ;;  %v5072_v1 = vsel %vm5071_vm6, %v6176_v16, %v5068_v63 }
0x1538   :  { %v5080_v49 = vmul.f32 %v5072_v1, %v8437_v29 }
0x153a   :  { %v5088_v14 = vmul.f32 %v5080_v49, %v8444_v9 }
0x153c   :  { %v5096_v40 = vadd.f32 %v5088_v14, %v8447_v32 }
0x153e   :  { %v5120_v23 = vsel %vm93_vm0, %v5096_v40, 0.0 }
0x153f   :  { %5121 = vadd.xlane.f32.xlu2 %v5120_v23 }
0x154a   :  { %v5101_v21 = vpop.xlane.xlu0 %5100 }
0x154b   :  { %v5123_v18 = vmul.f32 %v5101_v21, %v7193_v25 }
0x154d   :  { %v8506_v35 = vsub.f32 %v8451_v37, %v5123_v18 }
0x154f   :  { %v5139_v12 = vmul.f32 %v8506_v35, %v8506_v35 }
0x1551   :  { %v5147_v52 = vsel %vm93_vm0, %v5139_v12, 0.0 }
0x1552   :  { %5148 = vadd.xlane.f32.xlu1 %v5147_v52  ;;  %v5104_v29 = vpop.xlane.xlu2 %5103 }
0x1553   :  { %v5124_v9 = vmul.f32 %v5104_v29, %v7193_v25 }
0x1555   :  { %v8513_v32 = vsub.f32 %v8459_v62, %v5124_v9 }
0x1557   :  { %v5140_v38 = vmul.f32 %v8513_v32, %v8513_v32 }
0x1559   :  { %v5150_v41 = vsel %vm93_vm0, %v5140_v38, 0.0 }
0x155a   :  { %5151 = vadd.xlane.f32.xlu0 %v5150_v41 }
0x1567   :  { %v5107_v37 = vpop.xlane.xlu1 %5106 }
0x1568   :  { %v5125_v53 = vmul.f32 %v5107_v37, %v7193_v25 }
0x156a   :  { %v8520_v5 = vsub.f32 %v8469_v57, %v5125_v53 }
0x156c   :  { %v5141_v7 = vmul.f32 %v8520_v5, %v8520_v5 }
0x156e   :  { %v5153_v6 = vsel %vm93_vm0, %v5141_v7, 0.0 }
0x156f   :  { %v5110_v51 = vpop.xlane.xlu0 %5109  ;;  %5154 = vadd.xlane.f32.xlu2 %v5153_v6 }
0x1570   :  { %v5126_v62 = vmul.f32 %v5110_v51, %v7193_v25 }
0x1572   :  { %v8527_v48 = vsub.f32 %v8476_v46, %v5126_v62 }
0x1574   :  { %v5142_v27 = vmul.f32 %v8527_v48, %v8527_v48 }
0x1576   :  { %v5156_v33 = vsel %vm93_vm0, %v5142_v27, 0.0 }
0x1577   :  { %5157 = vadd.xlane.f32.xlu1 %v5156_v33  ;;  %v5113_v57 = vpop.xlane.xlu2 %5112 }
0x1578   :  { %v5127_v26 = vmul.f32 %v5113_v57, %v7193_v25 }
0x157a   :  { %v8534_v0 = vsub.f32 %v8483_v22, %v5127_v26 }
0x157c   :  { %v5143_v60 = vmul.f32 %v8534_v0, %v8534_v0 }
0x157e   :  { %v5159_v54 = vsel %vm93_vm0, %v5143_v60, 0.0 }
0x157f   :  { %5160 = vadd.xlane.f32.xlu0 %v5159_v54  ;;  %v5116_v46 = vpop.xlane.xlu1 %5115 }
0x1580   :  { %v5128_v20 = vmul.f32 %v5116_v46, %v7193_v25 }
0x1582   :  { %v8541_v56 = vsub.f32 %v8490_v31, %v5128_v20 }
0x1584   :  { %v5144_v36 = vmul.f32 %v8541_v56, %v8541_v56 }
0x1586   :  { %v5162_v8 = vsel %vm93_vm0, %v5144_v36, 0.0 }
0x1587   :  { %5163 = vadd.xlane.f32.xlu2 %v5162_v8 }
0x15aa   :  { %v5119_v22 = vpop.xlane.xlu0 %5118 }
0x15ab   :  { %v5129_v24 = vmul.f32 %v5119_v22, %v7193_v25 }
0x15ad   :  { %v8547_v4 = vsub.f32 %v5095_v34, %v5129_v24 }
0x15af   :  { %v5145_v45 = vmul.f32 %v8547_v4, %v8547_v4 }
0x15b1   :  { %v5165_v30 = vsel %vm93_vm0, %v5145_v45, 0.0 }
0x15b2   :  { %5166 = vadd.xlane.f32.xlu1 %v5165_v30  ;;  %v5122_v39 = vpop.xlane.xlu2 %5121 }
0x15b3   :  { %v5130_v31 = vmul.f32 %v5122_v39, %v7193_v25  ;;  %v5764_v39 = vld [vmem:[%s8687_s1 + $0x10] sm:$0xf] }
0x15b5   :  { %v8553_v19 = vsub.f32 %v5096_v40, %v5130_v31 }
0x15b7   :  { %v5146_v10 = vmul.f32 %v8553_v19, %v8553_v19 }
0x15b9   :  { %v5168_v43 = vsel %vm93_vm0, %v5146_v10, 0.0 }
0x15ba   :  { %5169 = vadd.xlane.f32.xlu0 %v5168_v43 }
0x15c5   :  { %v5149_v59 = vpop.xlane.xlu1 %5148 }
0x15c6   :  { %v5171_v3 = vmul.f32 %v5149_v59, %v7193_v25 }
0x15c8   :  { %v5179_v50 = vadd.f32 1e-05, %v5171_v3 }
0x15ca   :  { %vm5193_vm11 = vweird.f32 %v5179_v50 }
0x15cd   :  { %v5152_v61 = vpop.xlane.xlu0 %5151 }
0x15ce   :  { %v5172_v15 = vmul.f32 %v5152_v61, %v7193_v25 }
0x15d0   :  { %v5180_v2 = vadd.f32 1e-05, %v5172_v15 }
0x15d2   :  { %6177 = vrsqrt.f32 %v5180_v2  ;;  %vm5203_vm9 = vweird.f32 %v5180_v2 }
0x15d3   :  { %6179 = vrsqrt.f32 %v5179_v50 }
0x15d8   :  { %v6178_v1 = vpop.eup %6177 }
0x15d9   :  { %v6180_v49 = vpop.eup %6179  ;;  %v5198_v23 = vmul.f32 %v6178_v1, %v5180_v2  ;;  %vm5204_vm7 = vweird.f32 %v6178_v1 }
0x15da   :  { %v5188_v12 = vmul.f32 %v6180_v49, %v5179_v50  ;;  %vm5194_vm8 = vweird.f32 %v6180_v49  ;;  %vm8584_vm12 = vmor %vm5203_vm9, %vm5204_vm7 }
0x15db   :  { %v5199_v9 = vmul.f32 %v6178_v1, %v5198_v23  ;;  %vm8590_vm14 = vmor %vm5193_vm11, %vm5194_vm8 }
0x15dc   :  { %v5189_v37 = vmul.f32 %v6180_v49, %v5188_v12 }
0x15dd   :  { %v5200_v6 = vmul.f32 0.5, %v5199_v9 }
0x15de   :  { %v5190_v27 = vmul.f32 0.5, %v5189_v37 }
0x15df   :  { %v5201_v26 = vsub.f32 1.5, %v5200_v6 }
0x15e0   :  { %v5191_v46 = vsub.f32 1.5, %v5190_v27  ;;  %v5768_v27 = vld [vmem:[%s8687_s1 + $0x38] sm:$0xf] }
0x15e1   :  { %v5202_v8 = vmul.f32 %v6178_v1, %v5201_v26 }
0x15e2   :  { %v5155_v42 = vpop.xlane.xlu2 %5154  ;;  %v5192_v45 = vmul.f32 %v6180_v49, %v5191_v46 }
0x15e3   :  { %v5173_v17 = vmul.f32 %v5155_v42, %v7193_v25  ;;  %v5206_v43 = vsel %vm8584_vm12, %v6178_v1, %v5202_v8 }
0x15e4   :  { %v5196_v15 = vsel %vm8590_vm14, %v6180_v49, %v5192_v45  ;;  %v5268_v3 = vmul.f32 %v5206_v43, %v8513_v32  ;;  %v8625_v49 = vld [vmem:[#allocation5 + $0x21] ss:$0 sm:$0xff] }
0x15e5   :  { %v5181_v28 = vadd.f32 1e-05, %v5173_v17  ;;  %v5267_v2 = vmul.f32 %v5196_v15, %v8506_v35 }
0x15e7   :  { %6181 = vrsqrt.f32 %v5181_v28  ;;  %vm5213_vm1 = vweird.f32 %v5181_v28 }
0x15ea   :  { %v5158_v13 = vpop.xlane.xlu1 %5157 }
0x15eb   :  { %v5174_v55 = vmul.f32 %v5158_v13, %v7193_v25 }
0x15ed   :  { %v5182_v34 = vadd.f32 1e-05, %v5174_v55  ;;  %v6182_v14 = vpop.eup %6181 }
0x15ee   :  { %v5208_v52 = vmul.f32 %v6182_v14, %v5181_v28  ;;  %vm5214_vm10 = vweird.f32 %v6182_v14 }
0x15ef   :  { %6183 = vrsqrt.f32 %v5182_v34  ;;  %vm8598_vm3 = vmor %vm5213_vm1, %vm5214_vm10  ;;  %vm5223_vm4 = vweird.f32 %v5182_v34 }
0x15f0   :  { %v5209_v53 = vmul.f32 %v6182_v14, %v5208_v52 }
0x15f2   :  { %v5161_v16 = vpop.xlane.xlu0 %5160  ;;  %v5210_v33 = vmul.f32 0.5, %v5209_v53 }
0x15f3   :  { %v5175_v58 = vmul.f32 %v5161_v16, %v7193_v25 }
0x15f4   :  { %v5211_v20 = vsub.f32 1.5, %v5210_v33  ;;  %v5825_v33 = vld [vmem:[%s8687_s1 + $0x48] sm:$0xf0] }
0x15f5   :  { %v8564_v63 = vadd.f32 1e-05, %v5175_v58  ;;  %v8570_v40 = vpop.eup %6183 }
0x15f6   :  { %v5218_v29 = vmul.f32 %v8570_v40, %v5182_v34  ;;  %v5212_v30 = vmul.f32 %v6182_v14, %v5211_v20  ;;  %vm5224_vm13 = vweird.f32 %v8570_v40 }
0x15f7   :  { %6185 = vrsqrt.f32 %v8564_v63  ;;  %vm5225_vm6 = vmor %vm5223_vm4, %vm5224_vm13  ;;  %vm5233_vm7 = vweird.f32 %v8564_v63  ;;  %vm5378_vm4 = vcmask 1042434  }
0x15f8   :  { %v5219_v7 = vmul.f32 %v8570_v40, %v5218_v29  ;;  %v5216_v13 = vsel %vm8598_vm3, %v6182_v14, %v5212_v30  ;;  %vm5376_vm3 = vcmask 1041409  }
0x15f9   :  { %v5269_v58 = vmul.f32 %v5216_v13, %v8520_v5  ;;  %v5832_v13 = vld [vmem:[#allocation2 + $0x34] sm:$0xf] }
0x15fa   :  { %v5164_v47 = vpop.xlane.xlu2 %5163  ;;  %v5220_v57 = vmul.f32 0.5, %v5219_v7 }
0x15fb   :  { %v5176_v11 = vmul.f32 %v5164_v47, %v7193_v25 }
0x15fc   :  { %v5221_v36 = vsub.f32 1.5, %v5220_v57 }
0x15fd   :  { %v8566_v44 = vadd.f32 1e-05, %v5176_v11  ;;  %v8572_v21 = vpop.eup %6185  ;;  %v8617_v11 = vld [vmem:[#allocation5 + $0x20] ss:$0 sm:$0xff] }
0x15fe   :  { %v5228_v38 = vmul.f32 %v8572_v21, %v8564_v63  ;;  %v5222_v31 = vmul.f32 %v8570_v40, %v5221_v36  ;;  %vm5234_vm2 = vweird.f32 %v8572_v21  ;;  %v5276_v34 = vmul.f32 %v5268_v3, %v8617_v11  ;;  %v5799_v3 = vld [vmem:[#allocation2 + $0x38] sm:$0xf0] }
0x15ff   :  { %6187 = vrsqrt.f32 %v8566_v44  ;;  %vm5235_vm8 = vmor %vm5233_vm7, %vm5234_vm2  ;;  %vm5243_vm9 = vweird.f32 %v8566_v44  ;;  %v5275_v1 = vmul.f32 %v5267_v2, %v8617_v11  ;;  %v5277_v35 = vmul.f32 %v5269_v58, %v8617_v11 }
0x1600   :  { %v5229_v51 = vmul.f32 %v8572_v21, %v5228_v38  ;;  %v5226_v16 = vsel %vm5225_vm6, %v8570_v40, %v5222_v31  ;;  %v5284_v14 = vadd.f32 %v5276_v34, %v8625_v49  ;;  %v5824_v31 = vld [vmem:[%s8687_s1 + $0x20] sm:$0xf0]  ;;  %v5789_v34 = vld [vmem:[#allocation2 + $0x20] sm:$0xf]  ;;  %vm5382_vm6 = vcmask 1044484   ;;  %s6296_s1 = smov [#allocation7]  }
0x1601   :  { %v5270_v32 = vmul.f32 %v5226_v16, %v8527_v48  ;;  %vm5384_vm7 = vcmask 1045509  }
0x1602   :  { %v5230_v60 = vmul.f32 0.5, %v5229_v51  ;;  %v5298_v29 = vsel %vm93_vm0, %v5284_v14, -inf }
0x1603   :  { %v5278_v5 = vmul.f32 %v5270_v32, %v8617_v11  ;;  %v5299_v7 = vrot.slane %v5298_v29, 4 }
0x1604   :  { %v5231_v22 = vsub.f32 1.5, %v5230_v60 }
0x1605   :  { %v8574_v18 = vpop.eup %6187  ;;  %v5286_v12 = vadd.f32 %v5278_v5, %v8625_v49  ;;  %v5300_v8 = vmax.f32 %v5298_v29, %v5299_v7  ;;  %v5828_v5 = vld [vmem:[#allocation2 + $0x14] sm:$0xf]  ;;  %v5781_v29 = vld [vmem:[#allocation2 + $0x10] sm:$0xf] }
0x1606   :  { %v5238_v41 = vmul.f32 %v8574_v18, %v8566_v44  ;;  %v5232_v59 = vmul.f32 %v8572_v21, %v5231_v22  ;;  %vm5244_vm5 = vweird.f32 %v8574_v18 }
0x1607   :  { %vm5245_vm10 = vmor %vm5243_vm9, %vm5244_vm5  ;;  %v5312_v6 = vsel %vm93_vm0, %v5286_v12, -inf  ;;  %vm5380_vm5 = vcmask 1043459   ;;  %vm5388_vm9 = vcmask 1047559  }
0x1608   :  { %v5239_v62 = vmul.f32 %v8574_v18, %v5238_v41  ;;  %v5236_v47 = vsel %vm5235_vm8, %v8572_v21, %v5232_v59  ;;  %v5285_v21 = vadd.f32 %v5277_v35, %v8625_v49  ;;  %v5313_v46 = vrot.slane %v5312_v6, 4 }
0x1609   :  { %v5271_v63 = vmul.f32 %v5236_v47, %v8534_v0  ;;  %v5765_v59 = vor.u32 %v5824_v31, %v5764_v39  ;;  %v5802_v47 = vor.u32 %v5832_v13, %v5799_v3  ;;  %vm5386_vm8 = vcmask 1046534  }
0x160a   :  { %v5240_v54 = vmul.f32 0.5, %v5239_v62  ;;  %v5305_v37 = vsel %vm93_vm0, %v5285_v21, -inf  ;;  %v5314_v61 = vmax.f32 %v5312_v6, %v5313_v46  ;;  %v5833_v21 = vld [vmem:[#allocation2 + $0x34] sm:$0xf0] }
0x160b   :  { %v5279_v48 = vmul.f32 %v5271_v63, %v8617_v11  ;;  %v5306_v26 = vrot.slane %v5305_v37, 4  ;;  %v5831_v63 = vld [vmem:[#allocation2 + $0x24] sm:$0xf0]  ;;  %5476 = vrot.lane.b32.xlu1 %v5802_v47, %s6290_s9 }
0x160c   :  { %v5241_v24 = vsub.f32 1.5, %v5240_v54  ;;  %v5769_v54 = vor.u32 %v5825_v33, %v5768_v27  ;;  %v5790_v35 = vor.u32 %v5831_v63, %v5789_v34  ;;  %v5827_v47 = vld [vmem:[#allocation2 + $0x4] sm:$0xf0] }
0x160d   :  { %v5287_v9 = vadd.f32 %v5279_v48, %v8625_v49  ;;  %v5307_v43 = vmax.f32 %v5305_v37, %v5306_v26  ;;  %v5783_v48 = vld [vmem:[#allocation2 + $0x18] sm:$0xf0]  ;;  %v5791_v26 = vld [vmem:[#allocation2 + $0x28] sm:$0xf0] }
0x160e   :  { %v5242_v42 = vmul.f32 %v8574_v18, %v5241_v24  ;;  %5412 = vmatpush.bf16.msra.mxu2 %v5769_v54  ;;  %5470 = vrot.lane.b32.xlu0 %v5790_v35, %s6290_s9 }
0x160f   :  { %v5319_v51 = vsel %vm93_vm0, %v5287_v9, -inf  ;;  %v5308_v32 = vrot.slane %v5307_v43, 2  ;;  %v5829_v9 = vld [vmem:[#allocation2 + $0x14] sm:$0xf0] }
0x1610   :  { %v5246_v50 = vsel %vm5245_vm10, %v8574_v18, %v5242_v42  ;;  %v5320_v22 = vrot.slane %v5319_v51, 4  ;;  %v5782_v33 = vor.u32 %v5829_v9, %v5781_v29 }
0x1611   :  { %v5272_v44 = vmul.f32 %v5246_v50, %v8541_v56  ;;  %v5283_v56 = vadd.f32 %v5275_v1, %v8625_v49 }
0x1612   :  { %v5321_v16 = vmax.f32 %v5319_v51, %v5320_v22  ;;  %5413 = vmatpush.bf16.msra.mxu2 %v5765_v59 }
0x1613   :  { %v5280_v23 = vmul.f32 %v5272_v44, %v8617_v11  ;;  %v5315_v44 = vrot.slane %v5314_v61, 2 }
0x1614   :  { %v5322_v14 = vrot.slane %v5321_v16, 2 }
0x1615   :  { %v5288_v41 = vadd.f32 %v5280_v23, %v8625_v49  ;;  %v5316_v37 = vmax.f32 %v5314_v61, %v5315_v44 }
0x1616   :  { %v5323_v6 = vmax.f32 %v5321_v16, %v5322_v14  ;;  %5466 = vrot.lane.b32.xlu0 %v5782_v33, %s6290_s9 }
0x1617   :  { %v5326_v60 = vsel %vm93_vm0, %v5288_v41, -inf }
0x1618   :  { %v5327_v24 = vrot.slane %v5326_v60, 4 }
0x161a   :  { %v5328_v2 = vmax.f32 %v5326_v60, %v5327_v24 }
0x161c   :  { %v5329_v23 = vrot.slane %v5328_v2, 2 }
0x1625   :  { %v5167_v17 = vpop.xlane.xlu1 %5166 }
0x1626   :  { %v5177_v55 = vmul.f32 %v5167_v17, %v7193_v25 }
0x1628   :  { %v5185_v28 = vadd.f32 1e-05, %v5177_v55  ;;  %v5301_v55 = vrot.slane %v5300_v8, 2 }
0x162a   :  { %6189 = vrsqrt.f32 %v5185_v28  ;;  %vm5253_vm12 = vweird.f32 %v5185_v28 }
0x162d   :  { %v5170_v40 = vpop.xlane.xlu0 %5169 }
0x162e   :  { %v5178_v0 = vmul.f32 %v5170_v40, %v7193_v25  ;;  %v5291_v25 = vsel %vm93_vm0, %v5283_v56, -inf  ;;  %v5302_v40 = vmax.f32 %v5300_v8, %v5301_v55  ;;  %v5797_v56 = vld [vmem:[#allocation2 + $0x30] sm:$0xf] }
0x162f   :  { %v5292_v57 = vrot.slane %v5291_v25, 4  ;;  %v5798_v41 = vor.u32 %v5833_v21, %v5797_v56 }
0x1630   :  { %v6190_v18 = vpop.eup %6189  ;;  %v8635_v52 = vadd.f32 1e-05, %v5178_v0  ;;  %v5303_v51 = vrot.slane %v5302_v40, 1 }
0x1631   :  { %v5248_v38 = vmul.f32 %v6190_v18, %v5185_v28  ;;  %vm5254_vm11 = vweird.f32 %v6190_v18  ;;  %v5293_v10 = vmax.f32 %v5291_v25, %v5292_v57  ;;  %5474 = vrot.lane.b32.xlu2 %v5798_v41, %s6290_s9  ;;  %v5830_v57 = vld [vmem:[#allocation2 + $0x24] sm:$0xf] }
0x1632   :  { %6191 = vrsqrt.f32 %v8635_v52  ;;  %vm5255_vm13 = vmor %vm5253_vm12, %vm5254_vm11  ;;  %vm5263_vm1 = vweird.f32 %v8635_v52  ;;  %v5304_v24 = vmax.f32 %v5302_v40, %v5303_v51 }
0x1633   :  { %v5249_v53 = vmul.f32 %v6190_v18, %v5248_v38  ;;  %v5294_v50 = vrot.slane %v5293_v10, 2  ;;  %v5786_v38 = vor.u32 %v5828_v5, %v5783_v48 }
0x1634   :  { %v5348_v13 = vpack.c.bf16 %v5304_v24, %v5304_v24 }
0x1635   :  { %v5250_v62 = vmul.f32 0.5, %v5249_v53  ;;  %v5295_v25 = vmax.f32 %v5293_v10, %v5294_v50  ;;  %5468 = vrot.lane.b32.xlu1 %v5786_v38, %s6290_s9  ;;  %v5826_v10 = vld [vmem:[#allocation2 + $0x4] sm:$0xf] }
0x1636   :  { %v5369_v63 = vunpack.c.l.b16 %v5348_v13 }
0x1637   :  { %v5251_v20 = vsub.f32 1.5, %v5250_v62  ;;  %v5330_v62 = vmax.f32 %v5328_v2, %v5329_v23  ;;  %v5296_v46 = vrot.slane %v5295_v25, 1 }
0x1638   :  { %v6192_v36 = vpop.eup %6191 }
0x1639   :  { %v5252_v45 = vmul.f32 %v6190_v18, %v5251_v20  ;;  %v5258_v30 = vmul.f32 %v6192_v36, %v8635_v52  ;;  %vm5264_vm14 = vweird.f32 %v6192_v36  ;;  %v5317_v20 = vrot.slane %v5316_v37, 1 }
0x163a   :  { %vm5265_vm2 = vmor %vm5263_vm1, %vm5264_vm14 }
0x163b   :  { %v5256_v42 = vsel %vm5255_vm13, %v6190_v18, %v5252_v45  ;;  %v5259_v15 = vmul.f32 %v6192_v36, %v5258_v30  ;;  %v5309_v18 = vmax.f32 %v5307_v43, %v5308_v32  ;;  %v5331_v45 = vrot.slane %v5330_v62, 1  ;;  %v5775_v43 = vld [vmem:[#allocation2 + $0x8] sm:$0xf0] }
0x163c   :  { %v5273_v17 = vmul.f32 %v5256_v42, %v8547_v4  ;;  %v5318_v59 = vmax.f32 %v5316_v37, %v5317_v20  ;;  %v5778_v16 = vor.u32 %v5826_v10, %v5775_v43  ;;  %v5359_v20 = vld [vmem:[#allocation5 + $0x22] ss:$0 sm:$0xff] }
0x163d   :  { %v5260_v58 = vmul.f32 0.5, %v5259_v15  ;;  %v5310_v60 = vrot.slane %v5309_v18, 1 }
0x163e   :  { %v5281_v28 = vmul.f32 %v5273_v17, %v8617_v11  ;;  %v5773_v17 = vld [vmem:[#allocation2] sm:$0xf]  ;;  %v5350_v50 = vpack.c.bf16 %v5318_v59, %v5318_v59  ;;  %5464 = vrot.lane.b32.xlu0 %v5778_v16, %s6290_s9 }
0x163f   :  { %v5261_v1 = vsub.f32 1.5, %v5260_v58  ;;  %v5311_v39 = vmax.f32 %v5309_v18, %v5310_v60  ;;  %v5774_v34 = vor.u32 %v5827_v47, %v5773_v17 }
0x1640   :  { %v5289_v4 = vadd.f32 %v5281_v28, %v8625_v49 }
0x1641   :  { %v5262_v0 = vmul.f32 %v6192_v36, %v5261_v1  ;;  %v5349_v55 = vpack.c.bf16 %v5311_v39, %v5311_v39 }
0x1642   :  { %v5333_v12 = vsel %vm93_vm0, %v5289_v4, -inf  ;;  %v5371_v4 = vunpack.c.l.b16 %v5350_v50 }
0x1643   :  { %v5334_v53 = vrot.slane %v5333_v12, 4  ;;  %v5266_v7 = vsel %vm5265_vm2, %v6192_v36, %v5262_v0  ;;  %v5324_v36 = vrot.slane %v5323_v6, 1  ;;  %v5370_v35 = vunpack.c.l.b16 %v5349_v55 }
0x1644   :  { %v5274_v52 = vmul.f32 %v5266_v7, %v8553_v19  ;;  %v5794_v19 = vor.u32 %v5830_v57, %v5791_v26 }
0x1645   :  { %v5335_v27 = vmax.f32 %v5333_v12, %v5334_v53  ;;  %v5325_v15 = vmax.f32 %v5323_v6, %v5324_v36 }
0x1646   :  { %v5282_v54 = vmul.f32 %v5274_v52, %v8617_v11  ;;  %v5297_v11 = vmax.f32 %v5295_v25, %v5296_v46  ;;  %5472 = vrot.lane.b32.xlu2 %v5794_v19, %s6290_s9 }
0x1647   :  { %v5336_v8 = vrot.slane %v5335_v27, 2  ;;  %v5351_v28 = vpack.c.bf16 %v5325_v15, %v5325_v15 }
0x1648   :  { %v5290_v22 = vadd.f32 %v5282_v54, %v8625_v49  ;;  %v5332_v49 = vmax.f32 %v5330_v62, %v5331_v45  ;;  %v5347_v58 = vpack.c.bf16 %v5297_v11, %v5297_v11  ;;  %v5429_v45 = vld [vmem:[#allocation5 + $0x23] ss:$0 sm:$0xff] }
0x1649   :  { %v5337_v30 = vmax.f32 %v5335_v27, %v5336_v8  ;;  %v5372_v40 = vunpack.c.l.b16 %v5351_v28 }
0x164a   :  { %v5340_v31 = vsel %vm93_vm0, %v5290_v22, -inf  ;;  %v5352_v44 = vpack.c.bf16 %v5332_v49, %v5332_v49  ;;  %v5368_v14 = vunpack.c.l.b16 %v5347_v58 }
0x164b   :  { %v5338_v61 = vrot.slane %v5337_v30, 1  ;;  %v5341_v42 = vrot.slane %v5340_v31, 4 }
0x164c   :  { %v5377_v23 = vsel %vm5376_vm3, %v5369_v63, %v5368_v14  ;;  %v5373_v0 = vunpack.c.l.b16 %v5352_v44 }
0x164d   :  { %v5342_v3 = vmax.f32 %v5340_v31, %v5341_v42  ;;  %v5339_v2 = vmax.f32 %v5337_v30, %v5338_v61  ;;  %v5379_v21 = vsel %vm5378_vm4, %v5370_v35, %v5377_v23 }
0x164e   :  { %5462 = vrot.lane.b32.xlu2 %v5774_v34, %s6290_s9  ;;  %v5381_v12 = vsel %vm5380_vm5, %v5371_v4, %v5379_v21  ;;  %s5509_s9 = sshll.u32 %s6296_s1, 4  ;;  %s5510_s9 = int_to_ptr.vmem [resolvable:$true] %s5509_s9 }
0x164f   :  { %v5343_v32 = vrot.slane %v5342_v3, 2  ;;  %v5353_v5 = vpack.c.bf16 %v5339_v2, %v5339_v2  ;;  %v5383_v9 = vsel %vm5382_vm6, %v5372_v40, %v5381_v12 }
0x1650   :  { %v5385_v41 = vsel %vm5384_vm7, %v5373_v0, %v5383_v9 }
0x1651   :  { %v5344_v1 = vmax.f32 %v5342_v3, %v5343_v32  ;;  %v5374_v18 = vunpack.c.l.b16 %v5353_v5 }
0x1653   :  { %v5345_v48 = vrot.slane %v5344_v1, 1  ;;  %v5387_v25 = vsel %vm5386_vm8, %v5374_v18, %v5385_v41 }
0x1655   :  { %v5346_v56 = vmax.f32 %v5344_v1, %v5345_v48 }
0x1657   :  { %v5354_v29 = vpack.c.bf16 %v5346_v56, %v5346_v56 }
0x1659   :  { %v5375_v38 = vunpack.c.l.b16 %v5354_v29 }
0x165b   :  { %v5389_v37 = vsel %vm5388_vm9, %v5375_v38, %v5387_v25 }
0x165c   :  { %v5390_v53 = vpack.c.b16 %v5389_v37, %v5389_v37 }
0x165e   :  { %5770 = vmatmul.msk.bf16.vlgmr.msra.gmra.mxu2 %vm93_vm0, %v5390_v53 }
0x167d   :  { %v5477_v6 = vpop.permute.xlu1 %5476 }
0x1680   :  { %v5471_v62 = vpop.permute.xlu0 %5470 }
0x1688   :  { %v5467_v57 = vpop.permute.xlu0 %5466 }
0x168b   :  { %v5475_v7 = vpop.permute.xlu2 %5474 }
0x168c   :  { %v5482_v52 = vsel %vm2335_vm15, %v5475_v7, %v5477_v6 }
0x168d   :  { %5494 = vmatpush.bf16.msra.mxu3 %v5482_v52 }
0x16a0   :  { %v5473_v51 = vpop.permute.xlu2 %5472 }
0x16a1   :  { %v5481_v27 = vsel %vm2335_vm15, %v5471_v62, %v5473_v51 }
0x16a2   :  { %5495 = vmatpush.bf16.msra.mxu3 %v5481_v27 }
0x16a7   :  { %v5469_v33 = vpop.permute.xlu1 %5468 }
0x16a8   :  { %v5480_v26 = vsel %vm2335_vm15, %v5467_v57, %v5469_v33  ;;  %v5463_v54 = vpop.permute.xlu2 %5462 }
0x16a9   :  { %5496 = vmatpush.bf16.msra.mxu3 %v5480_v26 }
0x16b0   :  { %v5465_v60 = vpop.permute.xlu0 %5464 }
0x16b1   :  { %v5479_v46 = vsel %vm2335_vm15, %v5463_v54, %v5465_v60 }
0x16b2   :  { %5497 = vmatpush.bf16.msra.mxu3 %v5479_v46 }
0x16e1   :  { %v5415_v8 = vpop.f32.mrf.mxu2 }
0x16e2   :  { %v5416_v36 = vadd.f32 %v5415_v8, %v5359_v20 }
0x16e4   :  { %v5419_v22 = vmax.f32 %v5416_v36, 0.0 }
0x16e6   :  { %v5420_v19 = vpack.c.bf16 %v5419_v22, %v5419_v22 }
0x16e8   :  { %5803 = vmatmul.msk.bf16.vlgmr.msra.gmra.mxu3 %vm2335_vm15, %v5420_v19 }
0x16e9   :  { %v5417_v24 = vpop.f32.mrf.mxu2 }
0x176b   :  { %v5499_v30 = vpop.f32.mrf.mxu3 }
0x176c   :  { %v5500_v39 = vadd.f32 %v5499_v30, %v5429_v45 }
0x176e   :  { %5503 = vst [vmem:[#allocation7] sm:$0xff] %v5500_v39 }
0x176f   :  { %5514 = dma.vmem_to_hbm [thread:$0]  %s5510_s9, 128, %s5512_s24, [#allocation4]  }
0x1773   :  { %v5501_v31 = vpop.f32.mrf.mxu3 }
0x1774   :  { %6278 = dma.done.wait [#allocation4], 128  }
0x1775   :  { %6279 = vsyncadd [#allocation4], 4294967168 }
0x1776   :  { %5519 = vsyncpa [#allocation3], 1 }
0x1777   :  { %5520 = vsyncpa [#allocation6], 1 }
0x1778   :  { %5521 = vsyncpa [#allocation4], 1 }

</bundles_post_ra>
